<compile_context>
chip_gen: v5e
topology: v5e:2x2
jax: 0.10.0
libtpu: 0.0.40
codegen_flags: <defaults>
</compile_context>

<pallas_src>
import functools

import jax
import jax.numpy as jnp
from jax import lax
from jax.experimental import pallas as pl
from jax.experimental.pallas import tpu as pltpu

C1 = 64    # conv1 output channels
C2 = 32    # conv2 output channels
NCLS = 3   # fc output features


def _round_up(a, m):
    return (a + m - 1) // m * m


def _pick_bblk(B):
    """Batch lane-block size: multiple of 128, generation-aware cap, and nB >= 2
    whenever the padded batch allows (v7x megacore)."""
    try:
        vmem = pltpu.get_tpu_info().vmem_capacity_bytes
    except Exception:
        vmem = 64 << 20
    cap = 512 if vmem <= (64 << 20) else 1024      # 64 MiB VMEM (v7x) -> smaller blocks
    bpad128 = _round_up(max(B, 1), 128)
    bblk = 128
    for cand in (256, 512, 1024):
        if cand <= cap and bpad128 >= 2 * cand:
            bblk = cand
    return bblk


def ohlcv_tcnn_kernel(xpad_ref, w1_ref, b1_ref, w2g_ref, fcw_ref, fcb_ref, o_ref,
                      *, H, W, Bblk):
    WB = W * Bblk
    Xp = xpad_ref[0]                 # (H+2, (W+2)*Bblk), lane index = w*Bblk + b
    w1 = w1_ref[...]                 # (C1, 9)
    b1 = b1_ref[...]                 # (C1, 1)

    def conv1_row(h):
        # Tap matrix for output row h, assembled from Bblk-aligned lane slices of
        # the zero-padded input rows h..h+2 (in-VMEM im2col, no HBM expansion).
        taps = jnp.concatenate(
            [Xp[h + dh:h + dh + 1, dw * Bblk:dw * Bblk + WB]
             for dh in range(3) for dw in range(3)], axis=0)           # (9, WB)
        y = jnp.dot(w1, taps, preferred_element_type=jnp.float32) + b1
        return jnp.maximum(y, 0.0)                                     # (C1, WB)

    # Stream conv1 + ReLU over H: the fused conv2 + AdaptiveAvgPool stage only
    # needs the column sum S and the first / last relu(conv1) rows.
    row = conv1_row(0)
    first = row
    S = row
    for h in range(1, H):
        row = conv1_row(h)
        S = S + row
    last = row

    # Vertical conv2 taps dh = 0,1,2; conv2 zero-pads rows -1 and H, so the
    # H-pooled operands are S - last, S, S - first respectively.
    U_cat = jnp.concatenate([S - last, S, S - first], axis=0)          # (3*C1, WB)

    # conv2 + mean over H (1/H folded into w2g in glue): one K=3*C1 matmul per
    # horizontal tap dw, combined via +/-Bblk whole lane-block shifts (width pad).
    parts = [jnp.dot(w2g_ref[dw * C2:(dw + 1) * C2, :], U_cat,
                     preferred_element_type=jnp.float32)
             for dw in range(3)]                                       # 3 x (C2, WB)
    pooled = parts[1]
    if W > 1:
        z = jnp.zeros((C2, Bblk), jnp.float32)
        pooled = pooled + jnp.concatenate([z, parts[0][:, :WB - Bblk]], axis=1)
        pooled = pooled + jnp.concatenate([parts[2][:, Bblk:], z], axis=1)
    # (W == 1: the dw=0 / dw=2 taps fall entirely inside the zero padding.)

    # fc: gather the W lane-blocks into the contraction dim -> one matmul.
    P = jnp.concatenate([pooled[:, w * Bblk:(w + 1) * Bblk] for w in range(W)],
                        axis=0)                                        # (C2*W, Bblk)
    o_ref[...] = (jnp.dot(fcw_ref[...], P, preferred_element_type=jnp.float32)
                  + fcb_ref[...])                                      # (NCLS, Bblk)


def ohlcv_tcnn_forward(x, params):
    conv1_w, conv1_b, conv2_w, conv2_b, fc_w, fc_b = params
    B, H, W = x.shape

    Bblk = _pick_bblk(B)
    Bpad = _round_up(B, Bblk)
    nB = Bpad // Bblk

    # ---- glue: zero-pad (batch to Bpad, spatial by 1) and make batch the minor
    # lane axis: (nB, H+2, (W+2)*Bblk) with lane index = w*Bblk + b.
    xb = jnp.pad(x.astype(jnp.float32), ((0, Bpad - B), (1, 1), (1, 1)))
    xpad = (xb.reshape(nB, Bblk, H + 2, W + 2)
              .transpose(0, 2, 3, 1)
              .reshape(nB, H + 2, (W + 2) * Bblk))

    # ---- glue: lane-dense 2-D weights + constant folding.
    w1 = conv1_w.reshape(C1, 9).astype(jnp.float32)                   # [o, dh*3+dw]
    b1 = conv1_b.reshape(C1, 1).astype(jnp.float32)
    # conv2 weights grouped by horizontal tap dw (rows dw*C2+o, cols dh*C1+c),
    # with the 1/H of AdaptiveAvgPool folded in.
    w2g = (conv2_w.astype(jnp.float32).transpose(3, 0, 2, 1)
           .reshape(3 * C2, 3 * C1)) * (1.0 / H)
    # fc weights re-ordered so the contraction index is w*C2 + c; conv2 bias is
    # folded exactly into the fc bias (no nonlinearity between them).
    fc_w32 = fc_w.astype(jnp.float32)
    fcw = fc_w32.reshape(NCLS, C2, W).transpose(0, 2, 1).reshape(NCLS, W * C2)
    fcb = (fc_b.astype(jnp.float32)
           + fc_w32.reshape(NCLS, C2, W).sum(axis=2) @ conv2_b.astype(jnp.float32)
           ).reshape(NCLS, 1)

    kern = functools.partial(ohlcv_tcnn_kernel, H=H, W=W, Bblk=Bblk)
    out = pl.pallas_call(
        kern,
        out_shape=jax.ShapeDtypeStruct((NCLS, Bpad), jnp.float32),
        grid=(nB,),
        in_specs=[
            pl.BlockSpec((1, H + 2, (W + 2) * Bblk), lambda i: (i, 0, 0)),
            pl.BlockSpec((C1, 9), lambda i: (0, 0)),
            pl.BlockSpec((C1, 1), lambda i: (0, 0)),
            pl.BlockSpec((3 * C2, 3 * C1), lambda i: (0, 0)),
            pl.BlockSpec((NCLS, W * C2), lambda i: (0, 0)),
            pl.BlockSpec((NCLS, 1), lambda i: (0, 0)),
        ],
        out_specs=pl.BlockSpec((NCLS, Bblk), lambda i: (0, i)),
        compiler_params=pltpu.CompilerParams(
            dimension_semantics=("parallel",),      # batch blocks across TCs on v7x
            vmem_limit_bytes=32 * 1024 * 1024),
    )(xpad, w1, b1, w2g, fcw, fcb)
    return out[:, :B].T                             # (B, NCLS)


def ref_forward(x, params):
    """Pure-JAX reference (matches the PyTorch module)."""
    conv1_w, conv1_b, conv2_w, conv2_b, fc_w, fc_b = params
    B = x.shape[0]
    dn = ("NCHW", "OIHW", "NCHW")
    y = lax.conv_general_dilated(x[:, None, :, :], conv1_w, (1, 1), "SAME",
                                 dimension_numbers=dn,
                                 precision=lax.Precision.HIGHEST)
    y = jnp.maximum(y + conv1_b.reshape(1, -1, 1, 1), 0.0)
    y = lax.conv_general_dilated(y, conv2_w, (1, 1), "SAME",
                                 dimension_numbers=dn,
                                 precision=lax.Precision.HIGHEST)
    y = y + conv2_b.reshape(1, -1, 1, 1)
    pooled = y.mean(axis=2)                          # AdaptiveAvgPool2d((1, W))
    flat = pooled.reshape(B, -1)                     # (B, 32*W), channel-major
    return jnp.dot(flat, fc_w.T, precision=lax.Precision.HIGHEST) + fc_b


if __name__ == "__main__":
    B, seq_len, input_size = 2, 8, 5                 # OHLCV -> input_size = 5
    key = jax.random.PRNGKey(0)
    ks = jax.random.split(key, 7)
    x = jax.random.normal(ks[0], (B, seq_len, input_size), jnp.float32)
    conv1_w = 0.10 * jax.random.normal(ks[1], (C1, 1, 3, 3), jnp.float32)
    conv1_b = 0.10 * jax.random.normal(ks[2], (C1,), jnp.float32)
    conv2_w = 0.05 * jax.random.normal(ks[3], (C2, C1, 3, 3), jnp.float32)
    conv2_b = 0.10 * jax.random.normal(ks[4], (C2,), jnp.float32)
    fc_w = 0.05 * jax.random.normal(ks[5], (NCLS, C2 * input_size), jnp.float32)
    fc_b = 0.10 * jax.random.normal(ks[6], (NCLS,), jnp.float32)
    params = (conv1_w, conv1_b, conv2_w, conv2_b, fc_w, fc_b)

    out = jax.block_until_ready(ohlcv_tcnn_forward(x, params))
    ref = ref_forward(x, params)
    assert out.shape == (B, NCLS), out.shape
    assert jnp.allclose(out, ref, rtol=1e-3, atol=2e-3), (out, ref)
    print("KERNEL_OK")
</pallas_src>

<mosaic_0001>
module attributes {stable_mosaic.version = 11 : i64} {
  func.func @ohlcv_tcnn_kernel(%arg0: i32, %arg1: memref<1x10x896xf32, #tpu.memory_space<vmem>>, %arg2: memref<64x9xf32, #tpu.memory_space<vmem>>, %arg3: memref<64x1xf32, #tpu.memory_space<vmem>>, %arg4: memref<96x192xf32, #tpu.memory_space<vmem>>, %arg5: memref<3x160xf32, #tpu.memory_space<vmem>>, %arg6: memref<3x1xf32, #tpu.memory_space<vmem>>, %arg7: memref<3x128xf32, #tpu.memory_space<vmem>>) attributes {dimension_semantics = [#tpu.dimension_semantics<parallel>], iteration_bounds = array<i64: 1>, scalar_prefetch = 0 : i64, scratch_operands = 0 : i64, tpu.core_type = #tpu.core_type<tc>, window_params = [{transform_indices = @transform_0, window_bounds = array<i64: 1, 10, 896>}, {pipeline_mode = #tpu.pipeline_mode<synchronous>, transform_indices = @transform_1, window_bounds = array<i64: 64, 9>}, {pipeline_mode = #tpu.pipeline_mode<synchronous>, transform_indices = @transform_2, window_bounds = array<i64: 64, 1>}, {pipeline_mode = #tpu.pipeline_mode<synchronous>, transform_indices = @transform_3, window_bounds = array<i64: 96, 192>}, {pipeline_mode = #tpu.pipeline_mode<synchronous>, transform_indices = @transform_4, window_bounds = array<i64: 3, 160>}, {pipeline_mode = #tpu.pipeline_mode<synchronous>, transform_indices = @transform_5, window_bounds = array<i64: 3, 1>}, {transform_indices = @transform_6, window_bounds = array<i64: 3, 128>}]} {
    %c0 = arith.constant 0 : index
    %c0_0 = arith.constant 0 : index
    %c0_1 = arith.constant 0 : index
    %0 = vector.load %arg1[%c0, %c0_0, %c0_1] : memref<1x10x896xf32, #tpu.memory_space<vmem>>, vector<1x10x896xf32>
    %1 = vector.shape_cast %0 : vector<1x10x896xf32> to vector<10x896xf32>
    %c0_2 = arith.constant 0 : index
    %c0_3 = arith.constant 0 : index
    %2 = vector.load %arg2[%c0_2, %c0_3] : memref<64x9xf32, #tpu.memory_space<vmem>>, vector<64x9xf32>
    %c0_4 = arith.constant 0 : index
    %c0_5 = arith.constant 0 : index
    %3 = vector.load %arg3[%c0_4, %c0_5] : memref<64x1xf32, #tpu.memory_space<vmem>>, vector<64x1xf32>
    %4 = vector.extract_strided_slice %1 {offsets = [0, 0], sizes = [1, 640], strides = [1, 1]} : vector<10x896xf32> to vector<1x640xf32>
    %5 = vector.extract_strided_slice %1 {offsets = [0, 128], sizes = [1, 640], strides = [1, 1]} : vector<10x896xf32> to vector<1x640xf32>
    %6 = vector.extract_strided_slice %1 {offsets = [0, 256], sizes = [1, 640], strides = [1, 1]} : vector<10x896xf32> to vector<1x640xf32>
    %7 = vector.extract_strided_slice %1 {offsets = [1, 0], sizes = [1, 640], strides = [1, 1]} : vector<10x896xf32> to vector<1x640xf32>
    %8 = vector.extract_strided_slice %1 {offsets = [1, 128], sizes = [1, 640], strides = [1, 1]} : vector<10x896xf32> to vector<1x640xf32>
    %9 = vector.extract_strided_slice %1 {offsets = [1, 256], sizes = [1, 640], strides = [1, 1]} : vector<10x896xf32> to vector<1x640xf32>
    %10 = vector.extract_strided_slice %1 {offsets = [2, 0], sizes = [1, 640], strides = [1, 1]} : vector<10x896xf32> to vector<1x640xf32>
    %11 = vector.extract_strided_slice %1 {offsets = [2, 128], sizes = [1, 640], strides = [1, 1]} : vector<10x896xf32> to vector<1x640xf32>
    %12 = vector.extract_strided_slice %1 {offsets = [2, 256], sizes = [1, 640], strides = [1, 1]} : vector<10x896xf32> to vector<1x640xf32>
    %13 = tpu.concatenate %4, %5, %6, %7, %8, %9, %10, %11, %12 in 0 : vector<1x640xf32>, vector<1x640xf32>, vector<1x640xf32>, vector<1x640xf32>, vector<1x640xf32>, vector<1x640xf32>, vector<1x640xf32>, vector<1x640xf32>, vector<1x640xf32> -> vector<9x640xf32>
    %cst = arith.constant dense<0.000000e+00> : vector<64x640xf32>
    %14 = tpu.matmul %2, %13, %cst {dimension_numbers = #tpu.dot_dimension_numbers<[1], [0], [0], [1], [0, 0, 1, 1], [], []>} : vector<64x9xf32>, vector<9x640xf32>, vector<64x640xf32> -> vector<64x640xf32>
    %15 = vector.broadcast %3 : vector<64x1xf32> to vector<64x640xf32>
    %16 = arith.addf %14, %15 : vector<64x640xf32>
    %cst_6 = arith.constant 0.000000e+00 : f32
    %17 = vector.broadcast %cst_6 : f32 to vector<64x640xf32>
    %18 = arith.maximumf %16, %17 : vector<64x640xf32>
    %19 = vector.extract_strided_slice %1 {offsets = [1, 0], sizes = [1, 640], strides = [1, 1]} : vector<10x896xf32> to vector<1x640xf32>
    %20 = vector.extract_strided_slice %1 {offsets = [1, 128], sizes = [1, 640], strides = [1, 1]} : vector<10x896xf32> to vector<1x640xf32>
    %21 = vector.extract_strided_slice %1 {offsets = [1, 256], sizes = [1, 640], strides = [1, 1]} : vector<10x896xf32> to vector<1x640xf32>
    %22 = vector.extract_strided_slice %1 {offsets = [2, 0], sizes = [1, 640], strides = [1, 1]} : vector<10x896xf32> to vector<1x640xf32>
    %23 = vector.extract_strided_slice %1 {offsets = [2, 128], sizes = [1, 640], strides = [1, 1]} : vector<10x896xf32> to vector<1x640xf32>
    %24 = vector.extract_strided_slice %1 {offsets = [2, 256], sizes = [1, 640], strides = [1, 1]} : vector<10x896xf32> to vector<1x640xf32>
    %25 = vector.extract_strided_slice %1 {offsets = [3, 0], sizes = [1, 640], strides = [1, 1]} : vector<10x896xf32> to vector<1x640xf32>
    %26 = vector.extract_strided_slice %1 {offsets = [3, 128], sizes = [1, 640], strides = [1, 1]} : vector<10x896xf32> to vector<1x640xf32>
    %27 = vector.extract_strided_slice %1 {offsets = [3, 256], sizes = [1, 640], strides = [1, 1]} : vector<10x896xf32> to vector<1x640xf32>
    %28 = tpu.concatenate %19, %20, %21, %22, %23, %24, %25, %26, %27 in 0 : vector<1x640xf32>, vector<1x640xf32>, vector<1x640xf32>, vector<1x640xf32>, vector<1x640xf32>, vector<1x640xf32>, vector<1x640xf32>, vector<1x640xf32>, vector<1x640xf32> -> vector<9x640xf32>
    %cst_7 = arith.constant dense<0.000000e+00> : vector<64x640xf32>
    %29 = tpu.matmul %2, %28, %cst_7 {dimension_numbers = #tpu.dot_dimension_numbers<[1], [0], [0], [1], [0, 0, 1, 1], [], []>} : vector<64x9xf32>, vector<9x640xf32>, vector<64x640xf32> -> vector<64x640xf32>
    %30 = vector.broadcast %3 : vector<64x1xf32> to vector<64x640xf32>
    %31 = arith.addf %29, %30 : vector<64x640xf32>
    %cst_8 = arith.constant 0.000000e+00 : f32
    %32 = vector.broadcast %cst_8 : f32 to vector<64x640xf32>
    %33 = arith.maximumf %31, %32 : vector<64x640xf32>
    %34 = arith.addf %18, %33 : vector<64x640xf32>
    %35 = vector.extract_strided_slice %1 {offsets = [2, 0], sizes = [1, 640], strides = [1, 1]} : vector<10x896xf32> to vector<1x640xf32>
    %36 = vector.extract_strided_slice %1 {offsets = [2, 128], sizes = [1, 640], strides = [1, 1]} : vector<10x896xf32> to vector<1x640xf32>
    %37 = vector.extract_strided_slice %1 {offsets = [2, 256], sizes = [1, 640], strides = [1, 1]} : vector<10x896xf32> to vector<1x640xf32>
    %38 = vector.extract_strided_slice %1 {offsets = [3, 0], sizes = [1, 640], strides = [1, 1]} : vector<10x896xf32> to vector<1x640xf32>
    %39 = vector.extract_strided_slice %1 {offsets = [3, 128], sizes = [1, 640], strides = [1, 1]} : vector<10x896xf32> to vector<1x640xf32>
    %40 = vector.extract_strided_slice %1 {offsets = [3, 256], sizes = [1, 640], strides = [1, 1]} : vector<10x896xf32> to vector<1x640xf32>
    %41 = vector.extract_strided_slice %1 {offsets = [4, 0], sizes = [1, 640], strides = [1, 1]} : vector<10x896xf32> to vector<1x640xf32>
    %42 = vector.extract_strided_slice %1 {offsets = [4, 128], sizes = [1, 640], strides = [1, 1]} : vector<10x896xf32> to vector<1x640xf32>
    %43 = vector.extract_strided_slice %1 {offsets = [4, 256], sizes = [1, 640], strides = [1, 1]} : vector<10x896xf32> to vector<1x640xf32>
    %44 = tpu.concatenate %35, %36, %37, %38, %39, %40, %41, %42, %43 in 0 : vector<1x640xf32>, vector<1x640xf32>, vector<1x640xf32>, vector<1x640xf32>, vector<1x640xf32>, vector<1x640xf32>, vector<1x640xf32>, vector<1x640xf32>, vector<1x640xf32> -> vector<9x640xf32>
    %cst_9 = arith.constant dense<0.000000e+00> : vector<64x640xf32>
    %45 = tpu.matmul %2, %44, %cst_9 {dimension_numbers = #tpu.dot_dimension_numbers<[1], [0], [0], [1], [0, 0, 1, 1], [], []>} : vector<64x9xf32>, vector<9x640xf32>, vector<64x640xf32> -> vector<64x640xf32>
    %46 = vector.broadcast %3 : vector<64x1xf32> to vector<64x640xf32>
    %47 = arith.addf %45, %46 : vector<64x640xf32>
    %cst_10 = arith.constant 0.000000e+00 : f32
    %48 = vector.broadcast %cst_10 : f32 to vector<64x640xf32>
    %49 = arith.maximumf %47, %48 : vector<64x640xf32>
    %50 = arith.addf %34, %49 : vector<64x640xf32>
    %51 = vector.extract_strided_slice %1 {offsets = [3, 0], sizes = [1, 640], strides = [1, 1]} : vector<10x896xf32> to vector<1x640xf32>
    %52 = vector.extract_strided_slice %1 {offsets = [3, 128], sizes = [1, 640], strides = [1, 1]} : vector<10x896xf32> to vector<1x640xf32>
    %53 = vector.extract_strided_slice %1 {offsets = [3, 256], sizes = [1, 640], strides = [1, 1]} : vector<10x896xf32> to vector<1x640xf32>
    %54 = vector.extract_strided_slice %1 {offsets = [4, 0], sizes = [1, 640], strides = [1, 1]} : vector<10x896xf32> to vector<1x640xf32>
    %55 = vector.extract_strided_slice %1 {offsets = [4, 128], sizes = [1, 640], strides = [1, 1]} : vector<10x896xf32> to vector<1x640xf32>
    %56 = vector.extract_strided_slice %1 {offsets = [4, 256], sizes = [1, 640], strides = [1, 1]} : vector<10x896xf32> to vector<1x640xf32>
    %57 = vector.extract_strided_slice %1 {offsets = [5, 0], sizes = [1, 640], strides = [1, 1]} : vector<10x896xf32> to vector<1x640xf32>
    %58 = vector.extract_strided_slice %1 {offsets = [5, 128], sizes = [1, 640], strides = [1, 1]} : vector<10x896xf32> to vector<1x640xf32>
    %59 = vector.extract_strided_slice %1 {offsets = [5, 256], sizes = [1, 640], strides = [1, 1]} : vector<10x896xf32> to vector<1x640xf32>
    %60 = tpu.concatenate %51, %52, %53, %54, %55, %56, %57, %58, %59 in 0 : vector<1x640xf32>, vector<1x640xf32>, vector<1x640xf32>, vector<1x640xf32>, vector<1x640xf32>, vector<1x640xf32>, vector<1x640xf32>, vector<1x640xf32>, vector<1x640xf32> -> vector<9x640xf32>
    %cst_11 = arith.constant dense<0.000000e+00> : vector<64x640xf32>
    %61 = tpu.matmul %2, %60, %cst_11 {dimension_numbers = #tpu.dot_dimension_numbers<[1], [0], [0], [1], [0, 0, 1, 1], [], []>} : vector<64x9xf32>, vector<9x640xf32>, vector<64x640xf32> -> vector<64x640xf32>
    %62 = vector.broadcast %3 : vector<64x1xf32> to vector<64x640xf32>
    %63 = arith.addf %61, %62 : vector<64x640xf32>
    %cst_12 = arith.constant 0.000000e+00 : f32
    %64 = vector.broadcast %cst_12 : f32 to vector<64x640xf32>
    %65 = arith.maximumf %63, %64 : vector<64x640xf32>
    %66 = arith.addf %50, %65 : vector<64x640xf32>
    %67 = vector.extract_strided_slice %1 {offsets = [4, 0], sizes = [1, 640], strides = [1, 1]} : vector<10x896xf32> to vector<1x640xf32>
    %68 = vector.extract_strided_slice %1 {offsets = [4, 128], sizes = [1, 640], strides = [1, 1]} : vector<10x896xf32> to vector<1x640xf32>
    %69 = vector.extract_strided_slice %1 {offsets = [4, 256], sizes = [1, 640], strides = [1, 1]} : vector<10x896xf32> to vector<1x640xf32>
    %70 = vector.extract_strided_slice %1 {offsets = [5, 0], sizes = [1, 640], strides = [1, 1]} : vector<10x896xf32> to vector<1x640xf32>
    %71 = vector.extract_strided_slice %1 {offsets = [5, 128], sizes = [1, 640], strides = [1, 1]} : vector<10x896xf32> to vector<1x640xf32>
    %72 = vector.extract_strided_slice %1 {offsets = [5, 256], sizes = [1, 640], strides = [1, 1]} : vector<10x896xf32> to vector<1x640xf32>
    %73 = vector.extract_strided_slice %1 {offsets = [6, 0], sizes = [1, 640], strides = [1, 1]} : vector<10x896xf32> to vector<1x640xf32>
    %74 = vector.extract_strided_slice %1 {offsets = [6, 128], sizes = [1, 640], strides = [1, 1]} : vector<10x896xf32> to vector<1x640xf32>
    %75 = vector.extract_strided_slice %1 {offsets = [6, 256], sizes = [1, 640], strides = [1, 1]} : vector<10x896xf32> to vector<1x640xf32>
    %76 = tpu.concatenate %67, %68, %69, %70, %71, %72, %73, %74, %75 in 0 : vector<1x640xf32>, vector<1x640xf32>, vector<1x640xf32>, vector<1x640xf32>, vector<1x640xf32>, vector<1x640xf32>, vector<1x640xf32>, vector<1x640xf32>, vector<1x640xf32> -> vector<9x640xf32>
    %cst_13 = arith.constant dense<0.000000e+00> : vector<64x640xf32>
    %77 = tpu.matmul %2, %76, %cst_13 {dimension_numbers = #tpu.dot_dimension_numbers<[1], [0], [0], [1], [0, 0, 1, 1], [], []>} : vector<64x9xf32>, vector<9x640xf32>, vector<64x640xf32> -> vector<64x640xf32>
    %78 = vector.broadcast %3 : vector<64x1xf32> to vector<64x640xf32>
    %79 = arith.addf %77, %78 : vector<64x640xf32>
    %cst_14 = arith.constant 0.000000e+00 : f32
    %80 = vector.broadcast %cst_14 : f32 to vector<64x640xf32>
    %81 = arith.maximumf %79, %80 : vector<64x640xf32>
    %82 = arith.addf %66, %81 : vector<64x640xf32>
    %83 = vector.extract_strided_slice %1 {offsets = [5, 0], sizes = [1, 640], strides = [1, 1]} : vector<10x896xf32> to vector<1x640xf32>
    %84 = vector.extract_strided_slice %1 {offsets = [5, 128], sizes = [1, 640], strides = [1, 1]} : vector<10x896xf32> to vector<1x640xf32>
    %85 = vector.extract_strided_slice %1 {offsets = [5, 256], sizes = [1, 640], strides = [1, 1]} : vector<10x896xf32> to vector<1x640xf32>
    %86 = vector.extract_strided_slice %1 {offsets = [6, 0], sizes = [1, 640], strides = [1, 1]} : vector<10x896xf32> to vector<1x640xf32>
    %87 = vector.extract_strided_slice %1 {offsets = [6, 128], sizes = [1, 640], strides = [1, 1]} : vector<10x896xf32> to vector<1x640xf32>
    %88 = vector.extract_strided_slice %1 {offsets = [6, 256], sizes = [1, 640], strides = [1, 1]} : vector<10x896xf32> to vector<1x640xf32>
    %89 = vector.extract_strided_slice %1 {offsets = [7, 0], sizes = [1, 640], strides = [1, 1]} : vector<10x896xf32> to vector<1x640xf32>
    %90 = vector.extract_strided_slice %1 {offsets = [7, 128], sizes = [1, 640], strides = [1, 1]} : vector<10x896xf32> to vector<1x640xf32>
    %91 = vector.extract_strided_slice %1 {offsets = [7, 256], sizes = [1, 640], strides = [1, 1]} : vector<10x896xf32> to vector<1x640xf32>
    %92 = tpu.concatenate %83, %84, %85, %86, %87, %88, %89, %90, %91 in 0 : vector<1x640xf32>, vector<1x640xf32>, vector<1x640xf32>, vector<1x640xf32>, vector<1x640xf32>, vector<1x640xf32>, vector<1x640xf32>, vector<1x640xf32>, vector<1x640xf32> -> vector<9x640xf32>
    %cst_15 = arith.constant dense<0.000000e+00> : vector<64x640xf32>
    %93 = tpu.matmul %2, %92, %cst_15 {dimension_numbers = #tpu.dot_dimension_numbers<[1], [0], [0], [1], [0, 0, 1, 1], [], []>} : vector<64x9xf32>, vector<9x640xf32>, vector<64x640xf32> -> vector<64x640xf32>
    %94 = vector.broadcast %3 : vector<64x1xf32> to vector<64x640xf32>
    %95 = arith.addf %93, %94 : vector<64x640xf32>
    %cst_16 = arith.constant 0.000000e+00 : f32
    %96 = vector.broadcast %cst_16 : f32 to vector<64x640xf32>
    %97 = arith.maximumf %95, %96 : vector<64x640xf32>
    %98 = arith.addf %82, %97 : vector<64x640xf32>
    %99 = vector.extract_strided_slice %1 {offsets = [6, 0], sizes = [1, 640], strides = [1, 1]} : vector<10x896xf32> to vector<1x640xf32>
    %100 = vector.extract_strided_slice %1 {offsets = [6, 128], sizes = [1, 640], strides = [1, 1]} : vector<10x896xf32> to vector<1x640xf32>
    %101 = vector.extract_strided_slice %1 {offsets = [6, 256], sizes = [1, 640], strides = [1, 1]} : vector<10x896xf32> to vector<1x640xf32>
    %102 = vector.extract_strided_slice %1 {offsets = [7, 0], sizes = [1, 640], strides = [1, 1]} : vector<10x896xf32> to vector<1x640xf32>
    %103 = vector.extract_strided_slice %1 {offsets = [7, 128], sizes = [1, 640], strides = [1, 1]} : vector<10x896xf32> to vector<1x640xf32>
    %104 = vector.extract_strided_slice %1 {offsets = [7, 256], sizes = [1, 640], strides = [1, 1]} : vector<10x896xf32> to vector<1x640xf32>
    %105 = vector.extract_strided_slice %1 {offsets = [8, 0], sizes = [1, 640], strides = [1, 1]} : vector<10x896xf32> to vector<1x640xf32>
    %106 = vector.extract_strided_slice %1 {offsets = [8, 128], sizes = [1, 640], strides = [1, 1]} : vector<10x896xf32> to vector<1x640xf32>
    %107 = vector.extract_strided_slice %1 {offsets = [8, 256], sizes = [1, 640], strides = [1, 1]} : vector<10x896xf32> to vector<1x640xf32>
    %108 = tpu.concatenate %99, %100, %101, %102, %103, %104, %105, %106, %107 in 0 : vector<1x640xf32>, vector<1x640xf32>, vector<1x640xf32>, vector<1x640xf32>, vector<1x640xf32>, vector<1x640xf32>, vector<1x640xf32>, vector<1x640xf32>, vector<1x640xf32> -> vector<9x640xf32>
    %cst_17 = arith.constant dense<0.000000e+00> : vector<64x640xf32>
    %109 = tpu.matmul %2, %108, %cst_17 {dimension_numbers = #tpu.dot_dimension_numbers<[1], [0], [0], [1], [0, 0, 1, 1], [], []>} : vector<64x9xf32>, vector<9x640xf32>, vector<64x640xf32> -> vector<64x640xf32>
    %110 = vector.broadcast %3 : vector<64x1xf32> to vector<64x640xf32>
    %111 = arith.addf %109, %110 : vector<64x640xf32>
    %cst_18 = arith.constant 0.000000e+00 : f32
    %112 = vector.broadcast %cst_18 : f32 to vector<64x640xf32>
    %113 = arith.maximumf %111, %112 : vector<64x640xf32>
    %114 = arith.addf %98, %113 : vector<64x640xf32>
    %115 = vector.extract_strided_slice %1 {offsets = [7, 0], sizes = [1, 640], strides = [1, 1]} : vector<10x896xf32> to vector<1x640xf32>
    %116 = vector.extract_strided_slice %1 {offsets = [7, 128], sizes = [1, 640], strides = [1, 1]} : vector<10x896xf32> to vector<1x640xf32>
    %117 = vector.extract_strided_slice %1 {offsets = [7, 256], sizes = [1, 640], strides = [1, 1]} : vector<10x896xf32> to vector<1x640xf32>
    %118 = vector.extract_strided_slice %1 {offsets = [8, 0], sizes = [1, 640], strides = [1, 1]} : vector<10x896xf32> to vector<1x640xf32>
    %119 = vector.extract_strided_slice %1 {offsets = [8, 128], sizes = [1, 640], strides = [1, 1]} : vector<10x896xf32> to vector<1x640xf32>
    %120 = vector.extract_strided_slice %1 {offsets = [8, 256], sizes = [1, 640], strides = [1, 1]} : vector<10x896xf32> to vector<1x640xf32>
    %121 = vector.extract_strided_slice %1 {offsets = [9, 0], sizes = [1, 640], strides = [1, 1]} : vector<10x896xf32> to vector<1x640xf32>
    %122 = vector.extract_strided_slice %1 {offsets = [9, 128], sizes = [1, 640], strides = [1, 1]} : vector<10x896xf32> to vector<1x640xf32>
    %123 = vector.extract_strided_slice %1 {offsets = [9, 256], sizes = [1, 640], strides = [1, 1]} : vector<10x896xf32> to vector<1x640xf32>
    %124 = tpu.concatenate %115, %116, %117, %118, %119, %120, %121, %122, %123 in 0 : vector<1x640xf32>, vector<1x640xf32>, vector<1x640xf32>, vector<1x640xf32>, vector<1x640xf32>, vector<1x640xf32>, vector<1x640xf32>, vector<1x640xf32>, vector<1x640xf32> -> vector<9x640xf32>
    %cst_19 = arith.constant dense<0.000000e+00> : vector<64x640xf32>
    %125 = tpu.matmul %2, %124, %cst_19 {dimension_numbers = #tpu.dot_dimension_numbers<[1], [0], [0], [1], [0, 0, 1, 1], [], []>} : vector<64x9xf32>, vector<9x640xf32>, vector<64x640xf32> -> vector<64x640xf32>
    %126 = vector.broadcast %3 : vector<64x1xf32> to vector<64x640xf32>
    %127 = arith.addf %125, %126 : vector<64x640xf32>
    %cst_20 = arith.constant 0.000000e+00 : f32
    %128 = vector.broadcast %cst_20 : f32 to vector<64x640xf32>
    %129 = arith.maximumf %127, %128 : vector<64x640xf32>
    %130 = arith.addf %114, %129 : vector<64x640xf32>
    %131 = arith.subf %130, %129 : vector<64x640xf32>
    %132 = arith.subf %130, %18 : vector<64x640xf32>
    %133 = tpu.concatenate %131, %130, %132 in 0 : vector<64x640xf32>, vector<64x640xf32>, vector<64x640xf32> -> vector<192x640xf32>
    %c0_21 = arith.constant 0 : index
    %c0_22 = arith.constant 0 : index
    %134 = vector.load %arg4[%c0_21, %c0_22] : memref<96x192xf32, #tpu.memory_space<vmem>>, vector<32x192xf32>
    %cst_23 = arith.constant dense<0.000000e+00> : vector<32x640xf32>
    %135 = tpu.matmul %134, %133, %cst_23 {dimension_numbers = #tpu.dot_dimension_numbers<[1], [0], [0], [1], [0, 0, 1, 1], [], []>} : vector<32x192xf32>, vector<192x640xf32>, vector<32x640xf32> -> vector<32x640xf32>
    %c32 = arith.constant 32 : index
    %c0_24 = arith.constant 0 : index
    %136 = vector.load %arg4[%c32, %c0_24] : memref<96x192xf32, #tpu.memory_space<vmem>>, vector<32x192xf32>
    %cst_25 = arith.constant dense<0.000000e+00> : vector<32x640xf32>
    %137 = tpu.matmul %136, %133, %cst_25 {dimension_numbers = #tpu.dot_dimension_numbers<[1], [0], [0], [1], [0, 0, 1, 1], [], []>} : vector<32x192xf32>, vector<192x640xf32>, vector<32x640xf32> -> vector<32x640xf32>
    %c64 = arith.constant 64 : index
    %c0_26 = arith.constant 0 : index
    %138 = vector.load %arg4[%c64, %c0_26] : memref<96x192xf32, #tpu.memory_space<vmem>>, vector<32x192xf32>
    %cst_27 = arith.constant dense<0.000000e+00> : vector<32x640xf32>
    %139 = tpu.matmul %138, %133, %cst_27 {dimension_numbers = #tpu.dot_dimension_numbers<[1], [0], [0], [1], [0, 0, 1, 1], [], []>} : vector<32x192xf32>, vector<192x640xf32>, vector<32x640xf32> -> vector<32x640xf32>
    %cst_28 = arith.constant 0.000000e+00 : f32
    %140 = vector.broadcast %cst_28 : f32 to vector<32x128xf32>
    %141 = vector.extract_strided_slice %135 {offsets = [0, 0], sizes = [32, 512], strides = [1, 1]} : vector<32x640xf32> to vector<32x512xf32>
    %142 = tpu.concatenate %140, %141 in 1 : vector<32x128xf32>, vector<32x512xf32> -> vector<32x640xf32>
    %143 = arith.addf %137, %142 : vector<32x640xf32>
    %144 = vector.extract_strided_slice %139 {offsets = [0, 128], sizes = [32, 512], strides = [1, 1]} : vector<32x640xf32> to vector<32x512xf32>
    %145 = tpu.concatenate %144, %140 in 1 : vector<32x512xf32>, vector<32x128xf32> -> vector<32x640xf32>
    %146 = arith.addf %143, %145 : vector<32x640xf32>
    %147 = vector.extract_strided_slice %146 {offsets = [0, 0], sizes = [32, 128], strides = [1, 1]} : vector<32x640xf32> to vector<32x128xf32>
    %148 = vector.extract_strided_slice %146 {offsets = [0, 128], sizes = [32, 128], strides = [1, 1]} : vector<32x640xf32> to vector<32x128xf32>
    %149 = vector.extract_strided_slice %146 {offsets = [0, 256], sizes = [32, 128], strides = [1, 1]} : vector<32x640xf32> to vector<32x128xf32>
    %150 = vector.extract_strided_slice %146 {offsets = [0, 384], sizes = [32, 128], strides = [1, 1]} : vector<32x640xf32> to vector<32x128xf32>
    %151 = vector.extract_strided_slice %146 {offsets = [0, 512], sizes = [32, 128], strides = [1, 1]} : vector<32x640xf32> to vector<32x128xf32>
    %152 = tpu.concatenate %147, %148, %149, %150, %151 in 0 : vector<32x128xf32>, vector<32x128xf32>, vector<32x128xf32>, vector<32x128xf32>, vector<32x128xf32> -> vector<160x128xf32>
    %c0_29 = arith.constant 0 : index
    %c0_30 = arith.constant 0 : index
    %153 = vector.load %arg5[%c0_29, %c0_30] : memref<3x160xf32, #tpu.memory_space<vmem>>, vector<3x160xf32>
    %cst_31 = arith.constant dense<0.000000e+00> : vector<3x128xf32>
    %154 = tpu.matmul %153, %152, %cst_31 {dimension_numbers = #tpu.dot_dimension_numbers<[1], [0], [0], [1], [0, 0, 1, 1], [], []>} : vector<3x160xf32>, vector<160x128xf32>, vector<3x128xf32> -> vector<3x128xf32>
    %c0_32 = arith.constant 0 : index
    %c0_33 = arith.constant 0 : index
    %155 = vector.load %arg6[%c0_32, %c0_33] : memref<3x1xf32, #tpu.memory_space<vmem>>, vector<3x1xf32>
    %156 = vector.broadcast %155 : vector<3x1xf32> to vector<3x128xf32>
    %157 = arith.addf %154, %156 : vector<3x128xf32>
    %c0_34 = arith.constant 0 : index
    %c0_35 = arith.constant 0 : index
    %158 = vector.load %arg7[%c0_34, %c0_35] : memref<3x128xf32, #tpu.memory_space<vmem>>, vector<3x128xf32>
    tpu.vector_store %arg7[%c0_34, %c0_35], %157 {strides = array<i32>} : memref<3x128xf32, #tpu.memory_space<vmem>>, vector<3x128xf32>,
    return
  }
  func.func @transform_0(%arg0: i32) -> (i32, i32, i32) {
    %c0_i32 = arith.constant 0 : i32
    %c0_i32_0 = arith.constant 0 : i32
    %c0_i32_1 = arith.constant 0 : i32
    return %arg0, %c0_i32, %c0_i32_0 : i32, i32, i32
  }
  func.func @transform_1(%arg0: i32) -> (i32, i32) {
    %c0_i32 = arith.constant 0 : i32
    %c0_i32_0 = arith.constant 0 : i32
    %c0_i32_1 = arith.constant 0 : i32
    return %c0_i32, %c0_i32_0 : i32, i32
  }
  func.func @transform_2(%arg0: i32) -> (i32, i32) {
    %c0_i32 = arith.constant 0 : i32
    %c0_i32_0 = arith.constant 0 : i32
    %c0_i32_1 = arith.constant 0 : i32
    return %c0_i32, %c0_i32_0 : i32, i32
  }
  func.func @transform_3(%arg0: i32) -> (i32, i32) {
    %c0_i32 = arith.constant 0 : i32
    %c0_i32_0 = arith.constant 0 : i32
    %c0_i32_1 = arith.constant 0 : i32
    return %c0_i32, %c0_i32_0 : i32, i32
  }
  func.func @transform_4(%arg0: i32) -> (i32, i32) {
    %c0_i32 = arith.constant 0 : i32
    %c0_i32_0 = arith.constant 0 : i32
    %c0_i32_1 = arith.constant 0 : i32
    return %c0_i32, %c0_i32_0 : i32, i32
  }
  func.func @transform_5(%arg0: i32) -> (i32, i32) {
    %c0_i32 = arith.constant 0 : i32
    %c0_i32_0 = arith.constant 0 : i32
    %c0_i32_1 = arith.constant 0 : i32
    return %c0_i32, %c0_i32_0 : i32, i32
  }
  func.func @transform_6(%arg0: i32) -> (i32, i32) {
    %c0_i32 = arith.constant 0 : i32
    %c0_i32_0 = arith.constant 0 : i32
    return %c0_i32, %arg0 : i32, i32
  }
}

</mosaic_0001>

<bundles_post_ra>
// kernel: tpu_custom_call.1
= control target key start
LH: loop header
LB: loop body
LE: loop exit
PB: predicated region body
PF: predicated region fallthrough
CT: control target
= control target key end

     0   :  { %v4353_v3 = vmov 0   ;;  %vm124_vm0 = vcmask 1040384   ;;  %vm130_vm1 = vcmask 1041408   ;;  %vm136_vm2 = vcmask 1042432   ;;  %s9073_s0 = inlined_call_operand.vmem [shape: f32[1,10,896], index: 0, kind: input, shape index: {}]   ;;  %s9074_s1 = inlined_call_operand.vmem [shape: f32[64,9], index: 1, kind: input, shape index: {}]   ;;  %s9075_s2 = inlined_call_operand.vmem [shape: f32[64,1], index: 2, kind: input, shape index: {}]   ;;  %s9076_s3 = inlined_call_operand.vmem [shape: f32[96,192], index: 3, kind: input, shape index: {}]   ;;  %s9077_s4 = inlined_call_operand.vmem [shape: f32[3,160], index: 4, kind: input, shape index: {}]   ;;  %s9078_s5 = inlined_call_operand.vmem [shape: f32[3,1], index: 5, kind: input, shape index: {}]   ;;  %s9079_s6 = inlined_call_operand.hbm [shape: f32[3,128], index: 6, kind: output, shape index: {}]  }
   0x1   :  { %v51_v0 = vld [vmem:[%s9075_s2 + $0x28] sm:$0xff]  ;;  %v4396_v1 = vld [vmem:[%s9073_s0 + $0x10] sm:$0xff]  ;;  %v4401_v2 = vld [vmem:[%s9073_s0 + $0x18] sm:$0xff]  ;;  %4302 = vset.pattern.permute.xlu1 %v4353_v3  ;;  %4301 = vset.pattern.permute.xlu0 %v4353_v3  ;;  %vm142_vm3 = vcmask 1043456   ;;  %vm148_vm4 = vcmask 1044480   ;;  %vm154_vm5 = vcmask 1045504  }
   0x2   :  { %v4404_v4 = vrot.slane %v4396_v1, 2  ;;  %v4407_v5 = vrot.slane %v4401_v2, 2  ;;  %v4412_v6 = vld [vmem:[%s9073_s0] sm:$0xff]  ;;  %v4417_v7 = vld [vmem:[%s9073_s0 + $0x8] sm:$0xff]  ;;  %v4420_v8 = vrot.slane %v4396_v1, 6  ;;  %193 = vperm.xlu1 %4302, %v51_v0   ;;  %v4429_v11 = vrot.slane %v4396_v1, 4  ;;  %4303 = vset.pattern.permute.xlu2 %v4353_v3 }
   0x3   :  { %9390 = vst [vmem:[#allocation7_spill] sm:$0xff] %v4412_v6  ;;  %v4423_v9 = vrot.slane %v4417_v7, 7  ;;  %v4426_v10 = vrot.slane %v4412_v6, 6  ;;  %v4436_v12 = vrot.slane %v4417_v7, 5  ;;  %v4439_v13 = vrot.slane %v4412_v6, 4  ;;  %v53_v15 = vld [vmem:[%s9075_s2 + $0x38] sm:$0xff] }
   0x4   :  { %9388 = vst [vmem:[#allocation5_spill] sm:$0xff] %v4404_v4  ;;  %3882 = vmatpush.msk.msra.mxu0 %vm124_vm0, %v4404_v4  ;;  %4295 = vmatpush.msk.msra.mxu2 %vm124_vm0, %v4404_v4  ;;  %v4442_v14 = vrot.slane %v4417_v7, 3  ;;  %v4455_v17 = vrot.slane %v4396_v1, 7  ;;  %v4460_v19 = vrot.slane %v4401_v2, 6  ;;  %v4463_v20 = vrot.slane %v4417_v7, 6  ;;  %v4476_v24 = vld [vmem:[%s9073_s0 + $0x20] sm:$0xff] }
   0x5   :  { %9389 = vst [vmem:[#allocation6_spill] sm:$0xff] %v4407_v5  ;;  %3891 = vmatpush.msk.msra.mxu1 %vm124_vm0, %v4407_v5  ;;  %4297 = vmatpush.msk.msra.mxu3 %vm124_vm0, %v4407_v5  ;;  %v125_v16 = vsel %vm124_vm0, %v4412_v6, %v4423_v9  ;;  %vm160_vm6 = vcmask 1046528   ;;  %v4468_v22 = vrot.slane %v4396_v1, 5  ;;  %v4471_v23 = vrot.slane %v4401_v2, 4  ;;  %v50_v29 = vld [vmem:[%s9075_s2 + $0x20] sm:$0xff] }
   0x6   :  { %9391 = vst [vmem:[#allocation8_spill] sm:$0xff] %v4420_v8  ;;  %v131_v18 = vsel %vm130_vm1, %v125_v16, %v4420_v8  ;;  %203 = vperm.xlu0 %4301, %v53_v15   ;;  %v4481_v26 = vrot.slane %v4417_v7, 4  ;;  %v4484_v27 = vrot.slane %v4396_v1, 3  ;;  %v126_v28 = vsel %vm124_vm0, %v4417_v7, %v4455_v17 }
   0x7   :  { %9392 = vst [vmem:[#allocation9_spill] sm:$0xff] %v4423_v9  ;;  %v137_v21 = vsel %vm136_vm2, %v131_v18, %v4426_v10 }
   0x8   :  { %9393 = vst [vmem:[#allocation10_spill] sm:$0xff] %v4426_v10  ;;  %v143_v25 = vsel %vm142_vm3, %v137_v21, %v4436_v12 }
   0x9   :  { %9394 = vst [vmem:[#allocation11_spill] sm:$0xff] %v4429_v11 }
   0xa   :  { %9395 = vst [vmem:[#allocation12_spill] sm:$0xff] %v4436_v12 }
   0xb   :  { %9396 = vst [vmem:[#allocation13_spill] sm:$0xff] %v4439_v13 }
   0xc   :  { %9397 = vst [vmem:[#allocation14_spill] sm:$0xff] %v4455_v17 }
   0xd   :  { %9398 = vst [vmem:[#allocation15_spill] sm:$0xff] %v4460_v19 }
   0xe   :  { %9399 = vst [vmem:[#allocation16_spill] sm:$0xff] %v4463_v20 }
   0xf   :  { %9400 = vst [vmem:[#allocation17_spill] sm:$0xff] %v4468_v22 }
  0x10   :  { %9401 = vst [vmem:[#allocation18_spill] sm:$0xff] %v4471_v23 }
  0x11   :  { %9402 = vst [vmem:[#allocation19_spill] sm:$0xff] %v4481_v26 }
  0x12   :  { %9403 = vst [vmem:[#allocation20_spill] sm:$0xff] %v4484_v27 }
  0x13   :  { %11 = vsyncpa [#allocation3], 0  ;;  %v149_v30 = vsel %vm148_vm4, %v143_v25, %v4429_v11  ;;  %v132_v31 = vsel %vm130_vm1, %v126_v28, %v4460_v19  ;;  %vm206_vm7 = vcmask 72704   ;;  %v4497_v32 = vrot.slane %v4476_v24, 2  ;;  %v4506_v35 = vld [vmem:[%s9074_s1] sm:$0xff]  ;;  %v4511_v36 = vld [vmem:[%s9074_s1 + $0x38] sm:$0xff]  ;;  %188 = vperm.xlu1 %4302, %v50_v29  }
  0x14   :  { %v155_v33 = vsel %vm154_vm5, %v149_v30, %v4439_v13  ;;  %v138_v34 = vsel %vm136_vm2, %v132_v31, %v4463_v20  ;;  %v4516_v37 = vld [vmem:[%s9073_s0 + $0x28] sm:$0xff]  ;;  %v4519_v38 = vrot.slane %v4401_v2, 7  ;;  %v4522_v39 = vrot.slane %v4476_v24, 6  ;;  %v52_v43 = vld [vmem:[%s9075_s2 + $0x30] sm:$0xff]  ;;  %v46_v61 = vld [vmem:[%s9075_s2] sm:$0xff]  ;;  %s3873_s25 = sshll.u32 %s9079_s6, 4  ;;  %s3874_s25 = int_to_ptr.hbm [resolvable:$true] %s3873_s25 }
  0x15   :  { %v161_v40 = vsel %vm160_vm6, %v155_v33, %v4442_v14  ;;  %v144_v41 = vsel %vm142_vm3, %v138_v34, %v4468_v22  ;;  %v4529_v42 = vrot.slane %v4401_v2, 5  ;;  %v4537_v45 = vrot.slane %v4476_v24, 4  ;;  %198 = vperm.xlu0 %4301, %v52_v43   ;;  %v4593_v62 = vld [vmem:[%s9073_s0 + $0x30] sm:$0xff]  ;;  %v4616_v21 = vld [vmem:[%s9074_s1 + $0x8] sm:$0xff]  ;;  %v49_v31 = vld [vmem:[%s9075_s2 + $0x18] sm:$0xff] }
  0x16   :  { %9404 = vst [vmem:[#allocation21_spill] sm:$0xff] %v4519_v38  ;;  %256 = vmatpush.msra.mxu0 %v161_v40  ;;  %4296 = vmatpush.msra.mxu2 %v161_v40  ;;  %v150_v44 = vsel %vm148_vm4, %v144_v41, %v4471_v23  ;;  %v127_v46 = vsel %vm124_vm0, %v4396_v1, %v4519_v38  ;;  %v4543_v47 = vrot.slane %v4476_v24, 7  ;;  %v4552_v49 = vrot.slane %v4516_v37, 2  ;;  %v47_v28 = vld [vmem:[%s9075_s2 + $0x8] sm:$0xff]  ;;  %v4647_v33 = vld [vmem:[%s9074_s1 + $0x10] sm:$0xff] }
  0x17   :  { %9405 = vst [vmem:[#allocation22_spill] sm:$0xff] %v4522_v39  ;;  %v156_v48 = vsel %vm154_vm5, %v150_v44, %v4481_v26  ;;  %3883 = vmatmul.msk.f32.vlgmr.msra.gmra.mxu0 %vm206_vm7, %v4506_v35  ;;  %3890 = vmatmul.msk.f32.vlgmr.msra.gmra.mxu2 %vm206_vm7, %v4511_v36  ;;  %v133_v50 = vsel %vm130_vm1, %v127_v46, %v4522_v39  ;;  %v4557_v51 = vrot.slane %v4516_v37, 6  ;;  %v4564_v53 = vrot.slane %v4401_v2, 3  ;;  %v48_v43 = vld [vmem:[%s9075_s2 + $0x10] sm:$0xff] }
  0x18   :  { %9406 = vst [vmem:[#allocation23_spill] sm:$0xff] %v4529_v42  ;;  %v162_v52 = vsel %vm160_vm6, %v156_v48, %v4484_v27  ;;  %3900 = vmatpush.msk.msrb.mxu2 %vm124_vm0, %v4497_v32  ;;  %v139_v54 = vsel %vm136_vm2, %v133_v50, %v4420_v8  ;;  %v4569_v55 = vrot.slane %v4476_v24, 5  ;;  %v4574_v57 = vrot.slane %v4516_v37, 4  ;;  %183 = vperm.xlu2 %4303, %v49_v31  }
  0x19   :  { %9407 = vst [vmem:[#allocation24_spill] sm:$0xff] %v4537_v45  ;;  %297 = vmatpush.msra.mxu1 %v162_v52  ;;  %4298 = vmatpush.msra.mxu3 %v162_v52  ;;  %v145_v56 = vsel %vm142_vm3, %v139_v54, %v4529_v42  ;;  %v128_v58 = vsel %vm124_vm0, %v4401_v2, %v4543_v47  ;;  %v4600_v0 = vrot.slane %v4476_v24, 3  ;;  %v4605_v15 = vrot.slane %v4593_v62, 2 }
  0x1a   :  { %9408 = vst [vmem:[#allocation25_spill] sm:$0xff] %v4543_v47  ;;  %3892 = vmatmul.msk.f32.vlgmr.msra.gmra.mxu1 %vm206_vm7, %v4506_v35  ;;  %3899 = vmatmul.msk.f32.vlgmr.msra.gmra.mxu3 %vm206_vm7, %v4511_v36  ;;  %v151_v59 = vsel %vm148_vm4, %v145_v56, %v4537_v45  ;;  %v134_v60 = vsel %vm130_vm1, %v128_v58, %v4557_v51  ;;  %v4654_v34 = vrot.slane %v4516_v37, 7  ;;  %v4657_v40 = vrot.slane %v4412_v6, 1  ;;  %v4689_v56 = vld [vmem:[%s9074_s1 + $0x18] sm:$0xff] }
  0x1b   :  { %9409 = vst [vmem:[#allocation26_spill] sm:$0xff] %v4552_v49  ;;  %3909 = vmatpush.msk.msrb.mxu3 %vm124_vm0, %v4552_v49  ;;  %v157_v63 = vsel %vm154_vm5, %v151_v59, %v4429_v11  ;;  %v140_v3 = vsel %vm136_vm2, %v134_v60, %v4460_v19  ;;  %3927 = vmatpush.msk.msrb.mxu1 %vm124_vm0, %v4484_v27  ;;  %v4660_v41 = vrot.slane %v4593_v62, 6  ;;  %v4670_v44 = vrot.slane %v4516_v37, 5 }
  0x1c   :  { %9410 = vst [vmem:[#allocation27_spill] sm:$0xff] %v4557_v51  ;;  %v163_v16 = vsel %vm160_vm6, %v157_v63, %v4564_v53  ;;  %v146_v18 = vsel %vm142_vm3, %v140_v3, %v4569_v55  ;;  %168 = vperm.xlu1 %4302, %v46_v61   ;;  %3918 = vmatpush.msk.msrb.mxu0 %vm124_vm0, %v4605_v15  ;;  %v4673_v46 = vrot.slane %v4593_v62, 4  ;;  %v4679_v50 = vrot.slane %v4412_v6, 7 }
  0x1d   :  { %9411 = vst [vmem:[#allocation28_spill] sm:$0xff] %v4569_v55  ;;  %338 = vmatpush.msrb.mxu2 %v163_v16  ;;  %v152_v25 = vsel %vm148_vm4, %v146_v18, %v4574_v57  ;;  %173 = vperm.xlu0 %4301, %v47_v28   ;;  %v129_v48 = vsel %vm124_vm0, %v4476_v24, %v4654_v34  ;;  %v4692_v58 = vrot.slane %v4516_v37, 3  ;;  %v9080_v60 = vrot.slane %v4412_v6, 5 }
  0x1e   :  { %9412 = vst [vmem:[#allocation29_spill] sm:$0xff] %v4574_v57  ;;  %v158_v29 = vsel %vm154_vm5, %v152_v25, %v4471_v23  ;;  %v135_v52 = vsel %vm130_vm1, %v129_v48, %v4660_v41  ;;  %v505_v54 = vsel %vm124_vm0, %v4657_v40, %v4417_v7  ;;  %v4738_v48 = vrot.slane %v4417_v7, 1 }
  0x1f   :  { %9413 = vst [vmem:[#allocation30_spill] sm:$0xff] %v4593_v62  ;;  %3936 = vmatpush.msk.msra.mxu2 %vm124_vm0, %v4564_v53  ;;  %v164_v30 = vsel %vm160_vm6, %v158_v29, %v4600_v0  ;;  %3884 = vmatmul.msk.f32.gmra.mxu0 %vm206_vm7, %v4616_v21  ;;  %v141_v59 = vsel %vm136_vm2, %v135_v52, %v4522_v39  ;;  %v4741_v52 = vrot.slane %v4396_v1, 1  ;;  %vm2983_vm8 = vcmask 523264  }
  0x20   :  { %9414 = vst [vmem:[#allocation31_spill] sm:$0xff] %v4600_v0  ;;  %3901 = vmatmul.msk.f32.vlgmr.msrb.gmra.mxu2 %vm206_vm7, %v4506_v35  ;;  %379 = vmatpush.msrb.mxu3 %v164_v30  ;;  %v510_v61 = vsel %vm130_vm1, %v505_v54, %v4455_v17  ;;  %v147_v63 = vsel %vm142_vm3, %v141_v59, %v4670_v44  ;;  %vm3822_vm9 = vcmask 261120  }
  0x21   :  { %9415 = vst [vmem:[#allocation32_spill] sm:$0xff] %v4605_v15  ;;  %178 = vperm.xlu2 %4303, %v48_v43   ;;  %v515_v3 = vsel %vm136_vm2, %v510_v61, %v4679_v50  ;;  %v153_v16 = vsel %vm148_vm4, %v147_v63, %v4673_v46  ;;  %v4731_v43 = vld [vmem:[%s9074_s1 + $0x20] sm:$0xff]  ;;  %v506_v54 = vsel %vm124_vm0, %v4738_v48, %v4396_v1 }
  0x22   :  { %3945 = vmatpush.msk.msra.mxu3 %vm124_vm0, %v4600_v0  ;;  %3893 = vmatmul.msk.f32.gmra.mxu1 %vm206_vm7, %v4616_v21  ;;  %9416 = vst [vmem:[#allocation33_spill] sm:$0xff] %v4657_v40  ;;  %v520_v18 = vsel %vm142_vm3, %v515_v3, %v4463_v20  ;;  %v159_v25 = vsel %vm154_vm5, %v153_v16, %v4537_v45  ;;  %v4760_v3 = vld [vmem:[%s9074_s1 + $0x28] sm:$0xff] }
  0x23   :  { %3910 = vmatmul.msk.f32.vlgmr.msrb.gmra.mxu3 %vm206_vm7, %v4506_v35  ;;  %9417 = vst [vmem:[#allocation34_spill] sm:$0xff] %v4660_v41  ;;  %v525_v28 = vsel %vm148_vm4, %v520_v18, %v4468_v22  ;;  %v165_v29 = vsel %vm160_vm6, %v159_v25, %v4692_v58  ;;  %v507_v59 = vsel %vm124_vm0, %v4741_v52, %v4401_v2 }
  0x24   :  { %9418 = vst [vmem:[#allocation35_spill] sm:$0xff] %v4670_v44  ;;  %v530_v30 = vsel %vm154_vm5, %v525_v28, %v9080_v60  ;;  %420 = vmatpush.msrb.mxu0 %v165_v29  ;;  %v511_v61 = vsel %vm130_vm1, %v506_v54, %v4519_v38  ;;  %v512_v63 = vsel %vm130_vm1, %v507_v59, %v4543_v47 }
  0x25   :  { %9419 = vst [vmem:[#allocation36_spill] sm:$0xff] %v4673_v46  ;;  %v535_v31 = vsel %vm160_vm6, %v530_v30, %v4481_v26  ;;  %v516_v16 = vsel %vm136_vm2, %v511_v61, %v4423_v9  ;;  %v517_v18 = vsel %vm136_vm2, %v512_v63, %v4455_v17  ;;  %v4797_v63 = vld [vmem:[%s9074_s1 + $0x30] sm:$0xff] }
  0x26   :  { %9420 = vst [vmem:[#allocation37_spill] sm:$0xff] %v4679_v50  ;;  %565 = vmatpush.msrb.mxu1 %v535_v31  ;;  %3954 = vmatpush.msk.msra.mxu0 %vm124_vm0, %v4692_v58  ;;  %v521_v25 = vsel %vm142_vm3, %v516_v16, %v4420_v8  ;;  %v522_v28 = vsel %vm142_vm3, %v517_v18, %v4460_v19  ;;  %v4836_v16 = vrot.slane %v4401_v2, 1  ;;  %v4839_v18 = vrot.slane %v4476_v24, 1 }
  0x27   :  { %3885 = vmatmul.msk.f32.gmra.mxu0 %vm206_vm7, %v4647_v33  ;;  %9421 = vst [vmem:[#allocation38_spill] sm:$0xff] %v4692_v58  ;;  %v526_v29 = vsel %vm148_vm4, %v521_v25, %v4529_v42  ;;  %v527_v30 = vsel %vm148_vm4, %v522_v28, %v4569_v55  ;;  %v4842_v25 = vrot.slane %v4593_v62, 7  ;;  %v9085_v28 = vrot.slane %v4593_v62, 3 }
  0x28   :  { %3902 = vmatmul.msk.f32.gmra.mxu2 %vm206_vm7, %v4616_v21  ;;  %v531_v31 = vsel %vm154_vm5, %v526_v29, %v4436_v12  ;;  %v532_v54 = vsel %vm154_vm5, %v527_v30, %v4468_v22  ;;  %v508_v29 = vsel %vm124_vm0, %v4836_v16, %v4476_v24  ;;  %v4853_v30 = vrot.slane %v4593_v62, 5 }
  0x29   :  { %v536_v59 = vsel %vm160_vm6, %v531_v31, %v4429_v11  ;;  %v537_v61 = vsel %vm160_vm6, %v532_v54, %v4471_v23  ;;  %v509_v31 = vsel %vm124_vm0, %v4839_v18, %v4516_v37  ;;  %v513_v54 = vsel %vm130_vm1, %v508_v29, %v4654_v34  ;;  %3963 = vmatpush.msk.msra.mxu1 %vm124_vm0, %v9085_v28 }
  0x2a   :  { %3894 = vmatmul.msk.f32.gmra.mxu1 %vm206_vm7, %v4647_v33  ;;  %606 = vmatpush.msra.mxu2 %v536_v59  ;;  %9422 = vst [vmem:[#allocation39_spill] sm:$0xff] %v4853_v30  ;;  %v514_v59 = vsel %vm130_vm1, %v509_v31, %v4842_v25 }
  0x2b   :  { %3911 = vmatmul.msk.f32.gmra.mxu3 %vm206_vm7, %v4616_v21  ;;  %v519_v60 = vsel %vm136_vm2, %v514_v59, %v4543_v47 }
  0x2c   :  { %647 = vmatpush.msra.mxu3 %v537_v61  ;;  %3972 = vmatpush.msk.msrb.mxu2 %vm124_vm0, %v4429_v11  ;;  %v518_v61 = vsel %vm136_vm2, %v513_v54, %v4519_v38  ;;  %v524_v58 = vsel %vm142_vm3, %v519_v60, %v4557_v51 }
  0x2d   :  { %v523_v15 = vsel %vm142_vm3, %v518_v61, %v4522_v39  ;;  %v529_v31 = vsel %vm148_vm4, %v524_v58, %v4853_v30  ;;  %v9086_v58 = vrot.slane %v4412_v6, 2  ;;  %v4903_v61 = vrot.slane %v4417_v7, 2 }
  0x2e   :  { %3981 = vmatpush.msk.msrb.mxu3 %vm124_vm0, %v4471_v23  ;;  %v528_v29 = vsel %vm148_vm4, %v523_v15, %v4670_v44  ;;  %v534_v59 = vsel %vm154_vm5, %v529_v31, %v4569_v55 }
  0x2f   :  { %3886 = vmatmul.msk.f32.gmra.mxu0 %vm206_vm7, %v4689_v56  ;;  %v533_v54 = vsel %vm154_vm5, %v528_v29, %v4529_v42  ;;  %v539_v15 = vsel %vm160_vm6, %v534_v59, %v4574_v57  ;;  %9423 = vst [vmem:[#allocation40_spill] sm:$0xff] %v4903_v61  ;;  %v844_v29 = vsel %vm124_vm0, %v9086_v58, %v4738_v48 }
  0x30   :  { %3903 = vmatmul.msk.f32.gmra.mxu2 %vm206_vm7, %v4647_v33  ;;  %v538_v60 = vsel %vm160_vm6, %v533_v54, %v4537_v45  ;;  %729 = vmatpush.msra.mxu1 %v539_v15  ;;  %v845_v31 = vsel %vm124_vm0, %v4903_v61, %v4741_v52  ;;  %v849_v54 = vsel %vm130_vm1, %v844_v29, %v4396_v1 }
  0x31   :  { %688 = vmatpush.msra.mxu0 %v538_v60  ;;  %v850_v59 = vsel %vm130_vm1, %v845_v31, %v4401_v2  ;;  %v854_v60 = vsel %vm136_vm2, %v849_v54, %v4412_v6 }
  0x32   :  { %3895 = vmatmul.msk.f32.gmra.mxu1 %vm206_vm7, %v4689_v56  ;;  %v855_v15 = vsel %vm136_vm2, %v850_v59, %v4417_v7  ;;  %v859_v28 = vsel %vm142_vm3, %v854_v60, %v4423_v9 }
  0x33   :  { %3912 = vmatmul.msk.f32.gmra.mxu3 %vm206_vm7, %v4647_v33  ;;  %v860_v58 = vsel %vm142_vm3, %v855_v15, %v4455_v17 }
  0x34   :  { %v865_v29 = vsel %vm148_vm4, %v860_v58, %v4460_v19 }
  0x35   :  { %v870_v54 = vsel %vm154_vm5, %v865_v29, %v4463_v20 }
  0x37   :  { %3887 = vmatmul.msk.f32.gmra.mxu0 %vm206_vm7, %v4731_v43 }
  0x38   :  { %3904 = vmatmul.msk.f32.gmra.mxu2 %vm206_vm7, %v4689_v56 }
  0x3a   :  { %3896 = vmatmul.msk.f32.gmra.mxu1 %vm206_vm7, %v4731_v43 }
  0x3b   :  { %3913 = vmatmul.msk.f32.gmra.mxu3 %vm206_vm7, %v4689_v56 }
  0x3f   :  { %3888 = vmatmul.msk.f32.gmra.mxu0 %vm206_vm7, %v4760_v3 }
  0x40   :  { %3905 = vmatmul.msk.f32.gmra.mxu2 %vm206_vm7, %v4731_v43 }
  0x42   :  { %3897 = vmatmul.msk.f32.gmra.mxu1 %vm206_vm7, %v4760_v3 }
  0x43   :  { %3914 = vmatmul.msk.f32.gmra.mxu3 %vm206_vm7, %v4731_v43 }
  0x47   :  { %3889 = vmatmul.msk.f32.gmra.mxu0 %vm206_vm7, %v4797_v63 }
  0x48   :  { %3906 = vmatmul.msk.f32.gmra.mxu2 %vm206_vm7, %v4760_v3 }
  0x4a   :  { %3898 = vmatmul.msk.f32.gmra.mxu1 %vm206_vm7, %v4797_v63 }
  0x4b   :  { %3915 = vmatmul.msk.f32.gmra.mxu3 %vm206_vm7, %v4760_v3 }
  0x4f   :  { %3919 = vmatmul.msk.f32.vlgmr.msrb.gmra.mxu0 %vm206_vm7, %v4506_v35 }
  0x50   :  { %3907 = vmatmul.msk.f32.gmra.mxu2 %vm206_vm7, %v4797_v63  ;;  %3990 = vmatpush.msk.msrb.mxu0 %vm124_vm0, %v4537_v45 }
  0x52   :  { %3928 = vmatmul.msk.f32.vlgmr.msrb.gmra.mxu1 %vm206_vm7, %v4506_v35 }
  0x53   :  { %3916 = vmatmul.msk.f32.gmra.mxu3 %vm206_vm7, %v4797_v63  ;;  %3999 = vmatpush.msk.msrb.mxu1 %vm124_vm0, %v4574_v57  ;;  %v864_v57 = vsel %vm148_vm4, %v859_v28, %v4420_v8  ;;  %v875_v28 = vsel %vm160_vm6, %v870_v54, %v4468_v22 }
  0x54   :  { %v869_v31 = vsel %vm154_vm5, %v864_v57, %v4426_v10  ;;  %945 = vmatpush.msrb.mxu3 %v875_v28 }
  0x55   :  { %v874_v59 = vsel %vm160_vm6, %v869_v31, %v4436_v12 }
  0x56   :  { %904 = vmatpush.msrb.mxu2 %v874_v59 }
  0x57   :  { %3920 = vmatmul.msk.f32.gmra.mxu0 %vm206_vm7, %v4616_v21 }
  0x58   :  { %3908 = vmatmul.msk.f32.gmra.mxu2 %vm206_vm7, %v4511_v36 }
  0x5a   :  { %3929 = vmatmul.msk.f32.gmra.mxu1 %vm206_vm7, %v4616_v21 }
  0x5b   :  { %3917 = vmatmul.msk.f32.gmra.mxu3 %vm206_vm7, %v4511_v36 }
  0x5f   :  { %3921 = vmatmul.msk.f32.gmra.mxu0 %vm206_vm7, %v4647_v33 }
  0x60   :  { %3937 = vmatmul.msk.f32.vlgmr.msra.gmra.mxu2 %vm206_vm7, %v4506_v35 }
  0x61   :  { %4008 = vmatpush.msk.msra.mxu2 %vm124_vm0, %v4673_v46 }
  0x62   :  { %3930 = vmatmul.msk.f32.gmra.mxu1 %vm206_vm7, %v4647_v33 }
  0x63   :  { %3946 = vmatmul.msk.f32.vlgmr.msra.gmra.mxu3 %vm206_vm7, %v4506_v35 }
  0x64   :  { %4017 = vmatpush.msk.msra.mxu3 %vm124_vm0, %v4468_v22  ;;  %v847_v22 = vsel %vm124_vm0, %v4407_v5, %v4839_v18 }
  0x67   :  { %3922 = vmatmul.msk.f32.gmra.mxu0 %vm206_vm7, %v4689_v56 }
  0x68   :  { %3938 = vmatmul.msk.f32.gmra.mxu2 %vm206_vm7, %v4616_v21 }
  0x6a   :  { %3931 = vmatmul.msk.f32.gmra.mxu1 %vm206_vm7, %v4689_v56 }
  0x6b   :  { %3947 = vmatmul.msk.f32.gmra.mxu3 %vm206_vm7, %v4616_v21 }
  0x6f   :  { %3923 = vmatmul.msk.f32.gmra.mxu0 %vm206_vm7, %v4731_v43 }
  0x70   :  { %3939 = vmatmul.msk.f32.gmra.mxu2 %vm206_vm7, %v4647_v33 }
  0x72   :  { %3932 = vmatmul.msk.f32.gmra.mxu1 %vm206_vm7, %v4731_v43 }
  0x73   :  { %3948 = vmatmul.msk.f32.gmra.mxu3 %vm206_vm7, %v4647_v33 }
  0x77   :  { %3924 = vmatmul.msk.f32.gmra.mxu0 %vm206_vm7, %v4760_v3 }
  0x78   :  { %3940 = vmatmul.msk.f32.gmra.mxu2 %vm206_vm7, %v4689_v56 }
  0x7a   :  { %3933 = vmatmul.msk.f32.gmra.mxu1 %vm206_vm7, %v4760_v3 }
  0x7b   :  { %3949 = vmatmul.msk.f32.gmra.mxu3 %vm206_vm7, %v4689_v56 }
  0x7f   :  { %3925 = vmatmul.msk.f32.gmra.mxu0 %vm206_vm7, %v4797_v63 }
  0x80   :  { %3941 = vmatmul.msk.f32.gmra.mxu2 %vm206_vm7, %v4731_v43 }
  0x82   :  { %3934 = vmatmul.msk.f32.gmra.mxu1 %vm206_vm7, %v4797_v63 }
  0x83   :  { %3950 = vmatmul.msk.f32.gmra.mxu3 %vm206_vm7, %v4731_v43 }
  0x87   :  { %3926 = vmatmul.msk.f32.gmra.mxu0 %vm206_vm7, %v4511_v36 }
  0x88   :  { %3942 = vmatmul.msk.f32.gmra.mxu2 %vm206_vm7, %v4760_v3 }
  0x8a   :  { %3935 = vmatmul.msk.f32.gmra.mxu1 %vm206_vm7, %v4511_v36 }
  0x8b   :  { %3951 = vmatmul.msk.f32.gmra.mxu3 %vm206_vm7, %v4760_v3 }
  0x8f   :  { %3955 = vmatmul.msk.f32.vlgmr.msra.gmra.mxu0 %vm206_vm7, %v4506_v35 }
  0x90   :  { %3943 = vmatmul.msk.f32.gmra.mxu2 %vm206_vm7, %v4797_v63 }
  0x92   :  { %3964 = vmatmul.msk.f32.vlgmr.msra.gmra.mxu1 %vm206_vm7, %v4506_v35 }
  0x93   :  { %3952 = vmatmul.msk.f32.gmra.mxu3 %vm206_vm7, %v4797_v63 }
  0x94   :  { %v4968_v57 = vpop.f32.mrf.mxu0 }
  0x95   :  { %9424 = vst [vmem:[#allocation41_spill] sm:$0xff] %v4968_v57 }
  0x97   :  { %v4970_v58 = vpop.f32.mrf.mxu1  ;;  %3956 = vmatmul.msk.f32.gmra.mxu0 %vm206_vm7, %v4616_v21 }
  0x98   :  { %3944 = vmatmul.msk.f32.gmra.mxu2 %vm206_vm7, %v4511_v36 }
  0x9a   :  { %3965 = vmatmul.msk.f32.gmra.mxu1 %vm206_vm7, %v4616_v21  ;;  %v4980_v60 = vpop.f32.mrf.mxu2 }
  0x9b   :  { %3953 = vmatmul.msk.f32.gmra.mxu3 %vm206_vm7, %v4511_v36  ;;  %9425 = vst [vmem:[#allocation42_spill] sm:$0xff] %v4980_v60 }
  0x9c   :  { %v4982_v15 = vpop.f32.mrf.mxu0 }
  0x9d   :  { %9426 = vst [vmem:[#allocation43_spill] sm:$0xff] %v4982_v15  ;;  %v4984_v29 = vpop.f32.mrf.mxu3 }
  0x9f   :  { %v4986_v31 = vpop.f32.mrf.mxu1  ;;  %3957 = vmatmul.msk.f32.gmra.mxu0 %vm206_vm7, %v4647_v33 }
  0xa0   :  { %3973 = vmatmul.msk.f32.vlgmr.msrb.gmra.mxu2 %vm206_vm7, %v4506_v35 }
  0xa2   :  { %3966 = vmatmul.msk.f32.gmra.mxu1 %vm206_vm7, %v4647_v33 }
  0xa3   :  { %3982 = vmatmul.msk.f32.vlgmr.msrb.gmra.mxu3 %vm206_vm7, %v4506_v35  ;;  %v4996_v54 = vpop.f32.mrf.mxu2 }
  0xa4   :  { %v4998_v59 = vpop.f32.mrf.mxu0 }
  0xa5   :  { %9427 = vst [vmem:[#allocation44_spill] sm:$0xff] %v4998_v59  ;;  %v852_v59 = vsel %vm130_vm1, %v847_v22, %v4516_v37 }
  0xa6   :  { %v5000_v28 = vpop.f32.mrf.mxu3  ;;  %v857_v57 = vsel %vm136_vm2, %v852_v59, %v4401_v2 }
  0xa7   :  { %9428 = vst [vmem:[#allocation45_spill] sm:$0xff] %v5000_v28  ;;  %v5002_v46 = vpop.f32.mrf.mxu1  ;;  %3958 = vmatmul.msk.f32.gmra.mxu0 %vm206_vm7, %v4689_v56  ;;  %v846_v28 = vsel %vm124_vm0, %v4404_v4, %v4836_v16  ;;  %v862_v11 = vsel %vm142_vm3, %v857_v57, %v4543_v47 }
  0xa8   :  { %9429 = vst [vmem:[#allocation46_spill] sm:$0xff] %v5002_v46  ;;  %3974 = vmatmul.msk.f32.gmra.mxu2 %vm206_vm7, %v4616_v21  ;;  %v851_v12 = vsel %vm130_vm1, %v846_v28, %v4476_v24  ;;  %v867_v22 = vsel %vm148_vm4, %v862_v11, %v4557_v51 }
  0xa9   :  { %v856_v45 = vsel %vm136_vm2, %v851_v12, %v4396_v1 }
  0xaa   :  { %3967 = vmatmul.msk.f32.gmra.mxu1 %vm206_vm7, %v4689_v56  ;;  %v861_v23 = vsel %vm142_vm3, %v856_v45, %v4519_v38  ;;  %v872_v45 = vsel %vm154_vm5, %v867_v22, %v4460_v19 }
  0xab   :  { %3983 = vmatmul.msk.f32.gmra.mxu3 %vm206_vm7, %v4616_v21  ;;  %v5012_v10 = vpop.f32.mrf.mxu2  ;;  %v866_v28 = vsel %vm148_vm4, %v861_v23, %v4522_v39  ;;  %v877_v11 = vsel %vm160_vm6, %v872_v45, %v4569_v55  ;;  %v9105_v45 = vrot.slane %v4412_v6, 3 }
  0xac   :  { %v5024_v15 = vpop.f32.mrf.mxu0  ;;  %v871_v12 = vsel %vm154_vm5, %v866_v28, %v4420_v8  ;;  %1027 = vmatpush.msrb.mxu1 %v877_v11 }
  0xad   :  { %9430 = vst [vmem:[#allocation47_spill] sm:$0xff] %v5024_v15  ;;  %v876_v23 = vsel %vm160_vm6, %v871_v12, %v4529_v42  ;;  %v5075_v12 = vrot.slane %v4516_v37, 1 }
  0xae   :  { %v5030_v60 = vpop.f32.mrf.mxu3  ;;  %986 = vmatpush.msrb.mxu0 %v876_v23  ;;  %4035 = vmatpush.msk.msra.mxu1 %vm124_vm0, %v4569_v55  ;;  %v1179_v55 = vsel %vm124_vm0, %v9105_v45, %v4903_v61  ;;  %v5223_v61 = vpop.permute.xlu2 %183 }
  0xaf   :  { %9431 = vst [vmem:[#allocation48_spill] sm:$0xff] %v5030_v60  ;;  %v5040_v15 = vpop.f32.mrf.mxu1  ;;  %3959 = vmatmul.msk.f32.gmra.mxu0 %vm206_vm7, %v4731_v43  ;;  %v848_v11 = vsel %vm124_vm0, %v4497_v32, %v5075_v12 }
  0xb0   :  { %9432 = vst [vmem:[#allocation49_spill] sm:$0xff] %v5040_v15  ;;  %3975 = vmatmul.msk.f32.gmra.mxu2 %vm206_vm7, %v4647_v33  ;;  %4026 = vmatpush.msk.msra.mxu0 %vm124_vm0, %v4529_v42  ;;  %v853_v42 = vsel %vm130_vm1, %v848_v11, %v4593_v62 }
  0xb2   :  { %3968 = vmatmul.msk.f32.gmra.mxu1 %vm206_vm7, %v4731_v43 }
  0xb3   :  { %3984 = vmatmul.msk.f32.gmra.mxu3 %vm206_vm7, %v4647_v33  ;;  %v5058_v57 = vpop.f32.mrf.mxu2 }
  0xb4   :  { %v5064_v59 = vpop.f32.mrf.mxu0 }
  0xb5   :  { %9433 = vst [vmem:[#allocation50_spill] sm:$0xff] %v5064_v59  ;;  %v858_v59 = vsel %vm136_vm2, %v853_v42, %v4476_v24 }
  0xb6   :  { %v5066_v28 = vpop.f32.mrf.mxu3  ;;  %v863_v46 = vsel %vm142_vm3, %v858_v59, %v4654_v34 }
  0xb7   :  { %9434 = vst [vmem:[#allocation51_spill] sm:$0xff] %v5066_v28  ;;  %v5068_v22 = vpop.f32.mrf.mxu1  ;;  %3960 = vmatmul.msk.f32.gmra.mxu0 %vm206_vm7, %v4760_v3  ;;  %v1184_v28 = vsel %vm130_vm1, %v1179_v55, %v4741_v52  ;;  %v868_v11 = vsel %vm148_vm4, %v863_v46, %v4660_v41 }
  0xb8   :  { %9435 = vst [vmem:[#allocation52_spill] sm:$0xff] %v5068_v22  ;;  %3976 = vmatmul.msk.f32.gmra.mxu2 %vm206_vm7, %v4689_v56  ;;  %v1189_v22 = vsel %vm136_vm2, %v1184_v28, %v4657_v40  ;;  %v873_v42 = vsel %vm154_vm5, %v868_v11, %v4522_v39 }
  0xb9   :  { %v1194_v45 = vsel %vm142_vm3, %v1189_v22, %v4417_v7  ;;  %v878_v46 = vsel %vm160_vm6, %v873_v42, %v4670_v44 }
  0xba   :  { %3969 = vmatmul.msk.f32.gmra.mxu1 %vm206_vm7, %v4760_v3  ;;  %v1199_v55 = vsel %vm148_vm4, %v1194_v45, %v4455_v17  ;;  %1068 = vmatpush.msra.mxu2 %v878_v46  ;;  %v5155_v46 = vpop.permute.xlu1 %193 }
  0xbb   :  { %3985 = vmatmul.msk.f32.gmra.mxu3 %vm206_vm7, %v4689_v56  ;;  %v5082_v23 = vpop.f32.mrf.mxu2  ;;  %v1204_v7 = vsel %vm154_vm5, %v1199_v55, %v4679_v50 }
  0xbc   :  { %v5095_v60 = vpop.f32.mrf.mxu0  ;;  %v1209_v59 = vsel %vm160_vm6, %v1204_v7, %v4463_v20  ;;  %4044 = vmatpush.msk.msrb.mxu2 %vm124_vm0, %v4670_v44 }
  0xbd   :  { %9436 = vst [vmem:[#allocation53_spill] sm:$0xff] %v5095_v60  ;;  %1239 = vmatpush.msra.mxu3 %v1209_v59 }
  0xbe   :  { %v5101_v15 = vpop.f32.mrf.mxu3 }
  0xbf   :  { %9437 = vst [vmem:[#allocation54_spill] sm:$0xff] %v5101_v15  ;;  %v5111_v60 = vpop.f32.mrf.mxu1  ;;  %3961 = vmatmul.msk.f32.gmra.mxu0 %vm206_vm7, %v4797_v63  ;;  %4053 = vmatpush.msk.msrb.mxu3 %vm124_vm0, %v4853_v30 }
  0xc0   :  { %9438 = vst [vmem:[#allocation55_spill] sm:$0xff] %v5111_v60  ;;  %3977 = vmatmul.msk.f32.gmra.mxu2 %vm206_vm7, %v4731_v43 }
  0xc2   :  { %3970 = vmatmul.msk.f32.gmra.mxu1 %vm206_vm7, %v4797_v63 }
  0xc3   :  { %3986 = vmatmul.msk.f32.gmra.mxu3 %vm206_vm7, %v4731_v43  ;;  %v5129_v28 = vpop.f32.mrf.mxu2 }
  0xc4   :  { %v5135_v22 = vpop.f32.mrf.mxu0 }
  0xc5   :  { %9439 = vst [vmem:[#allocation56_spill] sm:$0xff] %v5135_v22 }
  0xc6   :  { %v5137_v45 = vpop.f32.mrf.mxu3 }
  0xc7   :  { %9440 = vst [vmem:[#allocation57_spill] sm:$0xff] %v5137_v45  ;;  %v5139_v11 = vpop.f32.mrf.mxu1  ;;  %3962 = vmatmul.msk.f32.gmra.mxu0 %vm206_vm7, %v4511_v36  ;;  %v5181_v45 = vpop.permute.xlu1 %188 }
  0xc8   :  { %9441 = vst [vmem:[#allocation58_spill] sm:$0xff] %v5139_v11  ;;  %3978 = vmatmul.msk.f32.gmra.mxu2 %vm206_vm7, %v4760_v3 }
  0xca   :  { %3971 = vmatmul.msk.f32.gmra.mxu1 %vm206_vm7, %v4511_v36 }
  0xcb   :  { %3987 = vmatmul.msk.f32.gmra.mxu3 %vm206_vm7, %v4760_v3  ;;  %v5149_v55 = vpop.f32.mrf.mxu2 }
  0xcc   :  { %v5151_v42 = vpop.f32.mrf.mxu0 }
  0xcd   :  { %9442 = vst [vmem:[#allocation59_spill] sm:$0xff] %v5151_v42 }
  0xce   :  { %v5153_v7 = vpop.f32.mrf.mxu3 }
  0xcf   :  { %9443 = vst [vmem:[#allocation60_spill] sm:$0xff] %v5153_v7  ;;  %v5157_v59 = vpop.f32.mrf.mxu1  ;;  %3991 = vmatmul.msk.f32.vlgmr.msrb.gmra.mxu0 %vm206_vm7, %v4506_v35  ;;  %v5173_v7 = vpop.permute.xlu0 %203 }
  0xd0   :  { %9444 = vst [vmem:[#allocation61_spill] sm:$0xff] %v5157_v59  ;;  %3979 = vmatmul.msk.f32.gmra.mxu2 %vm206_vm7, %v4797_v63 }
  0xd1   :  { %9447 = vst [vmem:[#allocation64_spill] sm:$0xff] %v5173_v7 }
  0xd2   :  { %4000 = vmatmul.msk.f32.vlgmr.msrb.gmra.mxu1 %vm206_vm7, %v4506_v35 }
  0xd3   :  { %3988 = vmatmul.msk.f32.gmra.mxu3 %vm206_vm7, %v4797_v63  ;;  %v5167_v30 = vpop.f32.mrf.mxu2 }
  0xd4   :  { %v5169_v50 = vpop.f32.mrf.mxu0 }
  0xd5   :  { %9445 = vst [vmem:[#allocation62_spill] sm:$0xff] %v5169_v50 }
  0xd6   :  { %v5171_v44 = vpop.f32.mrf.mxu3 }
  0xd7   :  { %9446 = vst [vmem:[#allocation63_spill] sm:$0xff] %v5171_v44  ;;  %v5175_v20 = vpop.f32.mrf.mxu1  ;;  %3992 = vmatmul.msk.f32.gmra.mxu0 %vm206_vm7, %v4616_v21  ;;  %v5199_v22 = vpop.permute.xlu0 %198 }
  0xd8   :  { %9448 = vst [vmem:[#allocation65_spill] sm:$0xff] %v5175_v20  ;;  %3980 = vmatmul.msk.f32.gmra.mxu2 %vm206_vm7, %v4511_v36 }
  0xda   :  { %4001 = vmatmul.msk.f32.gmra.mxu1 %vm206_vm7, %v4616_v21 }
  0xdb   :  { %3989 = vmatmul.msk.f32.gmra.mxu3 %vm206_vm7, %v4511_v36  ;;  %v5187_v15 = vpop.f32.mrf.mxu2 }
  0xdc   :  { %v5189_v44 = vpop.f32.mrf.mxu0 }
  0xdd   :  { %9449 = vst [vmem:[#allocation66_spill] sm:$0xff] %v5189_v44  ;;  %v5207_v44 = vpop.permute.xlu1 %168 }
  0xde   :  { %v5191_v50 = vpop.f32.mrf.mxu3  ;;  %9452 = vst [vmem:[#allocation69_spill] sm:$0xff] %v5207_v44 }
  0xdf   :  { %9450 = vst [vmem:[#allocation67_spill] sm:$0xff] %v5191_v50  ;;  %v5193_v42 = vpop.f32.mrf.mxu1  ;;  %3993 = vmatmul.msk.f32.gmra.mxu0 %vm206_vm7, %v4647_v33  ;;  %v5211_v50 = vadd.f32 %v4996_v54, %v5207_v44 }
  0xe0   :  { %9451 = vst [vmem:[#allocation68_spill] sm:$0xff] %v5193_v42  ;;  %4009 = vmatmul.msk.f32.vlgmr.msra.gmra.mxu2 %vm206_vm7, %v4506_v35 }
  0xe1   :  { %9453 = vst [vmem:[#allocation70_spill] sm:$0xff] %v5211_v50  ;;  %v9116_v60 = vmax.f32 %v5211_v50, 0.0 }
  0xe2   :  { %4002 = vmatmul.msk.f32.gmra.mxu1 %vm206_vm7, %v4647_v33 }
  0xe3   :  { %4018 = vmatmul.msk.f32.vlgmr.msra.gmra.mxu3 %vm206_vm7, %v4506_v35  ;;  %v5205_v40 = vpop.f32.mrf.mxu2 }
  0xe4   :  { %v5213_v42 = vpop.f32.mrf.mxu0 }
  0xe5   :  { %9454 = vst [vmem:[#allocation71_spill] sm:$0xff] %v5213_v42  ;;  %v1180_v42 = vsel %vm124_vm0, %v4442_v14, %v4404_v4 }
  0xe6   :  { %v649_v20 = vpop.f32.mrf.mxu3 }
  0xe7   :  { %v650_v59 = vadd.f32 %v649_v20, %v5207_v44  ;;  %v5216_v11 = vpop.f32.mrf.mxu1  ;;  %3994 = vmatmul.msk.f32.gmra.mxu0 %vm206_vm7, %v4689_v56 }
  0xe8   :  { %9455 = vst [vmem:[#allocation72_spill] sm:$0xff] %v5216_v11  ;;  %4010 = vmatmul.msk.f32.gmra.mxu2 %vm206_vm7, %v4616_v21  ;;  %v5241_v11 = vpop.permute.xlu0 %173 }
  0xe9   :  { %v757_v41 = vmax.f32 %v650_v59, 0.0  ;;  %v1181_v59 = vsel %vm124_vm0, %v4484_v27, %v4407_v5  ;;  %v5249_v50 = vadd.f32 %v5012_v10, %v5241_v11 }
  0xea   :  { %4003 = vmatmul.msk.f32.gmra.mxu1 %vm206_vm7, %v4689_v56 }
  0xeb   :  { %v5227_v54 = vadd.f32 %v757_v41, %v9116_v60  ;;  %4019 = vmatmul.msk.f32.gmra.mxu3 %vm206_vm7, %v4616_v21  ;;  %v5233_v20 = vpop.f32.mrf.mxu2  ;;  %v1185_v41 = vsel %vm130_vm1, %v1180_v42, %v4836_v16  ;;  %v1186_v60 = vsel %vm130_vm1, %v1181_v59, %v4839_v18  ;;  %9457 = vst [vmem:[#allocation74_spill] sm:$0xff] %v5249_v50 }
  0xec   :  { %v1190_v6 = vsel %vm136_vm2, %v1185_v41, %v4738_v48  ;;  %v1191_v5 = vsel %vm136_vm2, %v1186_v60, %v4741_v52  ;;  %v5291_v41 = vpop.permute.xlu2 %178 }
  0xed   :  { %9456 = vst [vmem:[#allocation73_spill] sm:$0xff] %v5227_v54  ;;  %v5251_v54 = vpop.f32.mrf.mxu0  ;;  %v1195_v26 = vsel %vm142_vm3, %v1190_v6, %v4396_v1  ;;  %v1196_v42 = vsel %vm142_vm3, %v1191_v5, %v4401_v2 }
  0xee   :  { %9458 = vst [vmem:[#allocation75_spill] sm:$0xff] %v5251_v54  ;;  %v652_v4 = vpop.f32.mrf.mxu3  ;;  %v1200_v10 = vsel %vm148_vm4, %v1195_v26, %v4519_v38  ;;  %v1201_v54 = vsel %vm148_vm4, %v1196_v42, %v4543_v47  ;;  %v5299_v42 = vadd.f32 %v5058_v57, %v5291_v41 }
  0xef   :  { %v653_v59 = vadd.f32 %v652_v4, %v5241_v11  ;;  %v5266_v27 = vpop.f32.mrf.mxu1  ;;  %3995 = vmatmul.msk.f32.gmra.mxu0 %vm206_vm7, %v4731_v43  ;;  %v1205_v1 = vsel %vm154_vm5, %v1200_v10, %v4423_v9  ;;  %v1206_v2 = vsel %vm154_vm5, %v1201_v54, %v4455_v17  ;;  %v9128_v4 = vmax.f32 %v5249_v50, 0.0 }
  0xf0   :  { %4011 = vmatmul.msk.f32.gmra.mxu2 %vm206_vm7, %v4647_v33  ;;  %v1210_v6 = vsel %vm160_vm6, %v1205_v1, %v4420_v8  ;;  %v1211_v26 = vsel %vm160_vm6, %v1206_v2, %v4460_v19  ;;  %9460 = vst [vmem:[#allocation77_spill] sm:$0xff] %v5299_v42  ;;  %v5335_v50 = vadd.f32 %v5082_v23, %v5223_v61 }
  0xf1   :  { %v762_v5 = vmax.f32 %v653_v59, 0.0  ;;  %1280 = vmatpush.msra.mxu0 %v1210_v6  ;;  %1321 = vmatpush.msra.mxu1 %v1211_v26  ;;  %v9136_v26 = vrot.slane %v4593_v62, 1 }
  0xf2   :  { %4004 = vmatmul.msk.f32.gmra.mxu1 %vm206_vm7, %v4731_v43  ;;  %9463 = vst [vmem:[#allocation80_spill] sm:$0xff] %v5335_v50 }
  0xf3   :  { %v5283_v60 = vadd.f32 %v762_v5, %v9128_v4  ;;  %4020 = vmatmul.msk.f32.gmra.mxu3 %vm206_vm7, %v4647_v33  ;;  %v5289_v54 = vpop.f32.mrf.mxu2  ;;  %4062 = vmatpush.msk.msrb.mxu0 %vm124_vm0, %v4420_v8  ;;  %v9129_v5 = vmax.f32 %v5299_v42, 0.0  ;;  %v1182_v4 = vsel %vm124_vm0, %v4564_v53, %v4497_v32 }
  0xf4   :  { %4071 = vmatpush.msk.msrb.mxu1 %vm124_vm0, %v4460_v19 }
  0xf5   :  { %9459 = vst [vmem:[#allocation76_spill] sm:$0xff] %v5283_v60  ;;  %v5301_v59 = vpop.f32.mrf.mxu0 }
  0xf6   :  { %9461 = vst [vmem:[#allocation78_spill] sm:$0xff] %v5301_v59  ;;  %v655_v10 = vpop.f32.mrf.mxu3  ;;  %v9485_v59 = vld [vmem:[#allocation20_spill] sm:$0xff] }
  0xf7   :  { %v656_v1 = vadd.f32 %v655_v10, %v5291_v41  ;;  %v5304_v2 = vpop.f32.mrf.mxu1  ;;  %3996 = vmatmul.msk.f32.gmra.mxu0 %vm206_vm7, %v4760_v3 }
  0xf8   :  { %4012 = vmatmul.msk.f32.gmra.mxu2 %vm206_vm7, %v4689_v56 }
  0xf9   :  { %v767_v6 = vmax.f32 %v656_v1, 0.0  ;;  %v1183_v1 = vsel %vm124_vm0, %v4600_v0, %v4552_v49 }
  0xfa   :  { %4005 = vmatmul.msk.f32.gmra.mxu1 %vm206_vm7, %v4760_v3 }
  0xfb   :  { %v5314_v57 = vadd.f32 %v767_v6, %v9129_v5  ;;  %4021 = vmatmul.msk.f32.gmra.mxu3 %vm206_vm7, %v4689_v56  ;;  %v5320_v10 = vpop.f32.mrf.mxu2  ;;  %v1187_v6 = vsel %vm130_vm1, %v1182_v4, %v5075_v12  ;;  %v1188_v5 = vsel %vm130_vm1, %v1183_v1, %v9136_v26 }
  0xfc   :  { %v1193_v19 = vsel %vm136_vm2, %v1188_v5, %v4839_v18 }
  0xfd   :  { %9462 = vst [vmem:[#allocation79_spill] sm:$0xff] %v5314_v57  ;;  %v5337_v42 = vpop.f32.mrf.mxu0  ;;  %v1192_v57 = vsel %vm136_vm2, %v1187_v6, %v4836_v16  ;;  %v1198_v60 = vsel %vm142_vm3, %v1193_v19, %v4516_v37  ;;  %v9137_v19 = vmax.f32 %v5335_v50, 0.0  ;;  %v5383_v6 = vadd.f32 %v5129_v28, %v5181_v45 }
  0xfe   :  { %9464 = vst [vmem:[#allocation81_spill] sm:$0xff] %v5337_v42  ;;  %v658_v8 = vpop.f32.mrf.mxu3  ;;  %v1197_v4 = vsel %vm142_vm3, %v1192_v57, %v4476_v24  ;;  %v1203_v26 = vsel %vm148_vm4, %v1198_v60, %v4842_v25 }
  0xff   :  { %v659_v1 = vadd.f32 %v658_v8, %v5223_v61  ;;  %v1202_v23 = vsel %vm148_vm4, %v1197_v4, %v4654_v34  ;;  %v5352_v42 = vpop.f32.mrf.mxu1  ;;  %3997 = vmatmul.msk.f32.gmra.mxu0 %vm206_vm7, %v4797_v63  ;;  %v1208_v8 = vsel %vm154_vm5, %v1203_v26, %v4543_v47  ;;  %9466 = vst [vmem:[#allocation83_spill] sm:$0xff] %v5383_v6 }
 0x100   :  { %4013 = vmatmul.msk.f32.gmra.mxu2 %vm206_vm7, %v4731_v43  ;;  %v1207_v24 = vsel %vm154_vm5, %v1202_v23, %v4519_v38  ;;  %v1213_v5 = vsel %vm160_vm6, %v1208_v8, %v4557_v51  ;;  %v9139_v8 = vmax.f32 %v5383_v6, 0.0  ;;  %v5431_v6 = vadd.f32 %v5167_v30, %v5199_v22 }
 0x101   :  { %v772_v37 = vmax.f32 %v659_v1, 0.0  ;;  %v1212_v60 = vsel %vm160_vm6, %v1207_v24, %v4522_v39  ;;  %1403 = vmatpush.msrb.mxu3 %v1213_v5  ;;  %v5407_v5 = vadd.f32 %v5149_v55, %v5155_v46  ;;  %v5445_v30 = vadd.f32 %v4984_v29, %v5173_v7 }
 0x102   :  { %1362 = vmatpush.msrb.mxu2 %v1212_v60  ;;  %4006 = vmatmul.msk.f32.gmra.mxu1 %vm206_vm7, %v4797_v63  ;;  %9471 = vst [vmem:[#allocation88_spill] sm:$0xff] %v5431_v6 }
 0x103   :  { %v5369_v57 = vadd.f32 %v772_v37, %v9137_v19  ;;  %4022 = vmatmul.msk.f32.gmra.mxu3 %vm206_vm7, %v4731_v43  ;;  %v5375_v26 = vpop.f32.mrf.mxu2  ;;  %9469 = vst [vmem:[#allocation86_spill] sm:$0xff] %v5407_v5  ;;  %v9148_v29 = vmax.f32 %v5445_v30, 0.0 }
 0x104   :  { %4080 = vmatpush.msk.msra.mxu2 %vm124_vm0, %v4522_v39  ;;  %4089 = vmatpush.msk.msra.mxu3 %vm124_vm0, %v4557_v51  ;;  %9474 = vst [vmem:[#allocation91_spill] sm:$0xff] %v5445_v30 }
 0x105   :  { %9465 = vst [vmem:[#allocation82_spill] sm:$0xff] %v5369_v57  ;;  %v5385_v4 = vpop.f32.mrf.mxu0 }
 0x106   :  { %9467 = vst [vmem:[#allocation84_spill] sm:$0xff] %v5385_v4  ;;  %v661_v1 = vpop.f32.mrf.mxu3 }
 0x107   :  { %v662_v23 = vadd.f32 %v661_v1, %v5181_v45  ;;  %v5388_v24 = vpop.f32.mrf.mxu1  ;;  %3998 = vmatmul.msk.f32.gmra.mxu0 %vm206_vm7, %v4511_v36 }
 0x108   :  { %4014 = vmatmul.msk.f32.gmra.mxu2 %vm206_vm7, %v4760_v3 }
 0x109   :  { %v777_v37 = vmax.f32 %v662_v23, 0.0 }
 0x10a   :  { %4007 = vmatmul.msk.f32.gmra.mxu1 %vm206_vm7, %v4511_v36 }
 0x10b   :  { %v5397_v28 = vadd.f32 %v777_v37, %v9139_v8  ;;  %4023 = vmatmul.msk.f32.gmra.mxu3 %vm206_vm7, %v4760_v3  ;;  %v5403_v60 = vpop.f32.mrf.mxu2  ;;  %v9143_v37 = vmax.f32 %v5407_v5, 0.0 }
 0x10d   :  { %9468 = vst [vmem:[#allocation85_spill] sm:$0xff] %v5397_v28  ;;  %v5409_v1 = vpop.f32.mrf.mxu0 }
 0x10e   :  { %v664_v19 = vpop.f32.mrf.mxu3 }
 0x10f   :  { %v665_v23 = vadd.f32 %v664_v19, %v5155_v46  ;;  %v5412_v50 = vpop.f32.mrf.mxu1  ;;  %4027 = vmatmul.msk.f32.vlgmr.msra.gmra.mxu0 %vm206_vm7, %v4506_v35 }
 0x110   :  { %4015 = vmatmul.msk.f32.gmra.mxu2 %vm206_vm7, %v4797_v63 }
 0x111   :  { %v782_v8 = vmax.f32 %v665_v23, 0.0 }
 0x112   :  { %4036 = vmatmul.msk.f32.vlgmr.msra.gmra.mxu1 %vm206_vm7, %v4506_v35 }
 0x113   :  { %v5421_v55 = vadd.f32 %v782_v8, %v9143_v37  ;;  %4024 = vmatmul.msk.f32.gmra.mxu3 %vm206_vm7, %v4797_v63  ;;  %v5427_v19 = vpop.f32.mrf.mxu2  ;;  %v9147_v8 = vmax.f32 %v5431_v6, 0.0 }
 0x115   :  { %9470 = vst [vmem:[#allocation87_spill] sm:$0xff] %v5421_v55  ;;  %v5433_v51 = vpop.f32.mrf.mxu0 }
 0x116   :  { %9472 = vst [vmem:[#allocation89_spill] sm:$0xff] %v5433_v51  ;;  %v667_v28 = vpop.f32.mrf.mxu3 }
 0x117   :  { %v668_v23 = vadd.f32 %v667_v28, %v5199_v22  ;;  %v5436_v5 = vpop.f32.mrf.mxu1  ;;  %4028 = vmatmul.msk.f32.gmra.mxu0 %vm206_vm7, %v4616_v21 }
 0x118   :  { %9473 = vst [vmem:[#allocation90_spill] sm:$0xff] %v5436_v5  ;;  %4016 = vmatmul.msk.f32.gmra.mxu2 %vm206_vm7, %v4511_v36 }
 0x119   :  { %v787_v37 = vmax.f32 %v668_v23, 0.0  ;;  %v5458_v23 = vadd.f32 %v5187_v15, %v5173_v7 }
 0x11a   :  { %4037 = vmatmul.msk.f32.gmra.mxu1 %vm206_vm7, %v4616_v21 }
 0x11b   :  { %v5449_v55 = vadd.f32 %v787_v37, %v9147_v8  ;;  %4025 = vmatmul.msk.f32.gmra.mxu3 %vm206_vm7, %v4511_v36  ;;  %v629_v28 = vpop.f32.mrf.mxu2  ;;  %9476 = vst [vmem:[#allocation93_spill] sm:$0xff] %v5458_v23  ;;  %v9150_v15 = vmax.f32 %v5458_v23, 0.0 }
 0x11c   :  { %v630_v39 = vadd.f32 %v629_v28, %v5173_v7 }
 0x11d   :  { %9475 = vst [vmem:[#allocation92_spill] sm:$0xff] %v5449_v55  ;;  %v5460_v57 = vpop.f32.mrf.mxu0 }
 0x11e   :  { %9477 = vst [vmem:[#allocation94_spill] sm:$0xff] %v5460_v57  ;;  %v791_v6 = vmax.f32 %v630_v39, 0.0  ;;  %v670_v37 = vpop.f32.mrf.mxu3  ;;  %v609_v39 = vadd.f32 %v5205_v40, %v5207_v44 }
 0x11f   :  { %v671_v8 = vadd.f32 %v670_v37, %v5173_v7  ;;  %v5468_v55 = vpop.f32.mrf.mxu1  ;;  %4029 = vmatmul.msk.f32.gmra.mxu0 %vm206_vm7, %v4647_v33  ;;  %v5479_v37 = vadd.f32 %v4970_v58, %v5207_v44 }
 0x120   :  { %v5466_v36 = vadd.f32 %v791_v6, %v9148_v29  ;;  %9478 = vst [vmem:[#allocation95_spill] sm:$0xff] %v5468_v55  ;;  %4045 = vmatmul.msk.f32.vlgmr.msrb.gmra.mxu2 %vm206_vm7, %v4506_v35  ;;  %v756_v30 = vmax.f32 %v609_v39, 0.0 }
 0x121   :  { %v792_v28 = vmax.f32 %v671_v8, 0.0  ;;  %9479 = vst [vmem:[#allocation96_spill] sm:$0xff] %v5479_v37  ;;  %v9154_v8 = vmax.f32 %v5479_v37, 0.0 }
 0x122   :  { %4038 = vmatmul.msk.f32.gmra.mxu1 %vm206_vm7, %v4647_v33 }
 0x123   :  { %v5483_v6 = vadd.f32 %v792_v28, %v9150_v15  ;;  %4054 = vmatmul.msk.f32.vlgmr.msrb.gmra.mxu3 %vm206_vm7, %v4506_v35  ;;  %v5489_v29 = vpop.f32.mrf.mxu2  ;;  %v612_v28 = vadd.f32 %v5233_v20, %v5241_v11  ;;  %v1510_v35 = vsel %vm124_vm0, %v4439_v13, %v4442_v14  ;;  %v796_v39 = vadd.f32 %v756_v30, %v9154_v8  ;;  %v9486_v13 = vld [vmem:[#allocation19_spill] sm:$0xff] }
 0x124   :  { %v1511_v37 = vsel %vm124_vm0, %v9486_v13, %v9485_v59 }
 0x125   :  { %9480 = vst [vmem:[#allocation97_spill] sm:$0xff] %v5483_v6  ;;  %v5491_v4 = vpop.f32.mrf.mxu0  ;;  %v761_v30 = vmax.f32 %v612_v28, 0.0 }
 0x126   :  { %9481 = vst [vmem:[#allocation98_spill] sm:$0xff] %v5491_v4  ;;  %v947_v40 = vpop.f32.mrf.mxu3 }
 0x127   :  { %v948_v58 = vadd.f32 %v947_v40, %v5207_v44  ;;  %v5497_v15 = vpop.f32.mrf.mxu1  ;;  %4030 = vmatmul.msk.f32.gmra.mxu0 %vm206_vm7, %v4689_v56  ;;  %v5510_v40 = vadd.f32 %v4986_v31, %v5241_v11  ;;  %v9488_v31 = vld [vmem:[#allocation6_spill] sm:$0xff] }
 0x128   :  { %9482 = vst [vmem:[#allocation99_spill] sm:$0xff] %v5497_v15  ;;  %4046 = vmatmul.msk.f32.gmra.mxu2 %vm206_vm7, %v4616_v21 }
 0x129   :  { %v1095_v23 = vmax.f32 %v948_v58, 0.0  ;;  %9483 = vst [vmem:[#allocation100_spill] sm:$0xff] %v5510_v40  ;;  %v9487_v58 = vld [vmem:[#allocation5_spill] sm:$0xff]  ;;  %v9157_v62 = vmax.f32 %v5510_v40, 0.0 }
 0x12a   :  { %4039 = vmatmul.msk.f32.gmra.mxu1 %vm206_vm7, %v4689_v56  ;;  %v1515_v8 = vsel %vm130_vm1, %v1510_v35, %v9487_v58 }
 0x12b   :  { %v5512_v20 = vadd.f32 %v1095_v23, %v796_v39  ;;  %4055 = vmatmul.msk.f32.gmra.mxu3 %vm206_vm7, %v4616_v21  ;;  %v5518_v6 = vpop.f32.mrf.mxu2  ;;  %v1516_v23 = vsel %vm130_vm1, %v1511_v37, %v9488_v31  ;;  %v9492_v21 = vld [vmem:[#allocation40_spill] sm:$0xff] }
 0x12c   :  { %v1521_v55 = vsel %vm136_vm2, %v1516_v23, %v9492_v21  ;;  %v4306_v23 = vld [vmem:[%s9073_s0] sm:$0xff] }
 0x12d   :  { %9484 = vst [vmem:[#allocation101_spill] sm:$0xff] %v5512_v20  ;;  %v5527_v39 = vpop.f32.mrf.mxu0  ;;  %v9490_v20 = vld [vmem:[#allocation7_spill] sm:$0xff]  ;;  %v1526_v35 = vsel %vm142_vm3, %v1521_v55, %v4741_v52  ;;  %v801_v55 = vadd.f32 %v761_v30, %v9157_v62  ;;  %v615_v62 = vadd.f32 %v5289_v54, %v5291_v41 }
 0x12e   :  { %9489 = vst [vmem:[#allocation20_spill] sm:$0xff] %v5527_v39  ;;  %v9491_v15 = vrot.slane %v9490_v20, 2  ;;  %v950_v57 = vpop.f32.mrf.mxu3  ;;  %v5543_v39 = vld [vmem:[%s9073_s0 + $0x10] sm:$0xff] }
 0x12f   :  { %v951_v37 = vadd.f32 %v950_v57, %v5241_v11  ;;  %v5556_v57 = vpop.f32.mrf.mxu1  ;;  %4031 = vmatmul.msk.f32.gmra.mxu0 %vm206_vm7, %v4731_v43 }
 0x130   :  { %v1520_v4 = vsel %vm136_vm2, %v1515_v8, %v9491_v15  ;;  %v5550_v8 = vld [vmem:[%s9073_s0 + $0x18] sm:$0xff]  ;;  %9493 = vst [vmem:[#allocation19_spill] sm:$0xff] %v5556_v57  ;;  %4047 = vmatmul.msk.f32.gmra.mxu2 %vm206_vm7, %v4647_v33 }
 0x131   :  { %v1525_v28 = vsel %vm142_vm3, %v1520_v4, %v4738_v48  ;;  %v1531_v4 = vsel %vm148_vm4, %v1526_v35, %v5550_v8  ;;  %v5569_v35 = vld [vmem:[%s9073_s0 + $0x8] sm:$0xff]  ;;  %v1100_v40 = vmax.f32 %v951_v37, 0.0  ;;  %v9497_v37 = vld [vmem:[#allocation34_spill] sm:$0xff] }
 0x132   :  { %v1530_v15 = vsel %vm148_vm4, %v1525_v28, %v5543_v39  ;;  %v1536_v30 = vsel %vm154_vm5, %v1531_v4, %v5569_v35  ;;  %4040 = vmatmul.msk.f32.gmra.mxu1 %vm206_vm7, %v4731_v43 }
 0x133   :  { %v1535_v28 = vsel %vm154_vm5, %v1530_v15, %v4306_v23  ;;  %v1541_v5 = vsel %vm160_vm6, %v1536_v30, %v4455_v17  ;;  %v9494_v15 = vld [vmem:[#allocation46_spill] sm:$0xff]  ;;  %v5583_v51 = vadd.f32 %v1100_v40, %v801_v55  ;;  %4056 = vmatmul.msk.f32.gmra.mxu3 %vm206_vm7, %v4647_v33  ;;  %v5589_v54 = vpop.f32.mrf.mxu2 }
 0x134   :  { %v1540_v57 = vsel %vm160_vm6, %v1535_v28, %v4423_v9  ;;  %1611 = vmatpush.msrb.mxu1 %v1541_v5  ;;  %v5581_v23 = vadd.f32 %v9494_v15, %v5291_v41  ;;  %v766_v5 = vmax.f32 %v615_v62, 0.0  ;;  %v618_v28 = vadd.f32 %v5320_v10, %v5223_v61  ;;  %v9500_v15 = vld [vmem:[#allocation49_spill] sm:$0xff] }
 0x135   :  { %1570 = vmatpush.msrb.mxu0 %v1540_v57  ;;  %9496 = vst [vmem:[#allocation6_spill] sm:$0xff] %v5583_v51  ;;  %v5595_v4 = vpop.f32.mrf.mxu0 }
 0x136   :  { %9495 = vst [vmem:[#allocation5_spill] sm:$0xff] %v5581_v23  ;;  %4107 = vmatpush.msk.msra.mxu1 %vm124_vm0, %v4455_v17  ;;  %v953_v57 = vpop.f32.mrf.mxu3  ;;  %v9161_v40 = vmax.f32 %v5581_v23, 0.0  ;;  %v9503_v17 = vld [vmem:[#allocation11_spill] sm:$0xff] }
 0x137   :  { %4098 = vmatpush.msk.msra.mxu0 %vm124_vm0, %v9497_v37  ;;  %9498 = vst [vmem:[#allocation7_spill] sm:$0xff] %v5595_v4  ;;  %v954_v55 = vadd.f32 %v953_v57, %v5291_v41  ;;  %v5601_v33 = vpop.f32.mrf.mxu1  ;;  %v5611_v37 = vadd.f32 %v9500_v15, %v5223_v61  ;;  %v1512_v23 = vsel %vm124_vm0, %v9503_v17, %v4564_v53  ;;  %v771_v15 = vmax.f32 %v618_v28, 0.0 }
 0x138   :  { %9499 = vst [vmem:[#allocation40_spill] sm:$0xff] %v5601_v33  ;;  %4032 = vmatmul.msk.f32.gmra.mxu0 %vm206_vm7, %v4760_v3  ;;  %4048 = vmatmul.msk.f32.gmra.mxu2 %vm206_vm7, %v4689_v56  ;;  %v806_v62 = vadd.f32 %v766_v5, %v9161_v40  ;;  %v9504_v5 = vld [vmem:[#allocation18_spill] sm:$0xff] }
 0x139   :  { %v1105_v30 = vmax.f32 %v954_v55, 0.0  ;;  %9501 = vst [vmem:[#allocation46_spill] sm:$0xff] %v5611_v37  ;;  %v1513_v55 = vsel %vm124_vm0, %v9504_v5, %v4600_v0  ;;  %v9163_v9 = vmax.f32 %v5611_v37, 0.0  ;;  %v9508_v37 = vld [vmem:[#allocation52_spill] sm:$0xff] }
 0x13a   :  { %4041 = vmatmul.msk.f32.gmra.mxu1 %vm206_vm7, %v4760_v3 }
 0x13b   :  { %v5613_v57 = vadd.f32 %v1105_v30, %v806_v62  ;;  %4057 = vmatmul.msk.f32.gmra.mxu3 %vm206_vm7, %v4689_v56  ;;  %v5619_v10 = vpop.f32.mrf.mxu2  ;;  %v1517_v62 = vsel %vm130_vm1, %v1512_v23, %v4497_v32  ;;  %v1518_v30 = vsel %vm130_vm1, %v1513_v55, %v4552_v49  ;;  %v5646_v55 = vld [vmem:[%s9073_s0 + $0x20] sm:$0xff]  ;;  %v9535_v49 = vld [vmem:[#allocation38_spill] sm:$0xff] }
 0x13c   :  { %v1522_v56 = vsel %vm136_vm2, %v1517_v62, %v9487_v58 }
 0x13d   :  { %9502 = vst [vmem:[#allocation34_spill] sm:$0xff] %v5613_v57  ;;  %v5631_v40 = vpop.f32.mrf.mxu0  ;;  %v1523_v57 = vsel %vm136_vm2, %v1518_v30, %v9488_v31  ;;  %v1527_v28 = vsel %vm142_vm3, %v1522_v56, %v4836_v16  ;;  %v5653_v30 = vld [vmem:[%s9073_s0 + $0x28] sm:$0xff] }
 0x13e   :  { %9505 = vst [vmem:[#allocation49_spill] sm:$0xff] %v5631_v40  ;;  %v956_v51 = vpop.f32.mrf.mxu3  ;;  %v1528_v23 = vsel %vm142_vm3, %v1523_v57, %v4839_v18  ;;  %v1532_v62 = vsel %vm148_vm4, %v1527_v28, %v5646_v55  ;;  %v811_v57 = vadd.f32 %v771_v15, %v9163_v9 }
 0x13f   :  { %v957_v33 = vadd.f32 %v956_v51, %v5223_v61  ;;  %9506 = vst [vmem:[#allocation11_spill] sm:$0xff] %v5653_v30  ;;  %v1533_v56 = vsel %vm148_vm4, %v1528_v23, %v5653_v30  ;;  %v5659_v51 = vpop.f32.mrf.mxu1  ;;  %v1537_v28 = vsel %vm154_vm5, %v1532_v62, %v5543_v39  ;;  %v621_v23 = vadd.f32 %v5375_v26, %v5181_v45 }
 0x140   :  { %9507 = vst [vmem:[#allocation18_spill] sm:$0xff] %v5659_v51  ;;  %4033 = vmatmul.msk.f32.gmra.mxu0 %vm206_vm7, %v4797_v63  ;;  %4049 = vmatmul.msk.f32.gmra.mxu2 %vm206_vm7, %v4731_v43  ;;  %v1538_v40 = vsel %vm154_vm5, %v1533_v56, %v5550_v8  ;;  %v1542_v15 = vsel %vm160_vm6, %v1537_v28, %v4519_v38 }
 0x141   :  { %v1110_v4 = vmax.f32 %v957_v33, 0.0  ;;  %v1543_v9 = vsel %vm160_vm6, %v1538_v40, %v4543_v47  ;;  %1652 = vmatpush.msra.mxu2 %v1542_v15  ;;  %v5677_v51 = vadd.f32 %v9508_v37, %v5181_v45  ;;  %v624_v28 = vadd.f32 %v5403_v60, %v5155_v46  ;;  %v9513_v15 = vld [vmem:[#allocation55_spill] sm:$0xff] }
 0x142   :  { %1693 = vmatpush.msra.mxu3 %v1543_v9  ;;  %4042 = vmatmul.msk.f32.gmra.mxu1 %vm206_vm7, %v4797_v63  ;;  %v776_v9 = vmax.f32 %v621_v23, 0.0 }
 0x143   :  { %9509 = vst [vmem:[#allocation52_spill] sm:$0xff] %v5677_v51  ;;  %v5679_v62 = vadd.f32 %v1110_v4, %v811_v57  ;;  %4058 = vmatmul.msk.f32.gmra.mxu3 %vm206_vm7, %v4731_v43  ;;  %v5685_v26 = vpop.f32.mrf.mxu2  ;;  %4116 = vmatpush.msk.msrb.mxu2 %vm124_vm0, %v4519_v38  ;;  %v9168_v4 = vmax.f32 %v5677_v51, 0.0  ;;  %v5700_v43 = vld [vmem:[%s9074_s1 + $0x38] sm:$0xff]  ;;  %v781_v51 = vmax.f32 %v624_v28, 0.0  ;;  %v627_v28 = vadd.f32 %v5427_v19, %v5199_v22 }
 0x144   :  { %4125 = vmatpush.msk.msrb.mxu3 %vm124_vm0, %v4543_v47  ;;  %v589_v19 = vadd.f32 %v5388_v24, %v5173_v7 }
 0x145   :  { %9510 = vst [vmem:[#allocation102_spill] sm:$0xff] %v5679_v62  ;;  %v5691_v40 = vpop.f32.mrf.mxu0  ;;  %v816_v57 = vadd.f32 %v776_v9, %v9168_v4 }
 0x146   :  { %9511 = vst [vmem:[#allocation103_spill] sm:$0xff] %v5691_v40  ;;  %v959_v33 = vpop.f32.mrf.mxu3 }
 0x147   :  { %v960_v37 = vadd.f32 %v959_v33, %v5181_v45  ;;  %v5695_v56 = vpop.f32.mrf.mxu1  ;;  %v5712_v33 = vadd.f32 %v9513_v15, %v5155_v46 }
 0x148   :  { %9512 = vst [vmem:[#allocation104_spill] sm:$0xff] %v5695_v56  ;;  %4034 = vmatmul.msk.f32.gmra.mxu0 %vm206_vm7, %v5700_v43  ;;  %4050 = vmatmul.msk.f32.gmra.mxu2 %vm206_vm7, %v4760_v3 }
 0x149   :  { %v1115_v23 = vmax.f32 %v960_v37, 0.0  ;;  %9514 = vst [vmem:[#allocation55_spill] sm:$0xff] %v5712_v33  ;;  %v9170_v60 = vmax.f32 %v5712_v33, 0.0  ;;  %v786_v33 = vmax.f32 %v627_v28, 0.0  ;;  %v5770_v28 = vld [vmem:[%s9074_s1 + $0x8] sm:$0xff] }
 0x14a   :  { %4043 = vmatmul.msk.f32.gmra.mxu1 %vm206_vm7, %v5700_v43 }
 0x14b   :  { %v5714_v47 = vadd.f32 %v1115_v23, %v816_v57  ;;  %4059 = vmatmul.msk.f32.gmra.mxu3 %vm206_vm7, %v4760_v3  ;;  %v5720_v38 = vpop.f32.mrf.mxu2  ;;  %v5733_v57 = vld [vmem:[%s9074_s1] sm:$0xff]  ;;  %v821_v3 = vadd.f32 %v781_v51, %v9170_v60  ;;  %v9517_v23 = vld [vmem:[#allocation58_spill] sm:$0xff] }
 0x14d   :  { %9515 = vst [vmem:[#allocation105_spill] sm:$0xff] %v5714_v47  ;;  %v5722_v9 = vpop.f32.mrf.mxu0  ;;  %v5743_v47 = vadd.f32 %v9517_v23, %v5199_v22 }
 0x14e   :  { %9516 = vst [vmem:[#allocation106_spill] sm:$0xff] %v5722_v9  ;;  %v962_v4 = vpop.f32.mrf.mxu3 }
 0x14f   :  { %v963_v37 = vadd.f32 %v962_v4, %v5155_v46  ;;  %v5726_v15 = vpop.f32.mrf.mxu1  ;;  %9518 = vst [vmem:[#allocation58_spill] sm:$0xff] %v5743_v47  ;;  %v9172_v23 = vmax.f32 %v5743_v47, 0.0 }
 0x150   :  { %4051 = vmatmul.msk.f32.gmra.mxu2 %vm206_vm7, %v4797_v63  ;;  %4063 = vmatmul.msk.f32.vlgmr.msrb.gmra.mxu0 %vm206_vm7, %v5733_v57 }
 0x151   :  { %v1120_v4 = vmax.f32 %v963_v37, 0.0  ;;  %v826_v24 = vadd.f32 %v786_v33, %v9172_v23 }
 0x152   :  { %4072 = vmatmul.msk.f32.vlgmr.msrb.gmra.mxu1 %vm206_vm7, %v5733_v57 }
 0x153   :  { %v5745_v62 = vadd.f32 %v1120_v4, %v821_v3  ;;  %4060 = vmatmul.msk.f32.gmra.mxu3 %vm206_vm7, %v4797_v63  ;;  %v5751_v9 = vpop.f32.mrf.mxu2  ;;  %v9521_v4 = vld [vmem:[#allocation42_spill] sm:$0xff] }
 0x154   :  { %v5761_v60 = vadd.f32 %v9521_v4, %v5173_v7 }
 0x155   :  { %9519 = vst [vmem:[#allocation107_spill] sm:$0xff] %v5745_v62  ;;  %v5753_v51 = vpop.f32.mrf.mxu0  ;;  %v790_v62 = vmax.f32 %v589_v19, 0.0 }
 0x156   :  { %9520 = vst [vmem:[#allocation108_spill] sm:$0xff] %v5753_v51  ;;  %v965_v37 = vpop.f32.mrf.mxu3  ;;  %v9174_v56 = vmax.f32 %v5761_v60, 0.0 }
 0x157   :  { %v966_v3 = vadd.f32 %v965_v37, %v5199_v22  ;;  %9522 = vst [vmem:[#allocation42_spill] sm:$0xff] %v5761_v60  ;;  %v5763_v63 = vpop.f32.mrf.mxu1 }
 0x158   :  { %9523 = vst [vmem:[#allocation109_spill] sm:$0xff] %v5763_v63  ;;  %4052 = vmatmul.msk.f32.gmra.mxu2 %vm206_vm7, %v5700_v43  ;;  %4064 = vmatmul.msk.f32.gmra.mxu0 %vm206_vm7, %v5770_v28  ;;  %v830_v33 = vadd.f32 %v790_v62, %v9174_v56  ;;  %v9529_v62 = vld [vmem:[#allocation41_spill] sm:$0xff]  ;;  %v9537_v63 = vld [vmem:[#allocation43_spill] sm:$0xff] }
 0x159   :  { %v1125_v37 = vmax.f32 %v966_v3, 0.0 }
 0x15a   :  { %4073 = vmatmul.msk.f32.gmra.mxu1 %vm206_vm7, %v5770_v28 }
 0x15b   :  { %v5776_v4 = vadd.f32 %v1125_v37, %v826_v24  ;;  %4061 = vmatmul.msk.f32.gmra.mxu3 %vm206_vm7, %v5700_v43  ;;  %v927_v51 = vpop.f32.mrf.mxu2  ;;  %v9526_v24 = vld [vmem:[#allocation61_spill] sm:$0xff] }
 0x15c   :  { %v928_v40 = vadd.f32 %v927_v51, %v5173_v7  ;;  %v568_v37 = vadd.f32 %v9526_v24, %v5207_v44  ;;  %v5798_v51 = vld [vmem:[%s9074_s1 + $0x10] sm:$0xff] }
 0x15d   :  { %9524 = vst [vmem:[#allocation110_spill] sm:$0xff] %v5776_v4  ;;  %v5784_v30 = vpop.f32.mrf.mxu0 }
 0x15e   :  { %9525 = vst [vmem:[#allocation111_spill] sm:$0xff] %v5784_v30  ;;  %v1129_v3 = vmax.f32 %v928_v40, 0.0  ;;  %v968_v19 = vpop.f32.mrf.mxu3  ;;  %v5806_v40 = vadd.f32 %v9529_v62, %v5207_v44 }
 0x15f   :  { %v969_v23 = vadd.f32 %v968_v19, %v5173_v7  ;;  %v5793_v4 = vpop.f32.mrf.mxu1  ;;  %v755_v19 = vmax.f32 %v568_v37, 0.0 }
 0x160   :  { %v5791_v47 = vadd.f32 %v1129_v3, %v830_v33  ;;  %9528 = vst [vmem:[#allocation112_spill] sm:$0xff] %v5793_v4  ;;  %4065 = vmatmul.msk.f32.gmra.mxu0 %vm206_vm7, %v5798_v51  ;;  %4081 = vmatmul.msk.f32.vlgmr.msra.gmra.mxu2 %vm206_vm7, %v5733_v57  ;;  %v907_v33 = vadd.f32 %v5489_v29, %v5207_v44  ;;  %v9178_v60 = vmax.f32 %v5806_v40, 0.0  ;;  %v9534_v29 = vld [vmem:[#allocation65_spill] sm:$0xff] }
 0x161   :  { %9530 = vst [vmem:[#allocation41_spill] sm:$0xff] %v5806_v40  ;;  %v1130_v3 = vmax.f32 %v969_v23, 0.0  ;;  %v571_v23 = vadd.f32 %v9534_v29, %v5241_v11  ;;  %v5841_v29 = vld [vmem:[%s9074_s1 + $0x18] sm:$0xff] }
 0x162   :  { %9527 = vst [vmem:[#allocation61_spill] sm:$0xff] %v5791_v47  ;;  %4074 = vmatmul.msk.f32.gmra.mxu1 %vm206_vm7, %v5798_v51  ;;  %v1094_v62 = vmax.f32 %v907_v33, 0.0  ;;  %v5832_v47 = vadd.f32 %v9537_v63, %v5241_v11  ;;  %v910_v33 = vadd.f32 %v5518_v6, %v5241_v11  ;;  %v9540_v63 = vrot.slane %v9490_v20, 5 }
 0x163   :  { %v5811_v24 = vadd.f32 %v1130_v3, %v5466_v36  ;;  %4090 = vmatmul.msk.f32.vlgmr.msra.gmra.mxu3 %vm206_vm7, %v5733_v57  ;;  %v5817_v56 = vpop.f32.mrf.mxu2  ;;  %v9536_v36 = vld [vmem:[#allocation24_spill] sm:$0xff] }
 0x164   :  { %9532 = vst [vmem:[#allocation114_spill] sm:$0xff] %v5817_v56  ;;  %v1514_v3 = vsel %vm124_vm0, %v9536_v36, %v9535_v49  ;;  %v9182_v56 = vmax.f32 %v5832_v47, 0.0  ;;  %v1099_v7 = vmax.f32 %v910_v33, 0.0 }
 0x165   :  { %9531 = vst [vmem:[#allocation113_spill] sm:$0xff] %v5811_v24  ;;  %v5820_v30 = vpop.f32.mrf.mxu0  ;;  %v795_v24 = vadd.f32 %v755_v19, %v9178_v60  ;;  %v1841_v19 = vsel %vm124_vm0, %v9540_v63, %v9486_v13  ;;  %v9541_v60 = vld [vmem:[#allocation32_spill] sm:$0xff] }
 0x166   :  { %9533 = vst [vmem:[#allocation115_spill] sm:$0xff] %v5820_v30  ;;  %v1241_v37 = vpop.f32.mrf.mxu3  ;;  %v1519_v40 = vsel %vm130_vm1, %v1514_v3, %v9541_v60  ;;  %v9545_v63 = vld [vmem:[#allocation44_spill] sm:$0xff] }
 0x167   :  { %v1242_v4 = vadd.f32 %v1241_v37, %v5207_v44  ;;  %9538 = vst [vmem:[#allocation65_spill] sm:$0xff] %v5832_v47  ;;  %v5836_v30 = vpop.f32.mrf.mxu1  ;;  %v1134_v37 = vadd.f32 %v1094_v62, %v795_v24  ;;  %v1524_v62 = vsel %vm136_vm2, %v1519_v40, %v4497_v32  ;;  %v9547_v40 = vld [vmem:[#allocation68_spill] sm:$0xff] }
 0x168   :  { %9539 = vst [vmem:[#allocation43_spill] sm:$0xff] %v5836_v30  ;;  %4066 = vmatmul.msk.f32.gmra.mxu0 %vm206_vm7, %v5841_v29  ;;  %4082 = vmatmul.msk.f32.gmra.mxu2 %vm206_vm7, %v5770_v28  ;;  %v760_v30 = vmax.f32 %v571_v23, 0.0  ;;  %v9544_v23 = vrot.slane %v9490_v20, 3  ;;  %v574_v60 = vadd.f32 %v9547_v40, %v5291_v41 }
 0x169   :  { %v1429_v6 = vmax.f32 %v1242_v4, 0.0  ;;  %v1846_v4 = vsel %vm130_vm1, %v1841_v19, %v9485_v59  ;;  %v1529_v19 = vsel %vm142_vm3, %v1524_v62, %v5075_v12 }
 0x16a   :  { %4075 = vmatmul.msk.f32.gmra.mxu1 %vm206_vm7, %v5841_v29  ;;  %v1851_v3 = vsel %vm136_vm2, %v1846_v4, %v9544_v23  ;;  %v4315_v4 = vld [vmem:[%s9073_s0 + $0x30] sm:$0xff]  ;;  %v765_v40 = vmax.f32 %v574_v60, 0.0 }
 0x16b   :  { %v5853_v49 = vadd.f32 %v1429_v6, %v1134_v37  ;;  %4091 = vmatmul.msk.f32.gmra.mxu3 %vm206_vm7, %v5770_v28  ;;  %v5859_v36 = vpop.f32.mrf.mxu2  ;;  %v5873_v37 = vadd.f32 %v9545_v63, %v5291_v41  ;;  %v800_v6 = vadd.f32 %v760_v30, %v9182_v56  ;;  %v1534_v23 = vsel %vm148_vm4, %v1529_v19, %v4315_v4 }
 0x16c   :  { %v1539_v62 = vsel %vm154_vm5, %v1534_v23, %v5646_v55 }
 0x16d   :  { %9542 = vst [vmem:[#allocation116_spill] sm:$0xff] %v5853_v49  ;;  %v5864_v24 = vpop.f32.mrf.mxu0  ;;  %v1856_v49 = vsel %vm142_vm3, %v1851_v3, %v9492_v21  ;;  %v1139_v63 = vadd.f32 %v1099_v7, %v800_v6  ;;  %v5895_v21 = vld [vmem:[%s9074_s1 + $0x20] sm:$0xff]  ;;  %v9548_v3 = vld [vmem:[#allocation33_spill] sm:$0xff]  ;;  %v913_v7 = vadd.f32 %v5589_v54, %v5291_v41 }
 0x16e   :  { %9543 = vst [vmem:[#allocation117_spill] sm:$0xff] %v5864_v24  ;;  %v1244_v33 = vpop.f32.mrf.mxu3  ;;  %v1861_v30 = vsel %vm148_vm4, %v1856_v49, %v4741_v52  ;;  %v9586_v24 = vld [vmem:[#allocation61_spill] sm:$0xff] }
 0x16f   :  { %9546 = vst [vmem:[#allocation44_spill] sm:$0xff] %v5873_v37  ;;  %v1245_v20 = vadd.f32 %v1244_v33, %v5241_v11  ;;  %v5890_v56 = vpop.f32.mrf.mxu1  ;;  %v1866_v49 = vsel %vm154_vm5, %v1861_v30, %v9548_v3  ;;  %v1544_v33 = vsel %vm160_vm6, %v1539_v62, %v4654_v34  ;;  %v1104_v54 = vmax.f32 %v913_v7, 0.0  ;;  %v5942_v7 = vld [vmem:[%s9074_s1 + $0x28] sm:$0xff] }
 0x170   :  { %4067 = vmatmul.msk.f32.gmra.mxu0 %vm206_vm7, %v5895_v21  ;;  %4083 = vmatmul.msk.f32.gmra.mxu2 %vm206_vm7, %v5798_v51  ;;  %v1871_v19 = vsel %vm160_vm6, %v1866_v49, %v5569_v35  ;;  %v9183_v35 = vmax.f32 %v5873_v37, 0.0  ;;  %v9552_v49 = vld [vmem:[#allocation47_spill] sm:$0xff] }
 0x171   :  { %v1434_v6 = vmax.f32 %v1245_v20, 0.0  ;;  %1734 = vmatpush.msra.mxu0 %v1544_v33  ;;  %1901 = vmatpush.msra.mxu1 %v1871_v19  ;;  %v9551_v20 = vld [vmem:[#allocation72_spill] sm:$0xff] }
 0x172   :  { %4076 = vmatmul.msk.f32.gmra.mxu1 %vm206_vm7, %v5895_v21  ;;  %v577_v30 = vadd.f32 %v9551_v20, %v5223_v61  ;;  %v805_v62 = vadd.f32 %v765_v40, %v9183_v35  ;;  %v9556_v35 = vld [vmem:[#allocation17_spill] sm:$0xff] }
 0x173   :  { %v5911_v4 = vadd.f32 %v1434_v6, %v1139_v63  ;;  %4092 = vmatmul.msk.f32.gmra.mxu3 %vm206_vm7, %v5798_v51  ;;  %v5917_v23 = vpop.f32.mrf.mxu2  ;;  %4134 = vmatpush.msk.msrb.mxu0 %vm124_vm0, %v4654_v34  ;;  %v5933_v34 = vadd.f32 %v9552_v49, %v5223_v61 }
 0x174   :  { %4143 = vmatpush.msk.msrb.mxu1 %vm124_vm0, %v4842_v25  ;;  %v916_v25 = vadd.f32 %v5619_v10, %v5223_v61  ;;  %v1144_v33 = vadd.f32 %v1104_v54, %v805_v62  ;;  %v770_v40 = vmax.f32 %v577_v30, 0.0  ;;  %v1843_v54 = vsel %vm124_vm0, %v9556_v35, %v9504_v5 }
 0x175   :  { %9549 = vst [vmem:[#allocation68_spill] sm:$0xff] %v5911_v4  ;;  %v5924_v60 = vpop.f32.mrf.mxu0  ;;  %v9187_v30 = vmax.f32 %v5933_v34, 0.0 }
 0x176   :  { %9550 = vst [vmem:[#allocation33_spill] sm:$0xff] %v5924_v60  ;;  %v1247_v63 = vpop.f32.mrf.mxu3  ;;  %v1109_v62 = vmax.f32 %v916_v25, 0.0 }
 0x177   :  { %v1248_v3 = vadd.f32 %v1247_v63, %v5291_v41  ;;  %9553 = vst [vmem:[#allocation72_spill] sm:$0xff] %v5933_v34  ;;  %v5937_v6 = vpop.f32.mrf.mxu1  ;;  %v9555_v63 = vld [vmem:[#allocation12_spill] sm:$0xff]  ;;  %v810_v25 = vadd.f32 %v770_v40, %v9187_v30 }
 0x178   :  { %4068 = vmatmul.msk.f32.gmra.mxu0 %vm206_vm7, %v5942_v7  ;;  %4084 = vmatmul.msk.f32.gmra.mxu2 %vm206_vm7, %v5841_v29  ;;  %v1842_v49 = vsel %vm124_vm0, %v9555_v63, %v9503_v17 }
 0x179   :  { %v1439_v19 = vmax.f32 %v1248_v3, 0.0  ;;  %v1847_v3 = vsel %vm130_vm1, %v1842_v49, %v4564_v53  ;;  %v1149_v34 = vadd.f32 %v1109_v62, %v810_v25 }
 0x17a   :  { %4077 = vmatmul.msk.f32.gmra.mxu1 %vm206_vm7, %v5942_v7  ;;  %v1852_v47 = vsel %vm136_vm2, %v1847_v3, %v4442_v14  ;;  %v580_v3 = vadd.f32 %v5266_v27, %v5181_v45 }
 0x17b   :  { %v5948_v20 = vadd.f32 %v1439_v19, %v1144_v33  ;;  %4093 = vmatmul.msk.f32.gmra.mxu3 %vm206_vm7, %v5841_v29  ;;  %v5954_v10 = vpop.f32.mrf.mxu2  ;;  %v1848_v33 = vsel %vm130_vm1, %v1843_v54, %v4600_v0  ;;  %v1857_v49 = vsel %vm142_vm3, %v1852_v47, %v9487_v58  ;;  %v5995_v47 = vld [vmem:[%s9074_s1 + $0x30] sm:$0xff] }
 0x17c   :  { %v1853_v37 = vsel %vm136_vm2, %v1848_v33, %v9485_v59  ;;  %v1862_v33 = vsel %vm148_vm4, %v1857_v49, %v4836_v16 }
 0x17d   :  { %9554 = vst [vmem:[#allocation47_spill] sm:$0xff] %v5948_v20  ;;  %v5967_v19 = vpop.f32.mrf.mxu0  ;;  %v9558_v20 = vld [vmem:[#allocation50_spill] sm:$0xff]  ;;  %v1858_v54 = vsel %vm142_vm3, %v1853_v37, %v9488_v31  ;;  %v1867_v27 = vsel %vm154_vm5, %v1862_v33, %v4738_v48 }
 0x17e   :  { %9557 = vst [vmem:[#allocation12_spill] sm:$0xff] %v5967_v19  ;;  %v5975_v4 = vadd.f32 %v9558_v20, %v5181_v45  ;;  %v1250_v60 = vpop.f32.mrf.mxu3  ;;  %v1863_v20 = vsel %vm148_vm4, %v1858_v54, %v4839_v18  ;;  %v1872_v25 = vsel %vm160_vm6, %v1867_v27, %v5543_v39  ;;  %v775_v54 = vmax.f32 %v580_v3, 0.0 }
 0x17f   :  { %v1251_v19 = vadd.f32 %v1250_v60, %v5223_v61  ;;  %v5990_v40 = vpop.f32.mrf.mxu1  ;;  %v1868_v37 = vsel %vm154_vm5, %v1863_v20, %v4741_v52  ;;  %v919_v60 = vadd.f32 %v5685_v26, %v5181_v45  ;;  %1942 = vmatpush.msrb.mxu2 %v1872_v25  ;;  %v9563_v20 = vld [vmem:[#allocation53_spill] sm:$0xff] }
 0x180   :  { %9559 = vst [vmem:[#allocation17_spill] sm:$0xff] %v5975_v4  ;;  %4069 = vmatmul.msk.f32.gmra.mxu0 %vm206_vm7, %v5995_v47  ;;  %4085 = vmatmul.msk.f32.gmra.mxu2 %vm206_vm7, %v5895_v21  ;;  %v1873_v49 = vsel %vm160_vm6, %v1868_v37, %v5550_v8  ;;  %v9188_v52 = vmax.f32 %v5975_v4, 0.0  ;;  %v6035_v27 = vadd.f32 %v9563_v20, %v5155_v46 }
 0x181   :  { %v1444_v62 = vmax.f32 %v1251_v19, 0.0  ;;  %1983 = vmatpush.msrb.mxu3 %v1873_v49  ;;  %v1114_v26 = vmax.f32 %v919_v60, 0.0  ;;  %v922_v60 = vadd.f32 %v5720_v38, %v5155_v46 }
 0x182   :  { %4078 = vmatmul.msk.f32.gmra.mxu1 %vm206_vm7, %v5995_v47  ;;  %v815_v8 = vadd.f32 %v775_v54, %v9188_v52  ;;  %9564 = vst [vmem:[#allocation53_spill] sm:$0xff] %v6035_v27  ;;  %v9189_v54 = vmax.f32 %v6035_v27, 0.0 }
 0x183   :  { %v6011_v30 = vadd.f32 %v1444_v62, %v1149_v34  ;;  %4094 = vmatmul.msk.f32.gmra.mxu3 %vm206_vm7, %v5895_v21  ;;  %v6017_v48 = vpop.f32.mrf.mxu2  ;;  %v583_v34 = vadd.f32 %v5304_v2, %v5155_v46 }
 0x184   :  { %v1154_v37 = vadd.f32 %v1114_v26, %v815_v8  ;;  %v586_v8 = vadd.f32 %v5352_v42, %v5199_v22 }
 0x185   :  { %9560 = vst [vmem:[#allocation50_spill] sm:$0xff] %v6011_v30  ;;  %v6020_v39 = vpop.f32.mrf.mxu0  ;;  %v780_v2 = vmax.f32 %v583_v34, 0.0 }
 0x186   :  { %9561 = vst [vmem:[#allocation118_spill] sm:$0xff] %v6020_v39  ;;  %v1253_v19 = vpop.f32.mrf.mxu3  ;;  %v785_v42 = vmax.f32 %v586_v8, 0.0 }
 0x187   :  { %v1254_v3 = vadd.f32 %v1253_v19, %v5181_v45  ;;  %v6027_v33 = vpop.f32.mrf.mxu1  ;;  %v1119_v19 = vmax.f32 %v922_v60, 0.0  ;;  %v820_v38 = vadd.f32 %v780_v2, %v9189_v54  ;;  %v925_v2 = vadd.f32 %v5751_v9, %v5199_v22 }
 0x188   :  { %9562 = vst [vmem:[#allocation119_spill] sm:$0xff] %v6027_v33  ;;  %4070 = vmatmul.msk.f32.gmra.mxu0 %vm206_vm7, %v5700_v43  ;;  %4086 = vmatmul.msk.f32.gmra.mxu2 %vm206_vm7, %v5942_v7 }
 0x189   :  { %v1449_v62 = vmax.f32 %v1254_v3, 0.0 }
 0x18a   :  { %4079 = vmatmul.msk.f32.gmra.mxu1 %vm206_vm7, %v5700_v43 }
 0x18b   :  { %v6039_v25 = vadd.f32 %v1449_v62, %v1154_v37  ;;  %4095 = vmatmul.msk.f32.gmra.mxu3 %vm206_vm7, %v5942_v7  ;;  %v6045_v49 = vpop.f32.mrf.mxu2  ;;  %v9568_v37 = vld [vmem:[#allocation56_spill] sm:$0xff]  ;;  %v1159_v62 = vadd.f32 %v1119_v19, %v820_v38 }
 0x18c   :  { %v6063_v60 = vadd.f32 %v9568_v37, %v5199_v22  ;;  %v1124_v37 = vmax.f32 %v925_v2, 0.0 }
 0x18d   :  { %9565 = vst [vmem:[#allocation120_spill] sm:$0xff] %v6039_v25  ;;  %v6048_v20 = vpop.f32.mrf.mxu0 }
 0x18e   :  { %9566 = vst [vmem:[#allocation121_spill] sm:$0xff] %v6048_v20  ;;  %v1256_v26 = vpop.f32.mrf.mxu3  ;;  %v9192_v4 = vmax.f32 %v6063_v60, 0.0 }
 0x18f   :  { %v1257_v34 = vadd.f32 %v1256_v26, %v5155_v46  ;;  %v6055_v3 = vpop.f32.mrf.mxu1  ;;  %9569 = vst [vmem:[#allocation56_spill] sm:$0xff] %v6063_v60 }
 0x190   :  { %9567 = vst [vmem:[#allocation122_spill] sm:$0xff] %v6055_v3  ;;  %4087 = vmatmul.msk.f32.gmra.mxu2 %vm206_vm7, %v5995_v47  ;;  %4099 = vmatmul.msk.f32.vlgmr.msra.gmra.mxu0 %vm206_vm7, %v5733_v57  ;;  %v825_v9 = vadd.f32 %v785_v42, %v9192_v4  ;;  %v691_v42 = vadd.f32 %v5409_v1, %v5207_v44  ;;  %v9577_v4 = vld [vmem:[#allocation45_spill] sm:$0xff]  ;;  %v9581_v1 = vld [vmem:[#allocation59_spill] sm:$0xff] }
 0x191   :  { %v1454_v52 = vmax.f32 %v1257_v34, 0.0  ;;  %v6101_v60 = vadd.f32 %v9577_v4, %v5207_v44  ;;  %v6116_v4 = vadd.f32 %v9581_v1, %v5207_v44  ;;  %v9588_v1 = vld [vmem:[#allocation48_spill] sm:$0xff] }
 0x192   :  { %4108 = vmatmul.msk.f32.vlgmr.msra.gmra.mxu1 %vm206_vm7, %v5733_v57  ;;  %v1164_v8 = vadd.f32 %v1124_v37, %v825_v9  ;;  %v1030_v37 = vadd.f32 %v5726_v15, %v5207_v44  ;;  %v9583_v15 = vld [vmem:[#allocation114_spill] sm:$0xff] }
 0x193   :  { %v6067_v54 = vadd.f32 %v1454_v52, %v1159_v62  ;;  %4096 = vmatmul.msk.f32.gmra.mxu3 %vm206_vm7, %v5995_v47  ;;  %v6073_v26 = vpop.f32.mrf.mxu2  ;;  %9578 = vst [vmem:[#allocation45_spill] sm:$0xff] %v6101_v60  ;;  %v1071_v25 = vadd.f32 %v9583_v15, %v5207_v44  ;;  %v6134_v15 = vadd.f32 %v9588_v1, %v5241_v11 }
 0x194   :  { %9571 = vst [vmem:[#allocation124_spill] sm:$0xff] %v6073_v26  ;;  %v1097_v20 = vmax.f32 %v1030_v37, 0.0 }
 0x195   :  { %9570 = vst [vmem:[#allocation123_spill] sm:$0xff] %v6067_v54  ;;  %v6076_v27 = vpop.f32.mrf.mxu0 }
 0x196   :  { %9572 = vst [vmem:[#allocation125_spill] sm:$0xff] %v6076_v27  ;;  %v1259_v19 = vpop.f32.mrf.mxu3 }
 0x197   :  { %v1260_v52 = vadd.f32 %v1259_v19, %v5199_v22  ;;  %v6081_v38 = vpop.f32.mrf.mxu1  ;;  %9582 = vst [vmem:[#allocation59_spill] sm:$0xff] %v6116_v4 }
 0x198   :  { %9573 = vst [vmem:[#allocation126_spill] sm:$0xff] %v6081_v38  ;;  %4088 = vmatmul.msk.f32.gmra.mxu2 %vm206_vm7, %v5700_v43  ;;  %4100 = vmatmul.msk.f32.gmra.mxu0 %vm206_vm7, %v5770_v28  ;;  %v1098_v38 = vmax.f32 %v1071_v25, 0.0 }
 0x199   :  { %v1459_v34 = vmax.f32 %v1260_v52, 0.0  ;;  %v732_v52 = vadd.f32 %v5412_v50, %v5207_v44 }
 0x19a   :  { %4109 = vmatmul.msk.f32.gmra.mxu1 %vm206_vm7, %v5770_v28 }
 0x19b   :  { %v6087_v62 = vadd.f32 %v1459_v34, %v1164_v8  ;;  %4097 = vmatmul.msk.f32.gmra.mxu3 %vm206_vm7, %v5700_v43  ;;  %v6093_v2 = vpop.f32.mrf.mxu2  ;;  %v9579_v8 = vld [vmem:[#allocation64_spill] sm:$0xff]  ;;  %v759_v39 = vmax.f32 %v732_v52, 0.0  ;;  %v9593_v52 = vld [vmem:[#allocation109_spill] sm:$0xff] }
 0x19c   :  { %9575 = vst [vmem:[#allocation128_spill] sm:$0xff] %v6093_v2 }
 0x19d   :  { %9574 = vst [vmem:[#allocation127_spill] sm:$0xff] %v6087_v62  ;;  %v6097_v19 = vpop.f32.mrf.mxu0  ;;  %v758_v62 = vmax.f32 %v691_v42, 0.0  ;;  %v9584_v42 = vld [vmem:[#allocation89_spill] sm:$0xff] }
 0x19e   :  { %9576 = vst [vmem:[#allocation129_spill] sm:$0xff] %v6097_v19  ;;  %v1262_v9 = vpop.f32.mrf.mxu3  ;;  %v9585_v19 = vld [vmem:[#allocation90_spill] sm:$0xff] }
 0x19f   :  { %v1263_v34 = vadd.f32 %v1262_v9, %v9579_v8  ;;  %v6108_v54 = vpop.f32.mrf.mxu1  ;;  %v694_v9 = vadd.f32 %v9584_v42, %v5241_v11  ;;  %v735_v27 = vadd.f32 %v9585_v19, %v5241_v11  ;;  %9589 = vst [vmem:[#allocation89_spill] sm:$0xff] %v6134_v15  ;;  %v9590_v42 = vld [vmem:[#allocation62_spill] sm:$0xff]  ;;  %v9592_v19 = vmax.f32 %v6101_v60, 0.0 }
 0x1a0   :  { %9580 = vst [vmem:[#allocation130_spill] sm:$0xff] %v6108_v54  ;;  %4101 = vmatmul.msk.f32.gmra.mxu0 %vm206_vm7, %v5798_v51  ;;  %4117 = vmatmul.msk.f32.vlgmr.msrb.gmra.mxu2 %vm206_vm7, %v5733_v57  ;;  %v6138_v50 = vadd.f32 %v9590_v42, %v5241_v11 }
 0x1a1   :  { %v1464_v30 = vmax.f32 %v1263_v34, 0.0  ;;  %v798_v37 = vadd.f32 %v758_v62, %v9592_v19  ;;  %v763_v2 = vmax.f32 %v694_v9, 0.0  ;;  %v764_v1 = vmax.f32 %v735_v27, 0.0  ;;  %v9598_v9 = vld [vmem:[#allocation66_spill] sm:$0xff] }
 0x1a2   :  { %4110 = vmatmul.msk.f32.gmra.mxu1 %vm206_vm7, %v5798_v51  ;;  %9591 = vst [vmem:[#allocation90_spill] sm:$0xff] %v6138_v50  ;;  %v1074_v62 = vadd.f32 %v5859_v36, %v5241_v11  ;;  %v9197_v19 = vmax.f32 %v6134_v15, 0.0  ;;  %v9596_v36 = vld [vmem:[#allocation51_spill] sm:$0xff] }
 0x1a3   :  { %v6126_v54 = vadd.f32 %v1464_v30, %v9586_v24  ;;  %4126 = vmatmul.msk.f32.vlgmr.msrb.gmra.mxu3 %vm206_vm7, %v5733_v57  ;;  %v1364_v34 = vpop.f32.mrf.mxu2  ;;  %v9195_v30 = vmax.f32 %v6116_v4, 0.0  ;;  %v1137_v33 = vadd.f32 %v1097_v20, %v798_v37  ;;  %v6169_v37 = vadd.f32 %v9598_v9, %v5291_v41  ;;  %v9604_v9 = vld [vmem:[#allocation28_spill] sm:$0xff] }
 0x1a4   :  { %v1365_v24 = vadd.f32 %v1364_v34, %v5207_v44 }
 0x1a5   :  { %9587 = vst [vmem:[#allocation114_spill] sm:$0xff] %v6126_v54  ;;  %v1033_v54 = vadd.f32 %v9593_v52, %v5241_v11  ;;  %v6146_v3 = vpop.f32.mrf.mxu0  ;;  %v799_v42 = vadd.f32 %v759_v39, %v9195_v30  ;;  %v9196_v52 = vmax.f32 %v6138_v50, 0.0 }
 0x1a6   :  { %9594 = vst [vmem:[#allocation61_spill] sm:$0xff] %v6146_v3  ;;  %v1432_v8 = vmax.f32 %v1365_v24, 0.0  ;;  %v1405_v26 = vpop.f32.mrf.mxu3  ;;  %v1103_v24 = vmax.f32 %v1074_v62, 0.0 }
 0x1a7   :  { %v1406_v34 = vadd.f32 %v1405_v26, %v5207_v44  ;;  %v6157_v60 = vpop.f32.mrf.mxu1  ;;  %v1102_v39 = vmax.f32 %v1033_v54, 0.0  ;;  %v1138_v27 = vadd.f32 %v1098_v38, %v799_v42  ;;  %v6165_v26 = vadd.f32 %v9596_v36, %v5291_v41  ;;  %9599 = vst [vmem:[#allocation109_spill] sm:$0xff] %v6169_v37  ;;  %v9601_v38 = vld [vmem:[#allocation24_spill] sm:$0xff]  ;;  %v9602_v42 = vld [vmem:[#allocation23_spill] sm:$0xff]  ;;  %v9603_v36 = vld [vmem:[#allocation29_spill] sm:$0xff] }
 0x1a8   :  { %v6155_v25 = vadd.f32 %v1432_v8, %v1137_v33  ;;  %9595 = vst [vmem:[#allocation48_spill] sm:$0xff] %v6157_v60  ;;  %4102 = vmatmul.msk.f32.gmra.mxu0 %vm206_vm7, %v5841_v29  ;;  %4118 = vmatmul.msk.f32.gmra.mxu2 %vm206_vm7, %v5770_v28  ;;  %v803_v33 = vadd.f32 %v763_v2, %v9197_v19  ;;  %v9607_v19 = vld [vmem:[#allocation30_spill] sm:$0xff] }
 0x1a9   :  { %v1433_v20 = vmax.f32 %v1406_v34, 0.0  ;;  %9597 = vst [vmem:[#allocation62_spill] sm:$0xff] %v6165_v26  ;;  %v804_v8 = vadd.f32 %v764_v1, %v9196_v52  ;;  %v1844_v34 = vsel %vm124_vm0, %v9602_v42, %v9601_v38  ;;  %v1845_v2 = vsel %vm124_vm0, %v9604_v9, %v9603_v36  ;;  %v9605_v1 = vld [vmem:[#allocation94_spill] sm:$0xff] }
 0x1aa   :  { %4111 = vmatmul.msk.f32.gmra.mxu1 %vm206_vm7, %v5841_v29  ;;  %v697_v62 = vadd.f32 %v9605_v1, %v5291_v41  ;;  %v9608_v4 = vrot.slane %v9607_v19, 3  ;;  %v1142_v3 = vadd.f32 %v1102_v39, %v803_v33 }
 0x1ab   :  { %v6175_v30 = vadd.f32 %v1433_v20, %v1138_v27  ;;  %4127 = vmatmul.msk.f32.gmra.mxu3 %vm206_vm7, %v5770_v28  ;;  %v1367_v54 = vpop.f32.mrf.mxu2  ;;  %v9606_v20 = vld [vmem:[#allocation38_spill] sm:$0xff]  ;;  %v1143_v39 = vadd.f32 %v1103_v24, %v804_v8  ;;  %v9614_v24 = vld [vmem:[#allocation11_spill] sm:$0xff] }
 0x1ac   :  { %v1368_v27 = vadd.f32 %v1367_v54, %v5241_v11  ;;  %v1849_v52 = vsel %vm130_vm1, %v1844_v34, %v9606_v20  ;;  %v1850_v50 = vsel %vm130_vm1, %v1845_v2, %v9608_v4  ;;  %v9611_v54 = vld [vmem:[#allocation112_spill] sm:$0xff]  ;;  %v9612_v2 = vld [vmem:[#allocation26_spill] sm:$0xff] }
 0x1ad   :  { %9600 = vst [vmem:[#allocation51_spill] sm:$0xff] %v6175_v30  ;;  %v9609_v30 = vld [vmem:[#allocation95_spill] sm:$0xff]  ;;  %v6197_v60 = vpop.f32.mrf.mxu0  ;;  %v1854_v36 = vsel %vm136_vm2, %v1849_v52, %v4564_v53  ;;  %v1855_v1 = vsel %vm136_vm2, %v1850_v50, %v4600_v0  ;;  %v1036_v38 = vadd.f32 %v9611_v54, %v5291_v41  ;;  %v768_v0 = vmax.f32 %v697_v62, 0.0 }
 0x1ae   :  { %v738_v15 = vadd.f32 %v9609_v30, %v5291_v41  ;;  %9610 = vst [vmem:[#allocation66_spill] sm:$0xff] %v6197_v60  ;;  %v1437_v34 = vmax.f32 %v1368_v27, 0.0  ;;  %v1408_v20 = vpop.f32.mrf.mxu3  ;;  %v1859_v4 = vsel %vm142_vm3, %v1854_v36, %v4497_v32  ;;  %v1860_v30 = vsel %vm142_vm3, %v1855_v1, %v9612_v2 }
 0x1af   :  { %v1409_v33 = vadd.f32 %v1408_v20, %v5241_v11  ;;  %v1864_v52 = vsel %vm148_vm4, %v1859_v4, %v5075_v12  ;;  %v9613_v60 = vrot.slane %v9607_v19, 1  ;;  %v6217_v27 = vpop.f32.mrf.mxu1  ;;  %v9202_v62 = vmax.f32 %v6165_v26, 0.0  ;;  %v9615_v20 = vld [vmem:[#allocation98_spill] sm:$0xff] }
 0x1b0   :  { %v6215_v54 = vadd.f32 %v1437_v34, %v1142_v3  ;;  %4103 = vmatmul.msk.f32.gmra.mxu0 %vm206_vm7, %v5895_v21  ;;  %4119 = vmatmul.msk.f32.gmra.mxu2 %vm206_vm7, %v5798_v51  ;;  %v1869_v8 = vsel %vm154_vm5, %v1864_v52, %v4836_v16  ;;  %v700_v1 = vadd.f32 %v9615_v20, %v5223_v61  ;;  %v9616_v16 = vld [vmem:[#allocation99_spill] sm:$0xff]  ;;  %v1107_v4 = vmax.f32 %v1036_v38, 0.0 }
 0x1b1   :  { %v1865_v50 = vsel %vm148_vm4, %v1860_v30, %v9613_v60  ;;  %v1077_v60 = vadd.f32 %v5917_v23, %v5291_v41  ;;  %v1438_v19 = vmax.f32 %v1409_v33, 0.0  ;;  %v1874_v3 = vsel %vm160_vm6, %v1869_v8, %v5646_v55  ;;  %v6247_v30 = vld [vmem:[%s9073_s0 + $0x48] sm:$0x3]  ;;  %v9618_v33 = vld [vmem:[#allocation54_spill] sm:$0xff] }
 0x1b2   :  { %v1870_v12 = vsel %vm154_vm5, %v1865_v50, %v4839_v18  ;;  %v741_v34 = vadd.f32 %v9616_v16, %v5223_v61  ;;  %2024 = vmatpush.msrb.mxu0 %v1874_v3  ;;  %v769_v18 = vmax.f32 %v738_v15, 0.0  ;;  %4112 = vmatmul.msk.f32.gmra.mxu1 %vm206_vm7, %v5895_v21  ;;  %v6251_v38 = vadd.f32 %v9618_v33, %v5223_v61  ;;  %v9620_v15 = vld [vmem:[#allocation71_spill] sm:$0xff] }
 0x1b3   :  { %v1875_v36 = vsel %vm160_vm6, %v1870_v12, %v9614_v24  ;;  %v6238_v23 = vadd.f32 %v1438_v19, %v1143_v39  ;;  %4128 = vmatmul.msk.f32.gmra.mxu3 %vm206_vm7, %v5798_v51  ;;  %v1370_v55 = vpop.f32.mrf.mxu2  ;;  %v6255_v39 = vadd.f32 %v9620_v15, %v5223_v61  ;;  %v808_v52 = vadd.f32 %v768_v0, %v9202_v62  ;;  %v9622_v12 = vld [vmem:[#allocation43_spill] sm:$0xff] }
 0x1b4   :  { %2065 = vmatpush.msrb.mxu1 %v1875_v36  ;;  %9619 = vst [vmem:[#allocation28_spill] sm:$0xff] %v6251_v38  ;;  %v1371_v50 = vadd.f32 %v1370_v55, %v5291_v41  ;;  %4152 = vmatpush.msk.msra.mxu2 %vm124_vm0, %v6247_v30  ;;  %v9204_v8 = vmax.f32 %v6169_v37, 0.0  ;;  %v1039_v19 = vadd.f32 %v9622_v12, %v5223_v61  ;;  %v1108_v3 = vmax.f32 %v1077_v60, 0.0  ;;  %v9623_v55 = vld [vmem:[#allocation20_spill] sm:$0xff]  ;;  %v9624_v12 = vld [vmem:[#allocation57_spill] sm:$0xff] }
 0x1b5   :  { %9617 = vst [vmem:[#allocation23_spill] sm:$0xff] %v6238_v23  ;;  %v6265_v24 = vpop.f32.mrf.mxu0  ;;  %v773_v36 = vmax.f32 %v700_v1, 0.0  ;;  %v774_v20 = vmax.f32 %v741_v34, 0.0  ;;  %v1147_v16 = vadd.f32 %v1107_v4, %v808_v52  ;;  %v6271_v62 = vadd.f32 %v9623_v55, %v5181_v45  ;;  %v9626_v55 = vld [vmem:[#allocation75_spill] sm:$0xff] }
 0x1b6   :  { %9621 = vst [vmem:[#allocation94_spill] sm:$0xff] %v6255_v39  ;;  %v1442_v33 = vmax.f32 %v1371_v50, 0.0  ;;  %v1411_v15 = vpop.f32.mrf.mxu3  ;;  %v809_v0 = vadd.f32 %v769_v18, %v9204_v8  ;;  %v9207_v26 = vmax.f32 %v6251_v38, 0.0  ;;  %v9206_v60 = vmax.f32 %v6255_v39, 0.0 }
 0x1b7   :  { %v1412_v23 = vadd.f32 %v1411_v15, %v5291_v41  ;;  %v1080_v1 = vadd.f32 %v5954_v10, %v5223_v61  ;;  %v6280_v4 = vpop.f32.mrf.mxu1  ;;  %v1112_v18 = vmax.f32 %v1039_v19, 0.0  ;;  %v6288_v15 = vadd.f32 %v9624_v12, %v5181_v45  ;;  %v9629_v19 = vld [vmem:[#allocation10_spill] sm:$0xff]  ;;  %v9631_v12 = vld [vmem:[#allocation19_spill] sm:$0xff] }
 0x1b8   :  { %v6278_v34 = vadd.f32 %v1442_v33, %v1147_v16  ;;  %4104 = vmatmul.msk.f32.gmra.mxu0 %vm206_vm7, %v5942_v7  ;;  %4120 = vmatmul.msk.f32.gmra.mxu2 %vm206_vm7, %v5841_v29  ;;  %v1148_v52 = vadd.f32 %v1108_v3, %v809_v0  ;;  %v6292_v10 = vadd.f32 %v9626_v55, %v5181_v45  ;;  %v778_v8 = vmax.f32 %v6271_v62, 0.0 }
 0x1b9   :  { %v1443_v50 = vmax.f32 %v1412_v23, 0.0  ;;  %9625 = vst [vmem:[#allocation30_spill] sm:$0xff] %v6288_v15  ;;  %v813_v16 = vadd.f32 %v773_v36, %v9207_v26  ;;  %v814_v33 = vadd.f32 %v774_v20, %v9206_v60  ;;  %v2197_v3 = vsel %vm124_vm0, %v9629_v19, %v9555_v63  ;;  %v9630_v36 = vld [vmem:[#allocation16_spill] sm:$0xff] }
 0x1ba   :  { %9627 = vst [vmem:[#allocation95_spill] sm:$0xff] %v6292_v10  ;;  %4113 = vmatmul.msk.f32.gmra.mxu1 %vm206_vm7, %v5942_v7  ;;  %v2198_v0 = vsel %vm124_vm0, %v9630_v36, %v9556_v35  ;;  %v1113_v20 = vmax.f32 %v1080_v1, 0.0  ;;  %v744_v55 = vadd.f32 %v9631_v12, %v5181_v45  ;;  %v1042_v63 = vadd.f32 %v5890_v56, %v5181_v45  ;;  %v6325_v1 = vld [vmem:[%s9073_s0 + $0x38] sm:$0x3] }
 0x1bb   :  { %v6299_v37 = vadd.f32 %v1443_v50, %v1148_v52  ;;  %4129 = vmatmul.msk.f32.gmra.mxu3 %vm206_vm7, %v5841_v29  ;;  %v1373_v23 = vpop.f32.mrf.mxu2  ;;  %v2202_v52 = vsel %vm130_vm1, %v2197_v3, %v9503_v17  ;;  %v2203_v50 = vsel %vm130_vm1, %v2198_v0, %v9504_v5  ;;  %v1152_v60 = vadd.f32 %v1112_v18, %v813_v16  ;;  %v9633_v3 = vld [vmem:[#allocation13_spill] sm:$0xff] }
 0x1bc   :  { %v1374_v62 = vadd.f32 %v1373_v23, %v5223_v61  ;;  %v6330_v23 = vld [vmem:[%s9073_s0 + $0x40] sm:$0x3]  ;;  %v2207_v0 = vsel %vm136_vm2, %v2202_v52, %v9633_v3  ;;  %v2176_v16 = vrot.slane %v6325_v1, 2  ;;  %v2208_v26 = vsel %vm136_vm2, %v2203_v50, %v9486_v13 }
 0x1bd   :  { %9628 = vst [vmem:[#allocation112_spill] sm:$0xff] %v6299_v37  ;;  %v6320_v19 = vpop.f32.mrf.mxu0  ;;  %v2212_v56 = vsel %vm142_vm3, %v2207_v0, %v4442_v14  ;;  %v6343_v37 = vld [vmem:[%s9073_s0 + $0x50] sm:$0x3]  ;;  %v2187_v38 = vrot.slane %v6330_v23, 1  ;;  %v9212_v52 = vrot.slane %v6330_v23, 2  ;;  %v1153_v3 = vadd.f32 %v1113_v20, %v814_v33 }
 0x1be   :  { %9632 = vst [vmem:[#allocation26_spill] sm:$0xff] %v6320_v19  ;;  %v1447_v12 = vmax.f32 %v1374_v62, 0.0  ;;  %v1414_v18 = vpop.f32.mrf.mxu3  ;;  %v2217_v62 = vsel %vm148_vm4, %v2212_v56, %v9487_v58  ;;  %v2188_v50 = vrot.slane %v6247_v30, 1  ;;  %v1083_v58 = vadd.f32 %v6017_v48, %v5181_v45  ;;  %4161 = vmatpush.msk.msra.mxu3 %vm124_vm0, %v6343_v37 }
 0x1bf   :  { %v1415_v39 = vadd.f32 %v1414_v18, %v5223_v61  ;;  %v6351_v14 = vpop.f32.mrf.mxu1  ;;  %v2222_v13 = vsel %vm154_vm5, %v2217_v62, %v2176_v16  ;;  %v2213_v33 = vsel %vm142_vm3, %v2208_v26, %v9485_v59  ;;  %v9210_v20 = vmax.f32 %v6288_v15, 0.0  ;;  %v9658_v15 = vld [vmem:[#allocation104_spill] sm:$0xff] }
 0x1c0   :  { %v6349_v19 = vadd.f32 %v1447_v12, %v1152_v60  ;;  %4105 = vmatmul.msk.f32.gmra.mxu0 %vm206_vm7, %v5995_v47  ;;  %4121 = vmatmul.msk.f32.gmra.mxu2 %vm206_vm7, %v5895_v21  ;;  %v2227_v60 = vsel %vm160_vm6, %v2222_v13, %v2187_v38  ;;  %v1117_v12 = vmax.f32 %v1042_v63, 0.0  ;;  %v2218_v18 = vsel %vm148_vm4, %v2213_v33, %v9488_v31  ;;  %v9635_v38 = vld [vmem:[#allocation7_spill] sm:$0xff]  ;;  %v9637_v13 = vld [vmem:[#allocation60_spill] sm:$0xff] }
 0x1c1   :  { %v1448_v0 = vmax.f32 %v1415_v39, 0.0  ;;  %2258 = vmatpush.msra.mxu2 %v2227_v60  ;;  %v779_v16 = vmax.f32 %v744_v55, 0.0  ;;  %v2223_v59 = vsel %vm154_vm5, %v2218_v18, %v9212_v52  ;;  %v818_v26 = vadd.f32 %v778_v8, %v9210_v20 }
 0x1c2   :  { %4114 = vmatmul.msk.f32.gmra.mxu1 %vm206_vm7, %v5995_v47  ;;  %v706_v31 = vadd.f32 %v9635_v38, %v5155_v46  ;;  %v2228_v55 = vsel %vm160_vm6, %v2223_v59, %v2188_v50  ;;  %v9211_v63 = vmax.f32 %v6292_v10, 0.0  ;;  %v1118_v62 = vmax.f32 %v1083_v58, 0.0  ;;  %v9639_v58 = vld [vmem:[#allocation40_spill] sm:$0xff] }
 0x1c3   :  { %v6369_v56 = vadd.f32 %v1448_v0, %v1153_v3  ;;  %4130 = vmatmul.msk.f32.gmra.mxu3 %vm206_vm7, %v5895_v21  ;;  %v1376_v48 = vpop.f32.mrf.mxu2  ;;  %v6389_v0 = vadd.f32 %v9637_v13, %v5155_v46  ;;  %v1157_v60 = vadd.f32 %v1117_v12, %v818_v26  ;;  %v1045_v8 = vadd.f32 %v5937_v6, %v5155_v46  ;;  %v9640_v6 = vld [vmem:[#allocation78_spill] sm:$0xff] }
 0x1c4   :  { %v1377_v39 = vadd.f32 %v1376_v48, %v5181_v45  ;;  %2299 = vmatpush.msra.mxu3 %v2228_v55  ;;  %v819_v48 = vadd.f32 %v779_v16, %v9211_v63  ;;  %v747_v59 = vadd.f32 %v9639_v58, %v5155_v46  ;;  %v783_v55 = vmax.f32 %v706_v31, 0.0 }
 0x1c5   :  { %9634 = vst [vmem:[#allocation11_spill] sm:$0xff] %v6369_v56  ;;  %v6385_v3 = vpop.f32.mrf.mxu0  ;;  %v1086_v16 = vadd.f32 %v6045_v49, %v5155_v46  ;;  %v9213_v31 = vmax.f32 %v6389_v0, 0.0  ;;  %v1048_v63 = vadd.f32 %v5990_v40, %v5199_v22  ;;  %v9648_v40 = vld [vmem:[#allocation81_spill] sm:$0xff] }
 0x1c6   :  { %9636 = vst [vmem:[#allocation98_spill] sm:$0xff] %v6385_v3  ;;  %v1452_v33 = vmax.f32 %v1377_v39, 0.0  ;;  %v1417_v18 = vpop.f32.mrf.mxu3  ;;  %4197 = vmatpush.msk.msrb.mxu3 %vm124_vm0, %v2188_v50  ;;  %v6409_v50 = vadd.f32 %v9640_v6, %v5155_v46  ;;  %v1158_v12 = vadd.f32 %v1118_v62, %v819_v48  ;;  %v1122_v39 = vmax.f32 %v1045_v8, 0.0  ;;  %v9643_v48 = vld [vmem:[#allocation49_spill] sm:$0xff]  ;;  %v9645_v6 = vld [vmem:[#allocation63_spill] sm:$0xff]  ;;  %v9694_v3 = vld [vmem:[#allocation38_spill] sm:$0xff] }
 0x1c7   :  { %9638 = vst [vmem:[#allocation99_spill] sm:$0xff] %v6389_v0  ;;  %v1418_v38 = vadd.f32 %v1417_v18, %v5181_v45  ;;  %v6401_v13 = vpop.f32.mrf.mxu1  ;;  %v823_v62 = vadd.f32 %v783_v55, %v9213_v31  ;;  %v709_v49 = vadd.f32 %v9643_v48, %v5199_v22 }
 0x1c8   :  { %v6399_v20 = vadd.f32 %v1452_v33, %v1157_v60  ;;  %4106 = vmatmul.msk.f32.gmra.mxu0 %vm206_vm7, %v5700_v43  ;;  %4122 = vmatmul.msk.f32.gmra.mxu2 %vm206_vm7, %v5942_v7  ;;  %9641 = vst [vmem:[#allocation54_spill] sm:$0xff] %v6409_v50  ;;  %v784_v60 = vmax.f32 %v747_v59, 0.0  ;;  %v9215_v8 = vmax.f32 %v6409_v50, 0.0  ;;  %v1123_v59 = vmax.f32 %v1086_v16, 0.0 }
 0x1c9   :  { %v1453_v26 = vmax.f32 %v1418_v38, 0.0  ;;  %v788_v10 = vmax.f32 %v709_v49, 0.0  ;;  %v1127_v49 = vmax.f32 %v1048_v63, 0.0 }
 0x1ca   :  { %4115 = vmatmul.msk.f32.gmra.mxu1 %vm206_vm7, %v5700_v43  ;;  %v824_v48 = vadd.f32 %v784_v60, %v9215_v8  ;;  %v9655_v8 = vld [vmem:[#allocation67_spill] sm:$0xff] }
 0x1cb   :  { %v6414_v33 = vadd.f32 %v1453_v26, %v1158_v12  ;;  %4131 = vmatmul.msk.f32.gmra.mxu3 %vm206_vm7, %v5942_v7  ;;  %v1379_v18 = vpop.f32.mrf.mxu2  ;;  %v6430_v12 = vadd.f32 %v9645_v6, %v5199_v22  ;;  %v1162_v26 = vadd.f32 %v1122_v39, %v823_v62  ;;  %v6449_v39 = vadd.f32 %v9648_v40, %v5199_v22  ;;  %v9650_v62 = vld [vmem:[#allocation124_spill] sm:$0xff]  ;;  %v9653_v40 = vld [vmem:[#allocation103_spill] sm:$0xff] }
 0x1cc   :  { %v1380_v58 = vadd.f32 %v1379_v18, %v5155_v46  ;;  %v9647_v18 = vld [vmem:[#allocation18_spill] sm:$0xff]  ;;  %v1163_v60 = vadd.f32 %v1123_v59, %v824_v48  ;;  %v9652_v48 = vld [vmem:[#allocation64_spill] sm:$0xff] }
 0x1cd   :  { %9642 = vst [vmem:[#allocation71_spill] sm:$0xff] %v6414_v33  ;;  %v6426_v38 = vpop.f32.mrf.mxu0  ;;  %v750_v31 = vadd.f32 %v9647_v18, %v5199_v22  ;;  %v9221_v63 = vmax.f32 %v6449_v39, 0.0  ;;  %v6475_v50 = vadd.f32 %v9655_v8, %v9652_v48  ;;  %v753_v0 = vadd.f32 %v9658_v15, %v9652_v48  ;;  %v9661_v15 = vld [vmem:[#allocation128_spill] sm:$0xff] }
 0x1ce   :  { %9644 = vst [vmem:[#allocation43_spill] sm:$0xff] %v6426_v38  ;;  %v1457_v52 = vmax.f32 %v1380_v58, 0.0  ;;  %v1420_v55 = vpop.f32.mrf.mxu3  ;;  %v1089_v58 = vadd.f32 %v9650_v62, %v5199_v22  ;;  %v712_v62 = vadd.f32 %v9653_v40, %v9652_v48 }
 0x1cf   :  { %9646 = vst [vmem:[#allocation20_spill] sm:$0xff] %v6430_v12  ;;  %v1421_v16 = vadd.f32 %v1420_v55, %v5155_v46  ;;  %v6441_v56 = vpop.f32.mrf.mxu1 }
 0x1d0   :  { %v6439_v33 = vadd.f32 %v1457_v52, %v1162_v26  ;;  %4123 = vmatmul.msk.f32.gmra.mxu2 %vm206_vm7, %v5995_v47  ;;  %4135 = vmatmul.msk.f32.vlgmr.msrb.gmra.mxu0 %vm206_vm7, %v5733_v57  ;;  %9649 = vst [vmem:[#allocation57_spill] sm:$0xff] %v6449_v39  ;;  %v9217_v52 = vmax.f32 %v6430_v12, 0.0  ;;  %v789_v26 = vmax.f32 %v750_v31, 0.0  ;;  %v1128_v31 = vmax.f32 %v1089_v58, 0.0 }
 0x1d1   :  { %v1458_v6 = vmax.f32 %v1421_v16, 0.0  ;;  %9656 = vst [vmem:[#allocation16_spill] sm:$0xff] %v6475_v50  ;;  %v793_v38 = vmax.f32 %v712_v62, 0.0 }
 0x1d2   :  { %4144 = vmatmul.msk.f32.vlgmr.msrb.gmra.mxu1 %vm206_vm7, %v5733_v57  ;;  %v828_v59 = vadd.f32 %v788_v10, %v9217_v52  ;;  %v9657_v52 = vld [vmem:[#allocation119_spill] sm:$0xff]  ;;  %v829_v58 = vadd.f32 %v789_v26, %v9221_v63 }
 0x1d3   :  { %v6454_v55 = vadd.f32 %v1458_v6, %v1163_v60  ;;  %4132 = vmatmul.msk.f32.gmra.mxu3 %vm206_vm7, %v5995_v47  ;;  %v1382_v18 = vpop.f32.mrf.mxu2  ;;  %v6471_v6 = vld [vmem:[%s9073_s0 + $0x58] sm:$0x3]  ;;  %v1051_v40 = vadd.f32 %v9657_v52, %v9652_v48  ;;  %v9659_v52 = vld [vmem:[#allocation84_spill] sm:$0xff] }
 0x1d4   :  { %v1383_v16 = vadd.f32 %v1382_v18, %v5199_v22  ;;  %v1167_v10 = vadd.f32 %v1127_v49, %v828_v59  ;;  %4170 = vmatpush.msk.msra.mxu0 %vm124_vm0, %v6471_v6  ;;  %v6496_v59 = vadd.f32 %v9659_v52, %v9652_v48  ;;  %v1168_v26 = vadd.f32 %v1128_v31, %v829_v58  ;;  %v9663_v58 = vld [vmem:[#allocation106_spill] sm:$0xff] }
 0x1d5   :  { %9651 = vst [vmem:[#allocation75_spill] sm:$0xff] %v6454_v55  ;;  %v6466_v60 = vpop.f32.mrf.mxu0  ;;  %v1132_v62 = vmax.f32 %v1051_v40, 0.0  ;;  %v989_v52 = vadd.f32 %v9663_v58, %v5207_v44 }
 0x1d6   :  { %9654 = vst [vmem:[#allocation10_spill] sm:$0xff] %v6466_v60  ;;  %v1462_v55 = vmax.f32 %v1383_v16, 0.0  ;;  %v1423_v18 = vpop.f32.mrf.mxu3  ;;  %v1092_v16 = vadd.f32 %v9661_v15, %v9652_v48  ;;  %v9225_v40 = vmax.f32 %v6496_v59, 0.0 }
 0x1d7   :  { %v1424_v12 = vadd.f32 %v1423_v18, %v5199_v22  ;;  %v6488_v49 = vpop.f32.mrf.mxu1  ;;  %9660 = vst [vmem:[#allocation19_spill] sm:$0xff] %v6496_v59 }
 0x1d8   :  { %v6486_v8 = vadd.f32 %v1462_v55, %v1167_v10  ;;  %4124 = vmatmul.msk.f32.gmra.mxu2 %vm206_vm7, %v5700_v43  ;;  %4136 = vmatmul.msk.f32.gmra.mxu0 %vm206_vm7, %v5770_v28  ;;  %v9224_v55 = vmax.f32 %v6475_v50, 0.0  ;;  %v794_v10 = vmax.f32 %v753_v0, 0.0  ;;  %v1133_v0 = vmax.f32 %v1092_v16, 0.0 }
 0x1d9   :  { %v1463_v18 = vmax.f32 %v1424_v12, 0.0 }
 0x1da   :  { %4145 = vmatmul.msk.f32.gmra.mxu1 %vm206_vm7, %v5770_v28  ;;  %v833_v31 = vadd.f32 %v793_v38, %v9224_v55  ;;  %v834_v50 = vadd.f32 %v794_v10, %v9225_v40  ;;  %v1096_v55 = vmax.f32 %v989_v52, 0.0 }
 0x1db   :  { %v6501_v63 = vadd.f32 %v1463_v18, %v1168_v26  ;;  %4133 = vmatmul.msk.f32.gmra.mxu3 %vm206_vm7, %v5700_v43  ;;  %v1385_v39 = vpop.f32.mrf.mxu2  ;;  %v9665_v43 = vld [vmem:[#allocation122_spill] sm:$0xff] }
 0x1dc   :  { %v1386_v12 = vadd.f32 %v1385_v39, %v9652_v48  ;;  %v1172_v15 = vadd.f32 %v1132_v62, %v833_v31  ;;  %v1324_v18 = vadd.f32 %v9665_v43, %v5207_v44  ;;  %v1173_v16 = vadd.f32 %v1133_v0, %v834_v50  ;;  %v9666_v31 = vld [vmem:[#allocation108_spill] sm:$0xff]  ;;  %v9669_v50 = vld [vmem:[#allocation126_spill] sm:$0xff] }
 0x1dd   :  { %9662 = vst [vmem:[#allocation13_spill] sm:$0xff] %v6501_v63  ;;  %v6513_v26 = vpop.f32.mrf.mxu0  ;;  %v1327_v0 = vadd.f32 %v9669_v50, %v5241_v11  ;;  %v9674_v50 = vld [vmem:[#allocation15_spill] sm:$0xff] }
 0x1de   :  { %9664 = vst [vmem:[#allocation7_spill] sm:$0xff] %v6513_v26  ;;  %v1467_v63 = vmax.f32 %v1386_v12, 0.0  ;;  %v1426_v60 = vpop.f32.mrf.mxu3  ;;  %v992_v12 = vadd.f32 %v9666_v31, %v5241_v11  ;;  %v1431_v43 = vmax.f32 %v1324_v18, 0.0 }
 0x1df   :  { %v1427_v38 = vadd.f32 %v1426_v60, %v9652_v48  ;;  %v6522_v39 = vpop.f32.mrf.mxu1  ;;  %v9668_v60 = vld [vmem:[#allocation73_spill] sm:$0xff] }
 0x1e0   :  { %v6520_v58 = vadd.f32 %v1467_v63, %v1172_v15  ;;  %4137 = vmatmul.msk.f32.gmra.mxu0 %vm206_vm7, %v5798_v51  ;;  %4153 = vmatmul.msk.f32.vlgmr.msra.gmra.mxu2 %vm206_vm7, %v5733_v57  ;;  %v1136_v52 = vadd.f32 %v1096_v55, %v9668_v60  ;;  %v1101_v31 = vmax.f32 %v992_v12, 0.0 }
 0x1e1   :  { %v1468_v62 = vmax.f32 %v1427_v38, 0.0 }
 0x1e2   :  { %4146 = vmatmul.msk.f32.gmra.mxu1 %vm206_vm7, %v5798_v51  ;;  %v1471_v18 = vadd.f32 %v1431_v43, %v1136_v52  ;;  %v9673_v52 = vld [vmem:[#allocation8_spill] sm:$0xff] }
 0x1e3   :  { %v6530_v10 = vadd.f32 %v1468_v62, %v1173_v16  ;;  %4162 = vmatmul.msk.f32.vlgmr.msra.gmra.mxu3 %vm206_vm7, %v5733_v57  ;;  %v1654_v63 = vpop.f32.mrf.mxu2  ;;  %v1436_v57 = vmax.f32 %v1327_v0, 0.0  ;;  %v9675_v0 = vld [vmem:[#allocation111_spill] sm:$0xff] }
 0x1e4   :  { %v1655_v15 = vadd.f32 %v1654_v63, %v5207_v44  ;;  %v9671_v63 = vld [vmem:[#allocation76_spill] sm:$0xff] }
 0x1e5   :  { %9667 = vst [vmem:[#allocation60_spill] sm:$0xff] %v6530_v10  ;;  %v6540_v38 = vpop.f32.mrf.mxu0  ;;  %v1141_v60 = vadd.f32 %v1101_v31, %v9671_v63  ;;  %v995_v31 = vadd.f32 %v9675_v0, %v5291_v41  ;;  %v9227_v0 = vrot.slane %v6247_v30, 2 }
 0x1e6   :  { %9670 = vst [vmem:[#allocation40_spill] sm:$0xff] %v6540_v38  ;;  %v1762_v16 = vmax.f32 %v1655_v15, 0.0  ;;  %v1695_v62 = vpop.f32.mrf.mxu3  ;;  %v2199_v15 = vsel %vm124_vm0, %v9673_v52, %v9602_v42 }
 0x1e7   :  { %v1696_v40 = vadd.f32 %v1695_v62, %v5207_v44  ;;  %v6545_v59 = vpop.f32.mrf.mxu1  ;;  %v1476_v62 = vadd.f32 %v1436_v57, %v1141_v60  ;;  %v6587_v60 = vld [vmem:[%s9073_s0 + $0x60] sm:$0x3] }
 0x1e8   :  { %v6543_v51 = vadd.f32 %v1762_v16, %v1471_v18  ;;  %4138 = vmatmul.msk.f32.gmra.mxu0 %vm206_vm7, %v5841_v29  ;;  %4154 = vmatmul.msk.f32.gmra.mxu2 %vm206_vm7, %v5770_v28  ;;  %v9676_v18 = vld [vmem:[#allocation24_spill] sm:$0xff]  ;;  %v9677_v16 = vld [vmem:[#allocation29_spill] sm:$0xff] }
 0x1e9   :  { %v1763_v55 = vmax.f32 %v1696_v40, 0.0  ;;  %v2200_v40 = vsel %vm124_vm0, %v9674_v50, %v9604_v9  ;;  %4179 = vmatpush.msk.msra.mxu1 %vm124_vm0, %v6587_v60 }
 0x1ea   :  { %4147 = vmatmul.msk.f32.gmra.mxu1 %vm206_vm7, %v5841_v29  ;;  %v2204_v29 = vsel %vm130_vm1, %v2199_v15, %v9676_v18 }
 0x1eb   :  { %v6553_v12 = vadd.f32 %v1763_v55, %v6155_v25  ;;  %4163 = vmatmul.msk.f32.gmra.mxu3 %vm206_vm7, %v5770_v28  ;;  %v1657_v43 = vpop.f32.mrf.mxu2  ;;  %v2205_v28 = vsel %vm130_vm1, %v2200_v40, %v9677_v16  ;;  %v9678_v55 = vld [vmem:[#allocation130_spill] sm:$0xff]  ;;  %v2189_v40 = vrot.slane %v6343_v37, 1 }
 0x1ec   :  { %v1658_v25 = vadd.f32 %v1657_v43, %v5241_v11  ;;  %v1330_v63 = vadd.f32 %v9678_v55, %v5291_v41  ;;  %v2210_v15 = vsel %vm136_vm2, %v2205_v28, %v9504_v5  ;;  %v6602_v5 = vld [vmem:[%s9074_s1 + $0x10] sm:$0xff] }
 0x1ed   :  { %9672 = vst [vmem:[#allocation78_spill] sm:$0xff] %v6553_v12  ;;  %v6574_v10 = vpop.f32.mrf.mxu0  ;;  %v2209_v12 = vsel %vm136_vm2, %v2204_v29, %v9503_v17  ;;  %v1106_v29 = vmax.f32 %v995_v31, 0.0  ;;  %v9680_v31 = vld [vmem:[#allocation31_spill] sm:$0xff] }
 0x1ee   :  { %9679 = vst [vmem:[#allocation49_spill] sm:$0xff] %v6574_v10  ;;  %v1767_v38 = vmax.f32 %v1658_v25, 0.0  ;;  %v1698_v26 = vpop.f32.mrf.mxu3  ;;  %v2214_v43 = vsel %vm142_vm3, %v2209_v12, %v4564_v53  ;;  %v2215_v28 = vsel %vm142_vm3, %v2210_v15, %v9680_v31  ;;  %v6629_v15 = vld [vmem:[%s9073_s0 + $0x68] sm:$0x3]  ;;  %v9229_v10 = vrot.slane %v6247_v30, 3 }
 0x1ef   :  { %v1699_v57 = vadd.f32 %v1698_v26, %v5241_v11  ;;  %v2219_v17 = vsel %vm148_vm4, %v2214_v43, %v4497_v32  ;;  %v6595_v53 = vpop.f32.mrf.mxu1  ;;  %v2190_v26 = vrot.slane %v6471_v6, 1  ;;  %v1441_v43 = vmax.f32 %v1330_v63, 0.0  ;;  %4188 = vmatpush.msk.msrb.mxu2 %vm124_vm0, %v6629_v15 }
 0x1f0   :  { %v6593_v16 = vadd.f32 %v1767_v38, %v1476_v62  ;;  %4139 = vmatmul.msk.f32.gmra.mxu0 %vm206_vm7, %v5895_v21  ;;  %4155 = vmatmul.msk.f32.gmra.mxu2 %vm206_vm7, %v6602_v5  ;;  %v2224_v32 = vsel %vm154_vm5, %v2219_v17, %v9227_v0  ;;  %v9681_v62 = vld [vmem:[#allocation115_spill] sm:$0xff]  ;;  %v2220_v25 = vsel %vm148_vm4, %v2215_v28, %v9612_v2  ;;  %v9683_v63 = vrot.slane %v6343_v37, 2 }
 0x1f1   :  { %v1768_v38 = vmax.f32 %v1699_v57, 0.0  ;;  %v2229_v12 = vsel %vm160_vm6, %v2224_v32, %v2189_v40  ;;  %v998_v55 = vadd.f32 %v9681_v62, %v5223_v61  ;;  %v9684_v2 = vld [vmem:[#allocation79_spill] sm:$0xff] }
 0x1f2   :  { %2340 = vmatpush.msra.mxu0 %v2229_v12  ;;  %4148 = vmatmul.msk.f32.gmra.mxu1 %vm206_vm7, %v5895_v21  ;;  %v2225_v32 = vsel %vm154_vm5, %v2220_v25, %v9683_v63  ;;  %v1146_v12 = vadd.f32 %v1106_v29, %v9684_v2 }
 0x1f3   :  { %v6620_v17 = vadd.f32 %v1768_v38, %v6215_v54  ;;  %4164 = vmatmul.msk.f32.gmra.mxu3 %vm206_vm7, %v6602_v5  ;;  %v1660_v57 = vpop.f32.mrf.mxu2  ;;  %v2230_v21 = vsel %vm160_vm6, %v2225_v32, %v2190_v26  ;;  %v9685_v38 = vld [vmem:[#allocation48_spill] sm:$0xff]  ;;  %v1111_v62 = vmax.f32 %v998_v55, 0.0  ;;  %v9687_v32 = vld [vmem:[#allocation82_spill] sm:$0xff] }
 0x1f4   :  { %v1661_v54 = vadd.f32 %v1660_v57, %v5291_v41  ;;  %4206 = vmatpush.msk.msrb.mxu0 %vm124_vm0, %v2189_v40  ;;  %v1333_v31 = vadd.f32 %v9685_v38, %v5223_v61  ;;  %2381 = vmatpush.msra.mxu1 %v2230_v21  ;;  %v1481_v0 = vadd.f32 %v1441_v43, %v1146_v12  ;;  %v6655_v40 = vld [vmem:[%s9074_s1 + $0x18] sm:$0xff]  ;;  %v9688_v12 = vld [vmem:[#allocation117_spill] sm:$0xff] }
 0x1f5   :  { %9682 = vst [vmem:[#allocation63_spill] sm:$0xff] %v6620_v17  ;;  %v6642_v28 = vpop.f32.mrf.mxu0 }
 0x1f6   :  { %9686 = vst [vmem:[#allocation18_spill] sm:$0xff] %v6642_v28  ;;  %v1772_v25 = vmax.f32 %v1661_v54, 0.0  ;;  %v1701_v63 = vpop.f32.mrf.mxu3  ;;  %4215 = vmatpush.msk.msrb.mxu1 %vm124_vm0, %v2190_v26  ;;  %v1446_v55 = vmax.f32 %v1333_v31, 0.0  ;;  %v2528_v26 = vrot.slane %v6325_v1, 5  ;;  %v1001_v54 = vadd.f32 %v9688_v12, %v5181_v45  ;;  %v9691_v31 = vld [vmem:[#allocation22_spill] sm:$0xff]  ;;  %v9693_v12 = vld [vmem:[#allocation36_spill] sm:$0xff] }
 0x1f7   :  { %v1702_v29 = vadd.f32 %v1701_v63, %v5291_v41  ;;  %v6648_v2 = vpop.f32.mrf.mxu1 }
 0x1f8   :  { %v6646_v57 = vadd.f32 %v1772_v25, %v1481_v0  ;;  %4140 = vmatmul.msk.f32.gmra.mxu0 %vm206_vm7, %v5942_v7  ;;  %4156 = vmatmul.msk.f32.gmra.mxu2 %vm206_vm7, %v6655_v40  ;;  %v1151_v0 = vadd.f32 %v1111_v62, %v9687_v32  ;;  %v9690_v25 = vld [vmem:[#allocation35_spill] sm:$0xff] }
 0x1f9   :  { %v1773_v43 = vmax.f32 %v1702_v29, 0.0  ;;  %v2201_v63 = vsel %vm124_vm0, %v9691_v31, %v9690_v25  ;;  %v9692_v29 = vld [vmem:[#allocation37_spill] sm:$0xff] }
 0x1fa   :  { %4149 = vmatmul.msk.f32.gmra.mxu1 %vm206_vm7, %v5942_v7  ;;  %v2565_v62 = vsel %vm124_vm0, %v9692_v29, %v9630_v36  ;;  %v1486_v17 = vadd.f32 %v1446_v55, %v1151_v0  ;;  %v2191_v0 = vrot.slane %v6587_v60, 1 }
 0x1fb   :  { %v6664_v21 = vadd.f32 %v1773_v43, %v6278_v34  ;;  %4165 = vmatmul.msk.f32.gmra.mxu3 %vm206_vm7, %v6655_v40  ;;  %v1663_v38 = vpop.f32.mrf.mxu2  ;;  %v2206_v34 = vsel %vm130_vm1, %v2201_v63, %v9693_v12  ;;  %v2538_v43 = vrot.slane %v6330_v23, 4  ;;  %v2570_v7 = vsel %vm130_vm1, %v2565_v62, %v9556_v35  ;;  %v9695_v62 = vld [vmem:[#allocation32_spill] sm:$0xff] }
 0x1fc   :  { %v1664_v32 = vadd.f32 %v1663_v38, %v5223_v61  ;;  %v2211_v28 = vsel %vm136_vm2, %v2206_v34, %v9676_v18  ;;  %v2575_v36 = vsel %vm136_vm2, %v2570_v7, %v2528_v26  ;;  %v1336_v38 = vadd.f32 %v6217_v27, %v5181_v45 }
 0x1fd   :  { %9689 = vst [vmem:[#allocation81_spill] sm:$0xff] %v6664_v21  ;;  %v6682_v21 = vpop.f32.mrf.mxu0  ;;  %v9228_v12 = vrot.slane %v6471_v6, 2  ;;  %v2216_v35 = vsel %vm142_vm3, %v2211_v28, %v9694_v3  ;;  %v2558_v34 = vrot.slane %v6325_v1, 3  ;;  %v1116_v26 = vmax.f32 %v1001_v54, 0.0  ;;  %v6707_v3 = vld [vmem:[%s9074_s1 + $0x20] sm:$0xff] }
 0x1fe   :  { %v1777_v29 = vmax.f32 %v1664_v32, 0.0  ;;  %v1704_v63 = vpop.f32.mrf.mxu3  ;;  %v2221_v18 = vsel %vm148_vm4, %v2216_v35, %v9695_v62  ;;  %v2564_v54 = vrot.slane %v6629_v15, 1 }
 0x1ff   :  { %v1705_v55 = vadd.f32 %v1704_v63, %v5223_v61  ;;  %v6700_v27 = vpop.f32.mrf.mxu1  ;;  %v2226_v1 = vsel %vm154_vm5, %v2221_v18, %v9228_v12  ;;  %v1451_v63 = vmax.f32 %v1336_v38, 0.0  ;;  %v9698_v18 = vld [vmem:[#allocation85_spill] sm:$0xff] }
 0x200   :  { %v6698_v7 = vadd.f32 %v1777_v29, %v1486_v17  ;;  %4141 = vmatmul.msk.f32.gmra.mxu0 %vm206_vm7, %v5995_v47  ;;  %4157 = vmatmul.msk.f32.gmra.mxu2 %vm206_vm7, %v6707_v3  ;;  %v2580_v17 = vsel %vm142_vm3, %v2575_v36, %v2538_v43  ;;  %v2231_v32 = vsel %vm160_vm6, %v2226_v1, %v2191_v0  ;;  %v9697_v36 = vrot.slane %v6330_v23, 2  ;;  %v9699_v38 = vld [vmem:[#allocation33_spill] sm:$0xff] }
 0x201   :  { %v1778_v28 = vmax.f32 %v1705_v55, 0.0  ;;  %v2585_v29 = vsel %vm148_vm4, %v2580_v17, %v9229_v10  ;;  %2422 = vmatpush.msrb.mxu2 %v2231_v32  ;;  %v1156_v1 = vadd.f32 %v1116_v26, %v9698_v18  ;;  %v1004_v17 = vadd.f32 %v9699_v38, %v5155_v46 }
 0x202   :  { %v2590_v35 = vsel %vm154_vm5, %v2585_v29, %v2558_v34  ;;  %4150 = vmatmul.msk.f32.gmra.mxu1 %vm206_vm7, %v5995_v47 }
 0x203   :  { %v6722_v62 = vadd.f32 %v1778_v28, %v6349_v19  ;;  %4166 = vmatmul.msk.f32.gmra.mxu3 %vm206_vm7, %v6707_v3  ;;  %v1666_v43 = vpop.f32.mrf.mxu2  ;;  %v2595_v55 = vsel %vm160_vm6, %v2590_v35, %v9697_v36  ;;  %4224 = vmatpush.msk.msra.mxu2 %vm124_vm0, %v2191_v0  ;;  %v1491_v47 = vadd.f32 %v1451_v63, %v1156_v1  ;;  %v1121_v35 = vmax.f32 %v1004_v17, 0.0  ;;  %v6749_v0 = vld [vmem:[%s9074_s1 + $0x38] sm:$0xff]  ;;  %v9702_v17 = vld [vmem:[#allocation12_spill] sm:$0xff] }
 0x204   :  { %v1667_v34 = vadd.f32 %v1666_v43, %v5181_v45  ;;  %2625 = vmatpush.msrb.mxu3 %v2595_v55  ;;  %v1339_v28 = vadd.f32 %v6280_v4, %v5155_v46  ;;  %v6756_v4 = vld [vmem:[%s9074_s1 + $0x28] sm:$0xff]  ;;  %v9701_v1 = vld [vmem:[#allocation87_spill] sm:$0xff] }
 0x205   :  { %9696 = vst [vmem:[#allocation124_spill] sm:$0xff] %v6722_v62  ;;  %v6736_v19 = vpop.f32.mrf.mxu0  ;;  %v1161_v38 = vadd.f32 %v1121_v35, %v9701_v1  ;;  %v6783_v35 = vld [vmem:[%s9074_s1 + $0x30] sm:$0xff] }
 0x206   :  { %4233 = vmatpush.msk.msra.mxu3 %vm124_vm0, %v2564_v54  ;;  %v1782_v32 = vmax.f32 %v1667_v34, 0.0  ;;  %v1707_v29 = vpop.f32.mrf.mxu3  ;;  %v1456_v63 = vmax.f32 %v1339_v28, 0.0  ;;  %v1007_v34 = vadd.f32 %v9702_v17, %v5199_v22  ;;  %v9706_v17 = vld [vmem:[#allocation92_spill] sm:$0xff] }
 0x207   :  { %v1708_v26 = vadd.f32 %v1707_v29, %v5181_v45  ;;  %v6744_v18 = vpop.f32.mrf.mxu1 }
 0x208   :  { %v6742_v36 = vadd.f32 %v1782_v32, %v1491_v47  ;;  %4142 = vmatmul.msk.f32.gmra.mxu0 %vm206_vm7, %v6749_v0  ;;  %4158 = vmatmul.msk.f32.gmra.mxu2 %vm206_vm7, %v6756_v4  ;;  %v1496_v28 = vadd.f32 %v1456_v63, %v1161_v38  ;;  %v1126_v12 = vmax.f32 %v1007_v34, 0.0 }
 0x209   :  { %v1783_v54 = vmax.f32 %v1708_v26, 0.0 }
 0x20a   :  { %4151 = vmatmul.msk.f32.gmra.mxu1 %vm206_vm7, %v6749_v0  ;;  %v1166_v34 = vadd.f32 %v1126_v12, %v9706_v17  ;;  %v6819_v12 = vld [vmem:[%s9074_s1 + $0x8] sm:$0xff] }
 0x20b   :  { %v6761_v43 = vadd.f32 %v1783_v54, %v6399_v20  ;;  %4167 = vmatmul.msk.f32.gmra.mxu3 %vm206_vm7, %v6756_v4  ;;  %v1669_v55 = vpop.f32.mrf.mxu2  ;;  %v1342_v20 = vadd.f32 %v6351_v14, %v5199_v22  ;;  %v6790_v14 = vld [vmem:[%s9074_s1] sm:$0xff] }
 0x20c   :  { %v1670_v47 = vadd.f32 %v1669_v55, %v5155_v46 }
 0x20d   :  { %9700 = vst [vmem:[#allocation64_spill] sm:$0xff] %v6761_v43  ;;  %v6771_v32 = vpop.f32.mrf.mxu0  ;;  %v1461_v55 = vmax.f32 %v1342_v20, 0.0 }
 0x20e   :  { %9703 = vst [vmem:[#allocation103_spill] sm:$0xff] %v6771_v32  ;;  %v1787_v29 = vmax.f32 %v1670_v47, 0.0  ;;  %v1710_v26 = vpop.f32.mrf.mxu3  ;;  %v9707_v47 = vld [vmem:[#allocation118_spill] sm:$0xff] }
 0x20f   :  { %v1711_v54 = vadd.f32 %v1710_v26, %v5155_v46  ;;  %v6778_v62 = vpop.f32.mrf.mxu1  ;;  %v1501_v20 = vadd.f32 %v1461_v55, %v1166_v34  ;;  %v9711_v34 = vld [vmem:[#allocation97_spill] sm:$0xff] }
 0x210   :  { %v6776_v10 = vadd.f32 %v1787_v29, %v1496_v28  ;;  %9704 = vst [vmem:[#allocation67_spill] sm:$0xff] %v6778_v62  ;;  %4159 = vmatmul.msk.f32.gmra.mxu2 %vm206_vm7, %v6783_v35  ;;  %4171 = vmatmul.msk.f32.vlgmr.msra.gmra.mxu0 %vm206_vm7, %v6790_v14  ;;  %v1010_v28 = vadd.f32 %v9707_v47, %v9652_v48 }
 0x211   :  { %v1788_v63 = vmax.f32 %v1711_v54, 0.0 }
 0x212   :  { %4180 = vmatmul.msk.f32.vlgmr.msra.gmra.mxu1 %vm206_vm7, %v6790_v14 }
 0x213   :  { %v6795_v1 = vadd.f32 %v1788_v63, %v6439_v33  ;;  %4168 = vmatmul.msk.f32.gmra.mxu3 %vm206_vm7, %v6783_v35  ;;  %v1672_v38 = vpop.f32.mrf.mxu2  ;;  %v1345_v33 = vadd.f32 %v6401_v13, %v9652_v48 }
 0x214   :  { %v1673_v29 = vadd.f32 %v1672_v38, %v5199_v22 }
 0x215   :  { %9705 = vst [vmem:[#allocation119_spill] sm:$0xff] %v6795_v1  ;;  %v6805_v26 = vpop.f32.mrf.mxu0  ;;  %v1131_v1 = vmax.f32 %v1010_v28, 0.0  ;;  %v1466_v55 = vmax.f32 %v1345_v33, 0.0  ;;  %v9712_v28 = vld [vmem:[#allocation121_spill] sm:$0xff] }
 0x216   :  { %9708 = vst [vmem:[#allocation104_spill] sm:$0xff] %v6805_v26  ;;  %v1792_v54 = vmax.f32 %v1673_v29, 0.0  ;;  %v1713_v63 = vpop.f32.mrf.mxu3  ;;  %v1283_v29 = vadd.f32 %v9712_v28, %v5207_v44  ;;  %v9716_v28 = vld [vmem:[#allocation101_spill] sm:$0xff] }
 0x217   :  { %v1714_v32 = vadd.f32 %v1713_v63, %v5199_v22  ;;  %v6812_v62 = vpop.f32.mrf.mxu1  ;;  %v1171_v47 = vadd.f32 %v1131_v1, %v9711_v34 }
 0x218   :  { %v6810_v43 = vadd.f32 %v1792_v54, %v1501_v20  ;;  %9709 = vst [vmem:[#allocation84_spill] sm:$0xff] %v6812_v62  ;;  %4160 = vmatmul.msk.f32.gmra.mxu2 %vm206_vm7, %v6749_v0  ;;  %4172 = vmatmul.msk.f32.gmra.mxu0 %vm206_vm7, %v6819_v12  ;;  %v1430_v26 = vmax.f32 %v1283_v29, 0.0 }
 0x219   :  { %v1793_v13 = vmax.f32 %v1714_v32, 0.0  ;;  %v1506_v32 = vadd.f32 %v1466_v55, %v1171_v47  ;;  %v9714_v55 = vld [vmem:[#allocation125_spill] sm:$0xff] }
 0x21a   :  { %4181 = vmatmul.msk.f32.gmra.mxu1 %vm206_vm7, %v6819_v12  ;;  %v1470_v29 = vadd.f32 %v1430_v26, %v9716_v28  ;;  %v9718_v26 = vld [vmem:[#allocation6_spill] sm:$0xff]  ;;  %v9720_v28 = vld [vmem:[#allocation61_spill] sm:$0xff] }
 0x21b   :  { %v6824_v38 = vadd.f32 %v1793_v13, %v6486_v8  ;;  %4169 = vmatmul.msk.f32.gmra.mxu3 %vm206_vm7, %v6749_v0  ;;  %v1675_v17 = vpop.f32.mrf.mxu2  ;;  %v1614_v8 = vadd.f32 %v6441_v56, %v5207_v44 }
 0x21c   :  { %v1676_v20 = vadd.f32 %v1675_v17, %v9652_v48  ;;  %v1286_v17 = vadd.f32 %v9714_v55, %v5241_v11 }
 0x21d   :  { %9710 = vst [vmem:[#allocation128_spill] sm:$0xff] %v6824_v38  ;;  %v6834_v54 = vpop.f32.mrf.mxu0  ;;  %v1761_v56 = vmax.f32 %v1614_v8, 0.0 }
 0x21e   :  { %9713 = vst [vmem:[#allocation106_spill] sm:$0xff] %v6834_v54  ;;  %v1797_v33 = vmax.f32 %v1676_v20, 0.0  ;;  %v1716_v63 = vpop.f32.mrf.mxu3  ;;  %v1617_v20 = vadd.f32 %v6488_v49, %v5241_v11  ;;  %v1435_v8 = vmax.f32 %v1286_v17, 0.0  ;;  %v9719_v17 = vld [vmem:[#allocation129_spill] sm:$0xff] }
 0x21f   :  { %v1717_v13 = vadd.f32 %v1716_v63, %v9652_v48  ;;  %v6841_v62 = vpop.f32.mrf.mxu1  ;;  %v1801_v63 = vadd.f32 %v1761_v56, %v1470_v29  ;;  %v1289_v56 = vadd.f32 %v9719_v17, %v5291_v41  ;;  %v1292_v29 = vadd.f32 %v9720_v28, %v5223_v61 }
 0x220   :  { %v6839_v38 = vadd.f32 %v1797_v33, %v1506_v32  ;;  %4173 = vmatmul.msk.f32.gmra.mxu0 %vm206_vm7, %v6602_v5  ;;  %4189 = vmatmul.msk.f32.vlgmr.msrb.gmra.mxu2 %vm206_vm7, %v6790_v14  ;;  %v1766_v55 = vmax.f32 %v1617_v20, 0.0  ;;  %v9230_v28 = vrot.slane %v6343_v37, 3 }
 0x221   :  { %v1798_v1 = vmax.f32 %v1717_v13, 0.0 }
 0x222   :  { %4182 = vmatmul.msk.f32.gmra.mxu1 %vm206_vm7, %v6602_v5 }
 0x223   :  { %v6850_v34 = vadd.f32 %v1798_v1, %v6520_v58  ;;  %4198 = vmatmul.msk.f32.vlgmr.msrb.gmra.mxu3 %vm206_vm7, %v6790_v14  ;;  %v1944_v47 = vpop.f32.mrf.mxu2 }
 0x224   :  { %v1945_v32 = vadd.f32 %v1944_v47, %v5207_v44  ;;  %v1475_v47 = vadd.f32 %v1435_v8, %v9718_v26  ;;  %v9722_v8 = vld [vmem:[#allocation9_spill] sm:$0xff]  ;;  %v2539_v26 = vrot.slane %v6247_v30, 4 }
 0x225   :  { %9715 = vst [vmem:[#allocation122_spill] sm:$0xff] %v6850_v34  ;;  %v6860_v33 = vpop.f32.mrf.mxu0 }
 0x226   :  { %9717 = vst [vmem:[#allocation108_spill] sm:$0xff] %v6860_v33  ;;  %v2092_v58 = vmax.f32 %v1945_v32, 0.0  ;;  %v1985_v13 = vpop.f32.mrf.mxu3 }
 0x227   :  { %v1986_v1 = vadd.f32 %v1985_v13, %v5207_v44  ;;  %v6865_v34 = vpop.f32.mrf.mxu1  ;;  %v1806_v13 = vadd.f32 %v1766_v55, %v1475_v47  ;;  %v2559_v47 = vrot.slane %v6330_v23, 3 }
 0x228   :  { %v6863_v54 = vadd.f32 %v2092_v58, %v1801_v63  ;;  %4174 = vmatmul.msk.f32.gmra.mxu0 %vm206_vm7, %v6655_v40  ;;  %4190 = vmatmul.msk.f32.gmra.mxu2 %vm206_vm7, %v6819_v12  ;;  %v2529_v63 = vrot.slane %v6330_v23, 5  ;;  %v2566_v58 = vsel %vm124_vm0, %v9722_v8, %v9673_v52  ;;  %v2540_v8 = vrot.slane %v6343_v37, 4 }
 0x229   :  { %v2093_v49 = vmax.f32 %v1986_v1, 0.0 }
 0x22a   :  { %4183 = vmatmul.msk.f32.gmra.mxu1 %vm206_vm7, %v6655_v40 }
 0x22b   :  { %v6877_v20 = vadd.f32 %v2093_v49, %v6543_v51  ;;  %4199 = vmatmul.msk.f32.gmra.mxu3 %vm206_vm7, %v6819_v12  ;;  %v1947_v32 = vpop.f32.mrf.mxu2  ;;  %v2571_v51 = vsel %vm130_vm1, %v2566_v58, %v9602_v42  ;;  %v1620_v49 = vadd.f32 %v6522_v39, %v5291_v41  ;;  %v9231_v58 = vrot.slane %v6471_v6, 3 }
 0x22c   :  { %v1948_v1 = vadd.f32 %v1947_v32, %v5241_v11  ;;  %v2576_v33 = vsel %vm136_vm2, %v2571_v51, %v2529_v63  ;;  %v9724_v63 = vld [vmem:[#allocation14_spill] sm:$0xff] }
 0x22d   :  { %9721 = vst [vmem:[#allocation73_spill] sm:$0xff] %v6877_v20  ;;  %v6893_v17 = vpop.f32.mrf.mxu0  ;;  %v2530_v20 = vrot.slane %v6247_v30, 5  ;;  %v2581_v32 = vsel %vm142_vm3, %v2576_v33, %v2539_v26  ;;  %v2567_v51 = vsel %vm124_vm0, %v9724_v63, %v9674_v50 }
 0x22e   :  { %9723 = vst [vmem:[#allocation126_spill] sm:$0xff] %v6893_v17  ;;  %v2097_v52 = vmax.f32 %v1948_v1, 0.0  ;;  %v1988_v55 = vpop.f32.mrf.mxu3  ;;  %v2586_v39 = vsel %vm148_vm4, %v2581_v32, %v9230_v28  ;;  %v1440_v1 = vmax.f32 %v1289_v56, 0.0  ;;  %v2572_v26 = vsel %vm130_vm1, %v2567_v51, %v9604_v9 }
 0x22f   :  { %v1989_v42 = vadd.f32 %v1988_v55, %v5241_v11  ;;  %v6911_v23 = vpop.f32.mrf.mxu1  ;;  %v2591_v33 = vsel %vm154_vm5, %v2586_v39, %v2559_v47  ;;  %v9726_v32 = vrot.slane %v6247_v30, 2  ;;  %v2577_v56 = vsel %vm136_vm2, %v2572_v26, %v2530_v20 }
 0x230   :  { %v6909_v17 = vadd.f32 %v2097_v52, %v1806_v13  ;;  %4175 = vmatmul.msk.f32.gmra.mxu0 %vm206_vm7, %v6707_v3  ;;  %4191 = vmatmul.msk.f32.gmra.mxu2 %vm206_vm7, %v6602_v5  ;;  %v1771_v13 = vmax.f32 %v1620_v49, 0.0  ;;  %v1623_v52 = vadd.f32 %v6545_v59, %v5223_v61  ;;  %v2582_v63 = vsel %vm142_vm3, %v2577_v56, %v2540_v8  ;;  %v9728_v49 = vld [vmem:[#allocation34_spill] sm:$0xff] }
 0x231   :  { %v2098_v55 = vmax.f32 %v1989_v42, 0.0  ;;  %v2596_v50 = vsel %vm160_vm6, %v2591_v33, %v9726_v32  ;;  %v2587_v20 = vsel %vm148_vm4, %v2582_v63, %v9231_v58  ;;  %v1480_v47 = vadd.f32 %v1440_v1, %v9728_v49 }
 0x232   :  { %9725 = vst [vmem:[#allocation76_spill] sm:$0xff] %v6909_v17  ;;  %2666 = vmatpush.msrb.mxu0 %v2596_v50  ;;  %4184 = vmatmul.msk.f32.gmra.mxu1 %vm206_vm7, %v6707_v3  ;;  %v1445_v59 = vmax.f32 %v1292_v29, 0.0  ;;  %v9729_v8 = vrot.slane %v6247_v30, 3  ;;  %v9731_v51 = vrot.slane %v6343_v37, 2  ;;  %v9732_v29 = vld [vmem:[#allocation102_spill] sm:$0xff]  ;;  %v2542_v49 = vrot.slane %v6587_v60, 4 }
 0x233   :  { %v6928_v28 = vadd.f32 %v2098_v55, %v6593_v16  ;;  %4200 = vmatmul.msk.f32.gmra.mxu3 %vm206_vm7, %v6602_v5  ;;  %v1950_v9 = vpop.f32.mrf.mxu2  ;;  %v1811_v26 = vadd.f32 %v1771_v13, %v1480_v47  ;;  %v1776_v55 = vmax.f32 %v1623_v52, 0.0  ;;  %v9734_v13 = vld [vmem:[#allocation66_spill] sm:$0xff] }
 0x234   :  { %v1951_v42 = vadd.f32 %v1950_v9, %v5291_v41  ;;  %v2592_v16 = vsel %vm154_vm5, %v2587_v20, %v9729_v8  ;;  %v1485_v56 = vadd.f32 %v1445_v59, %v9732_v29  ;;  %v1295_v52 = vadd.f32 %v9734_v13, %v5181_v45  ;;  %v9736_v8 = vld [vmem:[#allocation21_spill] sm:$0xff]  ;;  %v9738_v29 = vld [vmem:[#allocation27_spill] sm:$0xff] }
 0x235   :  { %9727 = vst [vmem:[#allocation8_spill] sm:$0xff] %v6928_v28  ;;  %v6942_v39 = vpop.f32.mrf.mxu0  ;;  %v2597_v33 = vsel %vm160_vm6, %v2592_v16, %v9731_v51  ;;  %v2568_v16 = vsel %vm124_vm0, %v9736_v8, %v9691_v31  ;;  %v9740_v8 = vld [vmem:[#allocation39_spill] sm:$0xff] }
 0x236   :  { %9730 = vst [vmem:[#allocation15_spill] sm:$0xff] %v6942_v39  ;;  %v2102_v32 = vmax.f32 %v1951_v42, 0.0  ;;  %v1991_v50 = vpop.f32.mrf.mxu3  ;;  %2707 = vmatpush.msrb.mxu1 %v2597_v33  ;;  %v1816_v20 = vadd.f32 %v1776_v55, %v1485_v56  ;;  %v2531_v42 = vrot.slane %v6343_v37, 5  ;;  %v2541_v33 = vrot.slane %v6471_v6, 4  ;;  %v9739_v56 = vld [vmem:[#allocation25_spill] sm:$0xff] }
 0x237   :  { %v1992_v1 = vadd.f32 %v1991_v50, %v5291_v41  ;;  %v6951_v30 = vpop.f32.mrf.mxu1  ;;  %v2552_v55 = vrot.slane %v6629_v15, 3  ;;  %v2551_v50 = vrot.slane %v6587_v60, 3  ;;  %v2569_v31 = vsel %vm124_vm0, %v9739_v56, %v9738_v29 }
 0x238   :  { %v6949_v63 = vadd.f32 %v2102_v32, %v1811_v26  ;;  %4176 = vmatmul.msk.f32.gmra.mxu0 %vm206_vm7, %v6756_v4  ;;  %4192 = vmatmul.msk.f32.gmra.mxu2 %vm206_vm7, %v6655_v40  ;;  %v2532_v26 = vrot.slane %v6471_v6, 5  ;;  %v2574_v15 = vsel %vm130_vm1, %v2569_v31, %v9740_v8 }
 0x239   :  { %v2103_v9 = vmax.f32 %v1992_v1, 0.0 }
 0x23a   :  { %9733 = vst [vmem:[#allocation111_spill] sm:$0xff] %v6949_v63  ;;  %4185 = vmatmul.msk.f32.gmra.mxu1 %vm206_vm7, %v6756_v4 }
 0x23b   :  { %v6961_v47 = vadd.f32 %v2103_v9, %v6646_v57  ;;  %4201 = vmatmul.msk.f32.gmra.mxu3 %vm206_vm7, %v6655_v40  ;;  %v1953_v59 = vpop.f32.mrf.mxu2  ;;  %v2573_v57 = vsel %vm130_vm1, %v2568_v16, %v9690_v25  ;;  %v1626_v9 = vadd.f32 %v6595_v53, %v5181_v45  ;;  %v9742_v53 = vrot.slane %v6343_v37, 3 }
 0x23c   :  { %v1954_v51 = vadd.f32 %v1953_v59, %v5223_v61  ;;  %v2578_v1 = vsel %vm136_vm2, %v2573_v57, %v2531_v42  ;;  %v2562_v42 = vrot.slane %v6587_v60, 2  ;;  %v2579_v57 = vsel %vm136_vm2, %v2574_v15, %v2532_v26 }
 0x23d   :  { %9735 = vst [vmem:[#allocation24_spill] sm:$0xff] %v6961_v47  ;;  %v6977_v32 = vpop.f32.mrf.mxu0  ;;  %v2583_v25 = vsel %vm142_vm3, %v2578_v1, %v2541_v33  ;;  %v2584_v33 = vsel %vm142_vm3, %v2579_v57, %v2542_v49  ;;  %v9743_v26 = vrot.slane %v6471_v6, 2  ;;  %v9744_v1 = vrot.slane %v6471_v6, 3  ;;  %v9746_v49 = vld [vmem:[#allocation105_spill] sm:$0xff] }
 0x23e   :  { %9737 = vst [vmem:[#allocation29_spill] sm:$0xff] %v6977_v32  ;;  %v2107_v13 = vmax.f32 %v1954_v51, 0.0  ;;  %v1994_v59 = vpop.f32.mrf.mxu3  ;;  %v2588_v58 = vsel %vm148_vm4, %v2583_v25, %v2551_v50  ;;  %v1450_v32 = vmax.f32 %v1295_v52, 0.0  ;;  %v1781_v50 = vmax.f32 %v1626_v9, 0.0 }
 0x23f   :  { %v1995_v16 = vadd.f32 %v1994_v59, %v5223_v61  ;;  %v6995_v56 = vpop.f32.mrf.mxu1  ;;  %v2593_v51 = vsel %vm154_vm5, %v2588_v58, %v9742_v53  ;;  %v1298_v9 = vadd.f32 %v6265_v24, %v5155_v46  ;;  %v1629_v25 = vadd.f32 %v6648_v2, %v5155_v46 }
 0x240   :  { %v6993_v29 = vadd.f32 %v2107_v13, %v1816_v20  ;;  %4177 = vmatmul.msk.f32.gmra.mxu0 %vm206_vm7, %v6783_v35  ;;  %4193 = vmatmul.msk.f32.gmra.mxu2 %vm206_vm7, %v6707_v3  ;;  %v2598_v52 = vsel %vm160_vm6, %v2593_v51, %v9743_v26  ;;  %v2589_v20 = vsel %vm148_vm4, %v2584_v33, %v2552_v55  ;;  %v9750_v33 = vld [vmem:[#allocation107_spill] sm:$0xff]  ;;  %v9751_v26 = vld [vmem:[#allocation26_spill] sm:$0xff] }
 0x241   :  { %v2108_v60 = vmax.f32 %v1995_v16, 0.0  ;;  %2748 = vmatpush.msra.mxu2 %v2598_v52  ;;  %v2594_v31 = vsel %vm154_vm5, %v2589_v20, %v9744_v1  ;;  %v1490_v55 = vadd.f32 %v1450_v32, %v9746_v49  ;;  %v1455_v57 = vmax.f32 %v1298_v9, 0.0 }
 0x242   :  { %9741 = vst [vmem:[#allocation130_spill] sm:$0xff] %v6993_v29  ;;  %4186 = vmatmul.msk.f32.gmra.mxu1 %vm206_vm7, %v6783_v35  ;;  %v2599_v58 = vsel %vm160_vm6, %v2594_v31, %v2562_v42  ;;  %v1786_v53 = vmax.f32 %v1629_v25, 0.0  ;;  %v1301_v52 = vadd.f32 %v9751_v26, %v5199_v22 }
 0x243   :  { %v7013_v13 = vadd.f32 %v2108_v60, %v6698_v7  ;;  %4202 = vmatmul.msk.f32.gmra.mxu3 %vm206_vm7, %v6707_v3  ;;  %v1956_v37 = vpop.f32.mrf.mxu2  ;;  %v1821_v7 = vadd.f32 %v1781_v50, %v1490_v55  ;;  %v1495_v60 = vadd.f32 %v1455_v57, %v9750_v33 }
 0x244   :  { %v1957_v6 = vadd.f32 %v1956_v37, %v5181_v45  ;;  %2789 = vmatpush.msra.mxu3 %v2599_v58  ;;  %v1460_v49 = vmax.f32 %v1301_v52, 0.0 }
 0x245   :  { %9745 = vst [vmem:[#allocation31_spill] sm:$0xff] %v7013_v13  ;;  %v7024_v59 = vpop.f32.mrf.mxu0  ;;  %v1826_v1 = vadd.f32 %v1786_v53, %v1495_v60 }
 0x246   :  { %9747 = vst [vmem:[#allocation115_spill] sm:$0xff] %v7024_v59  ;;  %v2112_v8 = vmax.f32 %v1957_v6, 0.0  ;;  %v1997_v15 = vpop.f32.mrf.mxu3 }
 0x247   :  { %v1998_v16 = vadd.f32 %v1997_v15, %v5181_v45  ;;  %v7031_v32 = vpop.f32.mrf.mxu1 }
 0x248   :  { %v7029_v42 = vadd.f32 %v2112_v8, %v1821_v7  ;;  %4178 = vmatmul.msk.f32.gmra.mxu0 %vm206_vm7, %v6749_v0  ;;  %4194 = vmatmul.msk.f32.gmra.mxu2 %vm206_vm7, %v6756_v4  ;;  %v9755_v8 = vld [vmem:[#allocation110_spill] sm:$0xff] }
 0x249   :  { %v2113_v24 = vmax.f32 %v1998_v16, 0.0  ;;  %v1500_v15 = vadd.f32 %v1460_v49, %v9755_v8  ;;  %v9756_v16 = vld [vmem:[#allocation98_spill] sm:$0xff] }
 0x24a   :  { %9748 = vst [vmem:[#allocation79_spill] sm:$0xff] %v7029_v42  ;;  %4187 = vmatmul.msk.f32.gmra.mxu1 %vm206_vm7, %v6749_v0  ;;  %v1304_v57 = vadd.f32 %v9756_v16, %v9652_v48  ;;  %v1591_v42 = vadd.f32 %v6682_v21, %v5199_v22  ;;  %v1922_v21 = vadd.f32 %v6995_v56, %v5199_v22 }
 0x24b   :  { %v7038_v51 = vadd.f32 %v2113_v24, %v6742_v36  ;;  %4203 = vmatmul.msk.f32.gmra.mxu3 %vm206_vm7, %v6756_v4  ;;  %v1959_v2 = vpop.f32.mrf.mxu2  ;;  %v1632_v36 = vadd.f32 %v6700_v27, %v5199_v22 }
 0x24c   :  { %v1960_v20 = vadd.f32 %v1959_v2, %v5155_v46  ;;  %v1465_v52 = vmax.f32 %v1304_v57, 0.0 }
 0x24d   :  { %9749 = vst [vmem:[#allocation48_spill] sm:$0xff] %v7038_v51  ;;  %v7048_v50 = vpop.f32.mrf.mxu0  ;;  %v1791_v7 = vmax.f32 %v1632_v36, 0.0 }
 0x24e   :  { %v2117_v31 = vmax.f32 %v1960_v20, 0.0  ;;  %v2000_v37 = vpop.f32.mrf.mxu3 }
 0x24f   :  { %v2001_v58 = vadd.f32 %v2000_v37, %v5155_v46  ;;  %v7055_v9 = vpop.f32.mrf.mxu1  ;;  %v1831_v2 = vadd.f32 %v1791_v7, %v1500_v15 }
 0x250   :  { %v7053_v55 = vadd.f32 %v2117_v31, %v1826_v1  ;;  %9753 = vst [vmem:[#allocation117_spill] sm:$0xff] %v7055_v9  ;;  %4195 = vmatmul.msk.f32.gmra.mxu2 %vm206_vm7, %v6783_v35  ;;  %4207 = vmatmul.msk.f32.vlgmr.msrb.gmra.mxu0 %vm206_vm7, %v6790_v14 }
 0x251   :  { %v2118_v6 = vmax.f32 %v2001_v58, 0.0  ;;  %v9760_v58 = vld [vmem:[#allocation113_spill] sm:$0xff] }
 0x252   :  { %9752 = vst [vmem:[#allocation82_spill] sm:$0xff] %v7053_v55  ;;  %4216 = vmatmul.msk.f32.vlgmr.msrb.gmra.mxu1 %vm206_vm7, %v6790_v14  ;;  %v1505_v49 = vadd.f32 %v1465_v52, %v9760_v58 }
 0x253   :  { %v7062_v25 = vadd.f32 %v2118_v6, %v6776_v10  ;;  %4204 = vmatmul.msk.f32.gmra.mxu3 %vm206_vm7, %v6783_v35  ;;  %v1962_v27 = vpop.f32.mrf.mxu2  ;;  %v1635_v10 = vadd.f32 %v6744_v18, %v9652_v48 }
 0x254   :  { %v1963_v24 = vadd.f32 %v1962_v27, %v5199_v22 }
 0x255   :  { %9754 = vst [vmem:[#allocation35_spill] sm:$0xff] %v7062_v25  ;;  %v7072_v53 = vpop.f32.mrf.mxu0  ;;  %v1796_v31 = vmax.f32 %v1635_v10, 0.0 }
 0x256   :  { %v2122_v33 = vmax.f32 %v1963_v24, 0.0  ;;  %v2003_v60 = vpop.f32.mrf.mxu3 }
 0x257   :  { %v2004_v26 = vadd.f32 %v2003_v60, %v5199_v22  ;;  %v7079_v1 = vpop.f32.mrf.mxu1  ;;  %v1836_v27 = vadd.f32 %v1796_v31, %v1505_v49 }
 0x258   :  { %v7077_v20 = vadd.f32 %v2122_v33, %v1831_v2  ;;  %9758 = vst [vmem:[#allocation37_spill] sm:$0xff] %v7079_v1  ;;  %4196 = vmatmul.msk.f32.gmra.mxu2 %vm206_vm7, %v6749_v0  ;;  %4208 = vmatmul.msk.f32.gmra.mxu0 %vm206_vm7, %v6819_v12 }
 0x259   :  { %v2123_v36 = vmax.f32 %v2004_v26, 0.0 }
 0x25a   :  { %9757 = vst [vmem:[#allocation22_spill] sm:$0xff] %v7077_v20  ;;  %4217 = vmatmul.msk.f32.gmra.mxu1 %vm206_vm7, %v6819_v12  ;;  %v9798_v20 = vld [vmem:[#allocation7_spill] sm:$0xff] }
 0x25b   :  { %v7086_v37 = vadd.f32 %v2123_v36, %v6810_v43  ;;  %4205 = vmatmul.msk.f32.gmra.mxu3 %vm206_vm7, %v6749_v0  ;;  %v1965_v18 = vpop.f32.mrf.mxu2  ;;  %v1579_v55 = vadd.f32 %v9798_v20, %v5291_v41 }
 0x25c   :  { %v1966_v6 = vadd.f32 %v1965_v18, %v9652_v48 }
 0x25d   :  { %9759 = vst [vmem:[#allocation36_spill] sm:$0xff] %v7086_v37  ;;  %v7094_v7 = vpop.f32.mrf.mxu0  ;;  %v1770_v20 = vmax.f32 %v1579_v55, 0.0 }
 0x25e   :  { %9761 = vst [vmem:[#allocation38_spill] sm:$0xff] %v7094_v7  ;;  %v2127_v8 = vmax.f32 %v1966_v6, 0.0  ;;  %v2006_v15 = vpop.f32.mrf.mxu3 }
 0x25f   :  { %v2007_v16 = vadd.f32 %v2006_v15, %v9652_v48  ;;  %v7099_v57 = vpop.f32.mrf.mxu1 }
 0x260   :  { %v7097_v43 = vadd.f32 %v2127_v8, %v1836_v27  ;;  %9763 = vst [vmem:[#allocation85_spill] sm:$0xff] %v7099_v57  ;;  %4209 = vmatmul.msk.f32.gmra.mxu0 %vm206_vm7, %v6602_v5  ;;  %4225 = vmatmul.msk.f32.vlgmr.msra.gmra.mxu2 %vm206_vm7, %v6790_v14  ;;  %v3811_v8 = vld [vmem:[%s9078_s5] sm:$0x7] }
 0x261   :  { %v2128_v24 = vmax.f32 %v2007_v16, 0.0  ;;  %3814 = vperm.xlu2 %4303, %v3811_v8  }
 0x262   :  { %9762 = vst [vmem:[#allocation32_spill] sm:$0xff] %v7097_v43  ;;  %4218 = vmatmul.msk.f32.gmra.mxu1 %vm206_vm7, %v6602_v5 }
 0x263   :  { %v7106_v2 = vadd.f32 %v2128_v24, %v6839_v38  ;;  %4234 = vmatmul.msk.f32.vlgmr.msra.gmra.mxu3 %vm206_vm7, %v6790_v14  ;;  %v7112_v10 = vpop.f32.mrf.mxu2 }
 0x265   :  { %9764 = vst [vmem:[#allocation33_spill] sm:$0xff] %v7106_v2  ;;  %v7114_v33 = vpop.f32.mrf.mxu0 }
 0x266   :  { %9765 = vst [vmem:[#allocation87_spill] sm:$0xff] %v7114_v33  ;;  %v7116_v60 = vpop.f32.mrf.mxu3 }
 0x267   :  { %v7118_v26 = vpop.f32.mrf.mxu1 }
 0x268   :  { %9766 = vst [vmem:[#allocation12_spill] sm:$0xff] %v7118_v26  ;;  %4210 = vmatmul.msk.f32.gmra.mxu0 %vm206_vm7, %v6655_v40  ;;  %4226 = vmatmul.msk.f32.gmra.mxu2 %vm206_vm7, %v6819_v12 }
 0x26a   :  { %4219 = vmatmul.msk.f32.gmra.mxu1 %vm206_vm7, %v6655_v40 }
 0x26b   :  { %4235 = vmatmul.msk.f32.gmra.mxu3 %vm206_vm7, %v6819_v12  ;;  %v7128_v14 = vpop.f32.mrf.mxu2 }
 0x26d   :  { %v7130_v38 = vpop.f32.mrf.mxu0 }
 0x26e   :  { %v7132_v52 = vpop.f32.mrf.mxu3 }
 0x26f   :  { %v7134_v36 = vpop.f32.mrf.mxu1 }
 0x270   :  { %9767 = vst [vmem:[#allocation92_spill] sm:$0xff] %v7134_v36  ;;  %4211 = vmatmul.msk.f32.gmra.mxu0 %vm206_vm7, %v6707_v3  ;;  %4227 = vmatmul.msk.f32.gmra.mxu2 %vm206_vm7, %v6602_v5 }
 0x272   :  { %4220 = vmatmul.msk.f32.gmra.mxu1 %vm206_vm7, %v6707_v3 }
 0x273   :  { %4236 = vmatmul.msk.f32.gmra.mxu3 %vm206_vm7, %v6602_v5  ;;  %v7144_v12 = vpop.f32.mrf.mxu2 }
 0x275   :  { %v7146_v31 = vpop.f32.mrf.mxu0 }
 0x276   :  { %9768 = vst [vmem:[#allocation118_spill] sm:$0xff] %v7146_v31  ;;  %v7148_v18 = vpop.f32.mrf.mxu3 }
 0x277   :  { %v7150_v58 = vpop.f32.mrf.mxu1 }
 0x278   :  { %9769 = vst [vmem:[#allocation97_spill] sm:$0xff] %v7150_v58  ;;  %4212 = vmatmul.msk.f32.gmra.mxu0 %vm206_vm7, %v6756_v4  ;;  %4228 = vmatmul.msk.f32.gmra.mxu2 %vm206_vm7, %v6655_v40 }
 0x27a   :  { %4221 = vmatmul.msk.f32.gmra.mxu1 %vm206_vm7, %v6756_v4 }
 0x27b   :  { %4237 = vmatmul.msk.f32.gmra.mxu3 %vm206_vm7, %v6655_v40  ;;  %v7160_v5 = vpop.f32.mrf.mxu2 }
 0x27d   :  { %v7162_v49 = vpop.f32.mrf.mxu0 }
 0x27e   :  { %9770 = vst [vmem:[#allocation121_spill] sm:$0xff] %v7162_v49  ;;  %v7164_v6 = vpop.f32.mrf.mxu3 }
 0x27f   :  { %v7166_v27 = vpop.f32.mrf.mxu1 }
 0x280   :  { %9771 = vst [vmem:[#allocation125_spill] sm:$0xff] %v7166_v27  ;;  %4213 = vmatmul.msk.f32.gmra.mxu0 %vm206_vm7, %v6783_v35  ;;  %4229 = vmatmul.msk.f32.gmra.mxu2 %vm206_vm7, %v6707_v3 }
 0x282   :  { %4222 = vmatmul.msk.f32.gmra.mxu1 %vm206_vm7, %v6783_v35 }
 0x283   :  { %4238 = vmatmul.msk.f32.gmra.mxu3 %vm206_vm7, %v6707_v3  ;;  %v7176_v40 = vpop.f32.mrf.mxu2 }
 0x285   :  { %v7181_v15 = vpop.f32.mrf.mxu0 }
 0x286   :  { %9772 = vst [vmem:[#allocation101_spill] sm:$0xff] %v7181_v15  ;;  %v7183_v16 = vpop.f32.mrf.mxu3 }
 0x287   :  { %v7185_v24 = vpop.f32.mrf.mxu1 }
 0x288   :  { %9773 = vst [vmem:[#allocation6_spill] sm:$0xff] %v7185_v24  ;;  %4214 = vmatmul.msk.f32.gmra.mxu0 %vm206_vm7, %v6749_v0  ;;  %4230 = vmatmul.msk.f32.gmra.mxu2 %vm206_vm7, %v6756_v4 }
 0x28a   :  { %4223 = vmatmul.msk.f32.gmra.mxu1 %vm206_vm7, %v6749_v0 }
 0x28b   :  { %4239 = vmatmul.msk.f32.gmra.mxu3 %vm206_vm7, %v6756_v4  ;;  %v7195_v3 = vpop.f32.mrf.mxu2 }
 0x28d   :  { %v7197_v8 = vpop.f32.mrf.mxu0 }
 0x28e   :  { %9774 = vst [vmem:[#allocation129_spill] sm:$0xff] %v7197_v8  ;;  %v7199_v9 = vpop.f32.mrf.mxu3 }
 0x28f   :  { %v7201_v1 = vpop.f32.mrf.mxu1 }
 0x290   :  { %9775 = vst [vmem:[#allocation61_spill] sm:$0xff] %v7201_v1  ;;  %4231 = vmatmul.msk.f32.gmra.mxu2 %vm206_vm7, %v6783_v35 }
 0x293   :  { %4240 = vmatmul.msk.f32.gmra.mxu3 %vm206_vm7, %v6783_v35  ;;  %v2278_v26 = vpop.f32.mrf.mxu2 }
 0x294   :  { %v2279_v56 = vadd.f32 %v2278_v26, %v5199_v22  ;;  %v2276_v26 = vadd.f32 %v7195_v3, %v5155_v46 }
 0x295   :  { %v7207_v57 = vpop.f32.mrf.mxu0 }
 0x296   :  { %9776 = vst [vmem:[#allocation9_spill] sm:$0xff] %v7207_v57  ;;  %v7209_v36 = vpop.f32.mrf.mxu3  ;;  %v9806_v57 = vld [vmem:[#allocation68_spill] sm:$0xff]  ;;  %v2473_v17 = vmax.f32 %v2276_v26, 0.0 }
 0x297   :  { %v7211_v4 = vpop.f32.mrf.mxu1 }
 0x298   :  { %9777 = vst [vmem:[#allocation14_spill] sm:$0xff] %v7211_v4  ;;  %4232 = vmatmul.msk.f32.gmra.mxu2 %vm206_vm7, %v6749_v0 }
 0x29b   :  { %4241 = vmatmul.msk.f32.gmra.mxu3 %vm206_vm7, %v6749_v0  ;;  %v2281_v58 = vpop.f32.mrf.mxu2 }
 0x29d   :  { %v7217_v27 = vpop.f32.mrf.mxu0 }
 0x29e   :  { %9778 = vst [vmem:[#allocation34_spill] sm:$0xff] %v7217_v27  ;;  %v7219_v24 = vpop.f32.mrf.mxu3 }
 0x29f   :  { %v7221_v59 = vpop.f32.mrf.mxu1 }
 0x2a0   :  { %9779 = vst [vmem:[#allocation102_spill] sm:$0xff] %v7221_v59 }
 0x2a3   :  { %v7223_v35 = vpop.f32.mrf.mxu2 }
 0x2a4   :  { %9780 = vst [vmem:[#allocation66_spill] sm:$0xff] %v7223_v35 }
 0x2a5   :  { %v7225_v39 = vpop.f32.mrf.mxu0 }
 0x2a6   :  { %9781 = vst [vmem:[#allocation21_spill] sm:$0xff] %v7225_v39  ;;  %v7227_v1 = vpop.f32.mrf.mxu3 }
 0x2a7   :  { %v7229_v4 = vpop.f32.mrf.mxu1 }
 0x2a8   :  { %9782 = vst [vmem:[#allocation27_spill] sm:$0xff] %v7229_v4 }
 0x2ab   :  { %v7231_v31 = vpop.f32.mrf.mxu2 }
 0x2ac   :  { %9783 = vst [vmem:[#allocation25_spill] sm:$0xff] %v7231_v31 }
 0x2ad   :  { %v7233_v33 = vpop.f32.mrf.mxu0 }
 0x2ae   :  { %9784 = vst [vmem:[#allocation39_spill] sm:$0xff] %v7233_v33  ;;  %v7235_v0 = vpop.f32.mrf.mxu3 }
 0x2af   :  { %v7237_v7 = vpop.f32.mrf.mxu1 }
 0x2b0   :  { %9785 = vst [vmem:[#allocation105_spill] sm:$0xff] %v7237_v7 }
 0x2b3   :  { %v7239_v28 = vpop.f32.mrf.mxu2 }
 0x2b4   :  { %9786 = vst [vmem:[#allocation107_spill] sm:$0xff] %v7239_v28 }
 0x2b5   :  { %v7241_v49 = vpop.f32.mrf.mxu0 }
 0x2b6   :  { %9787 = vst [vmem:[#allocation26_spill] sm:$0xff] %v7241_v49  ;;  %v7243_v59 = vpop.f32.mrf.mxu3 }
 0x2b7   :  { %v7245_v35 = vpop.f32.mrf.mxu1 }
 0x2b8   :  { %9788 = vst [vmem:[#allocation110_spill] sm:$0xff] %v7245_v35 }
 0x2bb   :  { %v7247_v47 = vpop.f32.mrf.mxu2 }
 0x2bc   :  { %9789 = vst [vmem:[#allocation98_spill] sm:$0xff] %v7247_v47  ;;  %v9797_v47 = vld [vmem:[#allocation10_spill] sm:$0xff] }
 0x2bd   :  { %v7249_v13 = vpop.f32.mrf.mxu0  ;;  %v1576_v35 = vadd.f32 %v9797_v47, %v5241_v11 }
 0x2be   :  { %9790 = vst [vmem:[#allocation113_spill] sm:$0xff] %v7249_v13  ;;  %v7251_v4 = vpop.f32.mrf.mxu3 }
 0x2bf   :  { %v7253_v31 = vpop.f32.mrf.mxu1  ;;  %v1765_v47 = vmax.f32 %v1576_v35, 0.0  ;;  %v1790_v35 = vmax.f32 %v1591_v42, 0.0  ;;  %v1919_v42 = vadd.f32 %v6951_v30, %v5155_v46  ;;  %v2121_v30 = vmax.f32 %v1922_v21, 0.0 }
 0x2c0   :  { %9791 = vst [vmem:[#allocation131_spill] sm:$0xff] %v7253_v31  ;;  %v9799_v31 = vld [vmem:[#allocation40_spill] sm:$0xff]  ;;  %v2478_v21 = vmax.f32 %v2279_v56, 0.0 }
 0x2c3   :  { %v7255_v2 = vpop.f32.mrf.mxu2 }
 0x2c4   :  { %9792 = vst [vmem:[#allocation132_spill] sm:$0xff] %v7255_v2  ;;  %v1582_v2 = vadd.f32 %v9799_v31, %v5223_v61  ;;  %v1594_v31 = vadd.f32 %v6736_v19, %v9652_v48  ;;  %v9808_v19 = vld [vmem:[#allocation50_spill] sm:$0xff] }
 0x2c5   :  { %v7257_v37 = vpop.f32.mrf.mxu0 }
 0x2c6   :  { %9793 = vst [vmem:[#allocation133_spill] sm:$0xff] %v7257_v37  ;;  %v7259_v7 = vpop.f32.mrf.mxu3  ;;  %v9800_v37 = vld [vmem:[#allocation49_spill] sm:$0xff]  ;;  %v1775_v13 = vmax.f32 %v1582_v2, 0.0  ;;  %v9807_v2 = vld [vmem:[#allocation47_spill] sm:$0xff] }
 0x2c7   :  { %v7261_v28 = vpop.f32.mrf.mxu1  ;;  %v1585_v39 = vadd.f32 %v9800_v37, %v5181_v45  ;;  %v7298_v29 = vadd.f32 %v1770_v20, %v9807_v2  ;;  %v9812_v20 = vld [vmem:[#allocation123_spill] sm:$0xff] }
 0x2c8   :  { %9794 = vst [vmem:[#allocation134_spill] sm:$0xff] %v7261_v28  ;;  %v9802_v28 = vld [vmem:[#allocation18_spill] sm:$0xff]  ;;  %v1815_v33 = vadd.f32 %v1775_v13, %v9808_v19  ;;  %v1910_v13 = vadd.f32 %v6841_v62, %v5291_v41  ;;  %v1916_v19 = vadd.f32 %v6911_v23, %v5181_v45  ;;  %v2273_v23 = vadd.f32 %v7176_v40, %v5181_v45 }
 0x2c9   :  { %v1780_v37 = vmax.f32 %v1585_v39, 0.0  ;;  %v1925_v39 = vadd.f32 %v7031_v32, %v9652_v48  ;;  %v1913_v32 = vadd.f32 %v6865_v34, %v5223_v61  ;;  %v7346_v40 = vadd.f32 %v7259_v7, %v5181_v45 }
 0x2ca   :  { %v2101_v3 = vmax.f32 %v1910_v13, 0.0 }
 0x2cb   :  { %v7263_v25 = vpop.f32.mrf.mxu2  ;;  %v2126_v62 = vmax.f32 %v1925_v39, 0.0  ;;  %v2106_v63 = vmax.f32 %v1913_v32, 0.0  ;;  %v2111_v39 = vmax.f32 %v1916_v19, 0.0  ;;  %v2267_v32 = vadd.f32 %v7144_v12, %v5291_v41 }
 0x2cc   :  { %9795 = vst [vmem:[#allocation135_spill] sm:$0xff] %v7263_v25  ;;  %v1588_v25 = vadd.f32 %v9802_v28, %v5155_v46  ;;  %v9810_v28 = vld [vmem:[#allocation84_spill] sm:$0xff]  ;;  %v7366_v12 = vadd.f32 %v7243_v59, %v5291_v41  ;;  %v7383_v59 = vadd.f32 %v7235_v0, %v5241_v11  ;;  %v2141_v0 = vadd.f32 %v2101_v3, %v7298_v29 }
 0x2cd   :  { %v7265_v51 = vpop.f32.mrf.mxu0  ;;  %v9828_v3 = vld [vmem:[#allocation116_spill] sm:$0xff] }
 0x2ce   :  { %9796 = vst [vmem:[#allocation136_spill] sm:$0xff] %v7265_v51  ;;  %v2642_v43 = vpop.f32.mrf.mxu3  ;;  %v9803_v51 = vld [vmem:[#allocation43_spill] sm:$0xff] }
 0x2cf   :  { %v7275_v8 = vpop.f32.mrf.mxu1  ;;  %v7281_v15 = vadd.f32 %v9803_v51, %v5207_v44  ;;  %v7293_v51 = vadd.f32 %v1765_v47, %v9806_v57  ;;  %v7306_v57 = vadd.f32 %v9810_v28, %v5241_v11 }
 0x2d0   :  { %9801 = vst [vmem:[#allocation10_spill] sm:$0xff] %v7275_v8  ;;  %v1785_v8 = vmax.f32 %v1588_v25, 0.0  ;;  %v9809_v25 = vld [vmem:[#allocation120_spill] sm:$0xff] }
 0x2d2   :  { %v1825_v2 = vadd.f32 %v1785_v8, %v9812_v20  ;;  %v9815_v8 = vld [vmem:[#allocation67_spill] sm:$0xff] }
 0x2d3   :  { %v7287_v27 = vpop.f32.mrf.mxu2  ;;  %v7327_v20 = vadd.f32 %v9815_v8, %v5207_v44 }
 0x2d4   :  { %9804 = vst [vmem:[#allocation7_spill] sm:$0xff] %v7287_v27  ;;  %v1795_v27 = vmax.f32 %v1594_v31, 0.0  ;;  %v2282_v31 = vadd.f32 %v2281_v58, %v9652_v48 }
 0x2d5   :  { %v7289_v49 = vpop.f32.mrf.mxu0 }
 0x2d6   :  { %9805 = vst [vmem:[#allocation40_spill] sm:$0xff] %v7289_v49  ;;  %v2645_v55 = vpop.f32.mrf.mxu3  ;;  %v1820_v49 = vadd.f32 %v1780_v37, %v9809_v25  ;;  %v9813_v37 = vld [vmem:[#allocation127_spill] sm:$0xff]  ;;  %v9814_v25 = vld [vmem:[#allocation114_spill] sm:$0xff] }
 0x2d7   :  { %v7311_v47 = vpop.f32.mrf.mxu1  ;;  %v1830_v28 = vadd.f32 %v1790_v35, %v9813_v37  ;;  %v7330_v34 = vadd.f32 %v2645_v55, %v5199_v22  ;;  %v2096_v35 = vmax.f32 %v7306_v57, 0.0  ;;  %v2116_v37 = vmax.f32 %v1919_v42, 0.0 }
 0x2d8   :  { %9811 = vst [vmem:[#allocation49_spill] sm:$0xff] %v7311_v47  ;;  %v1835_v47 = vadd.f32 %v1795_v27, %v9814_v25  ;;  %v2483_v27 = vmax.f32 %v2282_v31, 0.0  ;;  %v7338_v25 = vadd.f32 %v2642_v43, %v5155_v46  ;;  %v2468_v31 = vmax.f32 %v2273_v23, 0.0 }
 0x2d9   :  { %v2161_v55 = vadd.f32 %v2121_v30, %v1830_v28  ;;  %v2845_v56 = vmax.f32 %v7330_v34, 0.0  ;;  %v2156_v43 = vadd.f32 %v2116_v37, %v1825_v2  ;;  %v2151_v26 = vadd.f32 %v2111_v39, %v1820_v49 }
 0x2da   :  { %v2166_v42 = vadd.f32 %v2126_v62, %v1835_v47  ;;  %v7358_v47 = vadd.f32 %v7251_v4, %v5223_v61  ;;  %v2840_v7 = vmax.f32 %v7338_v25, 0.0  ;;  %v2264_v2 = vadd.f32 %v7128_v14, %v5241_v11 }
 0x2db   :  { %v7332_v58 = vpop.f32.mrf.mxu2  ;;  %v2518_v28 = vadd.f32 %v2478_v21, %v2161_v55  ;;  %v2513_v37 = vadd.f32 %v2473_v17, %v2156_v43  ;;  %v2835_v23 = vmax.f32 %v7346_v40, 0.0  ;;  %v2261_v17 = vadd.f32 %v7112_v10, %v5207_v44  ;;  %v7548_v40 = vld [vmem:[%s9076_s3 + $0x18] sm:$0xff] }
 0x2dc   :  { %9816 = vst [vmem:[#allocation18_spill] sm:$0xff] %v7332_v58  ;;  %v2270_v58 = vadd.f32 %v7160_v5, %v5223_v61  ;;  %v2523_v5 = vadd.f32 %v2483_v27, %v2166_v42  ;;  %v2146_v27 = vadd.f32 %v2106_v63, %v1815_v33  ;;  %v2458_v14 = vmax.f32 %v2267_v32, 0.0 }
 0x2dd   :  { %v7340_v8 = vpop.f32.mrf.mxu0  ;;  %v7371_v4 = vadd.f32 %v2845_v56, %v2518_v28  ;;  %v9235_v39 = vmax.f32 %v7358_v47, 0.0  ;;  %v7388_v55 = vadd.f32 %v2840_v7, %v2513_v37  ;;  %v2091_v33 = vmax.f32 %v7327_v20, 0.0  ;;  %9860 = vst [vmem:[#allocation142_spill] sm:$0xff] %v7548_v40 }
 0x2de   :  { %v2648_v57 = vpop.f32.mrf.mxu3  ;;  %v2463_v62 = vmax.f32 %v2270_v58, 0.0  ;;  %v2508_v58 = vadd.f32 %v2468_v31, %v2151_v26  ;;  %v2453_v43 = vmax.f32 %v2264_v2, 0.0  ;;  %v7402_v31 = vadd.f32 %v7227_v1, %v5207_v44  ;;  %v9825_v26 = vld [vmem:[#allocation56_spill] sm:$0xff] }
 0x2df   :  { %v7350_v13 = vadd.f32 %v2648_v57, %v9652_v48  ;;  %v7354_v19 = vpop.f32.mrf.mxu1  ;;  %9817 = vst [vmem:[#allocation43_spill] sm:$0xff] %v7371_v4  ;;  %v9821_v57 = vld [vmem:[#allocation42_spill] sm:$0xff]  ;;  %v9234_v28 = vmax.f32 %v7366_v12, 0.0  ;;  %v9826_v20 = vmax.f32 %v9825_v26, 0.0  ;;  %v9829_v2 = vmax.f32 %v7281_v15, 0.0  ;;  %v9831_v26 = vld [vmem:[#allocation53_spill] sm:$0xff] }
 0x2e0   :  { %9820 = vst [vmem:[#allocation50_spill] sm:$0xff] %v7388_v55  ;;  %v9822_v42 = vmax.f32 %v9821_v57, 0.0  ;;  %v2503_v32 = vadd.f32 %v2463_v62, %v2146_v27  ;;  %v2136_v62 = vadd.f32 %v2096_v35, %v7293_v51  ;;  %v2448_v37 = vmax.f32 %v2261_v17, 0.0 }
 0x2e1   :  { %v2850_v30 = vmax.f32 %v7350_v13, 0.0  ;;  %v7414_v29 = vsub.f32 %v7371_v4, %v9826_v20  ;;  %v1800_v1 = vadd.f32 %v9829_v2, %v9828_v3  ;;  %v9233_v57 = vmax.f32 %v7383_v59, 0.0 }
 0x2e2   :  { %v9832_v20 = vmax.f32 %v9831_v26, 0.0  ;;  %v2493_v35 = vadd.f32 %v2453_v43, %v2136_v62  ;;  %v9232_v17 = vmax.f32 %v7402_v31, 0.0  ;;  %v9840_v43 = vld [vmem:[#allocation72_spill] sm:$0xff]  ;;  %v7505_v13 = vsub.f32 %v7371_v4, %v2845_v56 }
 0x2e3   :  { %v7375_v21 = vadd.f32 %v2850_v30, %v2523_v5  ;;  %v7377_v49 = vpop.f32.mrf.mxu2  ;;  %v7407_v5 = vadd.f32 %v2835_v23, %v2508_v58  ;;  %9827 = vst [vmem:[#allocation123_spill] sm:$0xff] %v7414_v29  ;;  %v2498_v58 = vadd.f32 %v2458_v14, %v2141_v0  ;;  %v2131_v51 = vadd.f32 %v2091_v33, %v1800_v1  ;;  %v9835_v0 = vld [vmem:[#allocation17_spill] sm:$0xff] }
 0x2e4   :  { %9819 = vst [vmem:[#allocation47_spill] sm:$0xff] %v7377_v49  ;;  %v7432_v15 = vsub.f32 %v7388_v55, %v9832_v20  ;;  %v7450_v33 = vadd.f32 %v9233_v57, %v2493_v35  ;;  %v9841_v1 = vmax.f32 %v9840_v43, 0.0  ;;  %v7523_v34 = vsub.f32 %v7388_v55, %v2840_v7  ;;  %v9935_v49 = vld [vmem:[#allocation24_spill] sm:$0xff] }
 0x2e5   :  { %9818 = vst [vmem:[#allocation68_spill] sm:$0xff] %v7375_v21  ;;  %2996 = vmatpush.msra.mxu0 %v7375_v21  ;;  %v7394_v63 = vsub.f32 %v7375_v21, %v9822_v42  ;;  %v7396_v10 = vpop.f32.mrf.mxu0  ;;  %v7425_v42 = vadd.f32 %v9235_v39, %v2503_v32  ;;  %v7437_v14 = vadd.f32 %v9234_v28, %v2498_v58  ;;  %v9836_v32 = vmax.f32 %v9835_v0, 0.0 }
 0x2e6   :  { %9824 = vst [vmem:[#allocation84_spill] sm:$0xff] %v7407_v5  ;;  %v2488_v26 = vadd.f32 %v2448_v37, %v2131_v51  ;;  %v9844_v37 = vld [vmem:[#allocation44_spill] sm:$0xff]  ;;  %v2308_v28 = vadd.f32 %v7148_v18, %v5291_v41  ;;  %v2314_v39 = vadd.f32 %v7183_v16, %v5181_v45  ;;  %v9858_v7 = vmax.f32 %v7358_v47, 0.0 }
 0x2e7   :  { %9823 = vst [vmem:[#allocation120_spill] sm:$0xff] %v7394_v63  ;;  %2997 = vmatpush.msra.mxu0 %v7371_v4  ;;  %3033 = vmatpush.msra.mxu1 %v7394_v63  ;;  %v7420_v27 = vpop.f32.mrf.mxu1  ;;  %v7444_v3 = vsub.f32 %v7407_v5, %v9836_v32  ;;  %v7457_v62 = vsub.f32 %v7425_v42, %v9841_v1  ;;  %v9845_v51 = vmax.f32 %v9844_v37, 0.0  ;;  %v9847_v32 = vld [vmem:[#allocation65_spill] sm:$0xff] }
 0x2e8   :  { %9830 = vst [vmem:[#allocation127_spill] sm:$0xff] %v7425_v42  ;;  %v7463_v20 = vadd.f32 %v9232_v17, %v2488_v26  ;;  %v9848_v43 = vmax.f32 %v9847_v32, 0.0  ;;  %v7486_v1 = vsub.f32 %v7375_v21, %v2850_v30  ;;  %v9851_v37 = vld [vmem:[#allocation41_spill] sm:$0xff]  ;;  %v2317_v16 = vadd.f32 %v7199_v9, %v5155_v46 }
 0x2e9   :  { %2998 = vmatpush.msra.mxu0 %v7388_v55  ;;  %3034 = vmatpush.msra.mxu1 %v7414_v29  ;;  %9833 = vst [vmem:[#allocation114_spill] sm:$0xff] %v7432_v15  ;;  %v7470_v35 = vsub.f32 %v7437_v14, %v9845_v51  ;;  %v9852_v51 = vmax.f32 %v9851_v37, 0.0  ;;  %v7498_v32 = vld [vmem:[%s9076_s3 + $0x8] sm:$0xff]  ;;  %v7511_v37 = vpop.f32.mrf.mxu3  ;;  %v7558_v47 = vadd.f32 %v7072_v53, %v5241_v11  ;;  %v2469_v53 = vmax.f32 %v2314_v39, 0.0 }
 0x2ea   :  { %9834 = vst [vmem:[#allocation67_spill] sm:$0xff] %v7437_v14  ;;  %v7479_v26 = vsub.f32 %v7450_v33, %v9848_v43  ;;  %v2302_v43 = vadd.f32 %v7116_v60, %v5207_v44  ;;  %v2311_v60 = vadd.f32 %v7164_v6, %v5223_v61  ;;  %v7541_v6 = vsub.f32 %v7425_v42, %v9858_v7 }
 0x2eb   :  { %2999 = vmatpush.msra.mxu0 %v7407_v5  ;;  %3035 = vmatpush.msra.mxu1 %v7432_v15  ;;  %9837 = vst [vmem:[#allocation42_spill] sm:$0xff] %v7444_v3  ;;  %v7446_v2 = vpop.f32.mrf.mxu2  ;;  %v7491_v17 = vsub.f32 %v7463_v20, %v9852_v51  ;;  %v2305_v51 = vadd.f32 %v7132_v52, %v5241_v11 }
 0x2ec   :  { %9838 = vst [vmem:[#allocation56_spill] sm:$0xff] %v7446_v2  ;;  %v7533_v52 = vsub.f32 %v7407_v5, %v2835_v23  ;;  %v2449_v18 = vmax.f32 %v2302_v43, 0.0  ;;  %v2464_v23 = vmax.f32 %v2311_v60, 0.0  ;;  %v2320_v43 = vadd.f32 %v7209_v36, %v5199_v22  ;;  %v9864_v36 = vld [vmem:[#allocation76_spill] sm:$0xff] }
 0x2ed   :  { %9839 = vst [vmem:[#allocation116_spill] sm:$0xff] %v7450_v33  ;;  %3000 = vmatpush.msra.mxu0 %v7425_v42  ;;  %3036 = vmatpush.msra.mxu1 %v7444_v3  ;;  %v7459_v58 = vpop.f32.mrf.mxu0  ;;  %v2454_v25 = vmax.f32 %v2305_v51, 0.0  ;;  %v9862_v51 = vmax.f32 %v7366_v12, 0.0  ;;  %v7681_v21 = vadd.f32 %v7396_v10, %v5223_v61  ;;  %v9889_v3 = vld [vmem:[#allocation36_spill] sm:$0xff]  ;;  %v7697_v10 = vld [vmem:[%s9076_s3 + $0x10] sm:$0xff] }
 0x2ee   :  { %9842 = vst [vmem:[#allocation53_spill] sm:$0xff] %v7457_v62  ;;  %v7569_v9 = vadd.f32 %v2449_v18, %v6863_v54  ;;  %v9866_v54 = vld [vmem:[#allocation39_spill] sm:$0xff] }
 0x2ef   :  { %9843 = vst [vmem:[#allocation17_spill] sm:$0xff] %v7463_v20  ;;  %3001 = vmatpush.msra.mxu0 %v7437_v14  ;;  %3037 = vmatpush.msra.mxu1 %v7457_v62  ;;  %v7472_v0 = vpop.f32.mrf.mxu1  ;;  %v7566_v60 = vsub.f32 %v7437_v14, %v9862_v51  ;;  %v7580_v12 = vadd.f32 %v2454_v25, %v9864_v36  ;;  %v9865_v51 = vld [vmem:[#allocation111_spill] sm:$0xff]  ;;  %v2474_v14 = vmax.f32 %v2317_v16, 0.0  ;;  %v9870_v25 = vld [vmem:[#allocation9_spill] sm:$0xff]  ;;  %v9875_v16 = vmax.f32 %v7402_v31, 0.0 }
 0x2f0   :  { %9846 = vst [vmem:[#allocation72_spill] sm:$0xff] %v7470_v35  ;;  %v2355_v18 = vadd.f32 %v9866_v54, %v5181_v45  ;;  %v7598_v36 = vadd.f32 %v9870_v25, %v5241_v11  ;;  %v7619_v25 = vld [vmem:[%s9076_s3] sm:$0xff]  ;;  %v9880_v31 = vld [vmem:[#allocation129_spill] sm:$0xff]  ;;  %v9923_v29 = vmax.f32 %v7681_v21, 0.0 }
 0x2f1   :  { %3002 = vmatpush.msra.mxu0 %v7450_v33  ;;  %3038 = vmatpush.msra.mxu1 %v7470_v35  ;;  %9849 = vst [vmem:[#allocation44_spill] sm:$0xff] %v7479_v26  ;;  %v7602_v42 = vpop.f32.mrf.mxu3 }
 0x2f2   :  { %9850 = vst [vmem:[#allocation65_spill] sm:$0xff] %v7486_v1  ;;  %v2470_v4 = vmax.f32 %v2355_v18, 0.0  ;;  %v9885_v18 = vld [vmem:[#allocation22_spill] sm:$0xff] }
 0x2f3   :  { %3003 = vmatpush.msra.mxu0 %v7463_v20  ;;  %3039 = vmatpush.msra.mxu1 %v7479_v26  ;;  %9853 = vst [vmem:[#allocation41_spill] sm:$0xff] %v7491_v17  ;;  %v7493_v57 = vpop.f32.mrf.mxu2 }
 0x2f4   :  { %9854 = vst [vmem:[#allocation137_spill] sm:$0xff] %v7505_v13 }
 0x2f5   :  { %3004 = vmatpush.msra.mxu0 %v7486_v1  ;;  %3040 = vmatpush.msra.mxu1 %v7491_v17  ;;  %v7507_v30 = vpop.f32.mrf.mxu0  ;;  %9855 = vst [vmem:[#allocation138_spill] sm:$0xff] %v7511_v37  ;;  %v9886_v37 = vld [vmem:[#allocation32_spill] sm:$0xff] }
 0x2f6   :  { %4242 = vmatmul.msk.f32.vlgmr.msra.gmra.mxu1 %vm2983_vm8, %v7498_v32  ;;  %9856 = vst [vmem:[#allocation139_spill] sm:$0xff] %v7523_v34 }
 0x2f7   :  { %3005 = vmatpush.msra.mxu0 %v7505_v13  ;;  %v7527_v56 = vpop.f32.mrf.mxu1  ;;  %9857 = vst [vmem:[#allocation140_spill] sm:$0xff] %v7533_v52  ;;  %v2459_v13 = vmax.f32 %v2308_v28, 0.0  ;;  %v7554_v28 = vadd.f32 %v7048_v50, %v5207_v44  ;;  %v7573_v50 = vadd.f32 %v7130_v38, %v5181_v45  ;;  %v9867_v38 = vmax.f32 %v7383_v59, 0.0  ;;  %v9873_v59 = vld [vmem:[#allocation34_spill] sm:$0xff] }
 0x2f8   :  { %9859 = vst [vmem:[#allocation141_spill] sm:$0xff] %v7541_v6  ;;  %v7606_v5 = vadd.f32 %v9873_v59, %v5291_v41  ;;  %v9879_v59 = vld [vmem:[#allocation101_spill] sm:$0xff] }
 0x2f9   :  { %3006 = vmatpush.msra.mxu0 %v7523_v34  ;;  %9861 = vst [vmem:[#allocation143_spill] sm:$0xff] %v7554_v28  ;;  %v7591_v39 = vsub.f32 %v7450_v33, %v9867_v38  ;;  %v9874_v38 = vld [vmem:[#allocation113_spill] sm:$0xff]  ;;  %v7626_v33 = vadd.f32 %v9879_v59, %v9652_v48 }
 0x2fa   :  { %9863 = vst [vmem:[#allocation144_spill] sm:$0xff] %v7566_v60 }
 0x2fb   :  { %3007 = vmatpush.msra.mxu0 %v7533_v52  ;;  %v7543_v1 = vpop.f32.mrf.mxu2  ;;  %v2323_v52 = vadd.f32 %v7219_v24, %v9652_v48  ;;  %9868 = vst [vmem:[#allocation76_spill] sm:$0xff] %v7591_v39  ;;  %v9869_v24 = vld [vmem:[#allocation130_spill] sm:$0xff] }
 0x2fc   :  { %v7594_v34 = vadd.f32 %v2464_v23, %v9869_v24  ;;  %9872 = vst [vmem:[#allocation111_spill] sm:$0xff] %v7602_v42  ;;  %v2361_v23 = vadd.f32 %v9874_v38, %v5199_v22  ;;  %v7614_v24 = vsub.f32 %v7463_v20, %v9875_v16  ;;  %v7633_v16 = vadd.f32 %v9880_v31, %v5207_v44  ;;  %v9881_v20 = vld [vmem:[#allocation21_spill] sm:$0xff] }
 0x2fd   :  { %3008 = vmatpush.msra.mxu0 %v7541_v6  ;;  %v2686_v7 = vpop.f32.mrf.mxu0  ;;  %v7583_v6 = vadd.f32 %v2459_v13, %v9865_v51  ;;  %v9871_v13 = vld [vmem:[#allocation26_spill] sm:$0xff]  ;;  %9877 = vst [vmem:[#allocation130_spill] sm:$0xff] %v7619_v25  ;;  %v2484_v38 = vmax.f32 %v2323_v52, 0.0  ;;  %v7637_v55 = vadd.f32 %v9881_v20, %v5223_v61  ;;  %v7647_v52 = vld [vmem:[%s9076_s3 + $0x28] sm:$0xff]  ;;  %v7653_v20 = vadd.f32 %v7507_v30, %v5155_v46 }
 0x2fe   :  { %4243 = vmatmul.msk.f32.gmra.mxu1 %vm2983_vm8, %v7548_v40  ;;  %v2358_v51 = vadd.f32 %v9871_v13, %v5155_v46  ;;  %9876 = vst [vmem:[#allocation39_spill] sm:$0xff] %v7614_v24  ;;  %v2480_v26 = vmax.f32 %v2361_v23, 0.0  ;;  %v9887_v23 = vld [vmem:[#allocation48_spill] sm:$0xff] }
 0x2ff   :  { %3009 = vmatpush.msra.mxu0 %v7566_v60  ;;  %v2727_v54 = vpop.f32.mrf.mxu1  ;;  %v2479_v60 = vmax.f32 %v2320_v43, 0.0  ;;  %v9878_v43 = vld [vmem:[#allocation79_spill] sm:$0xff]  ;;  %9883 = vst [vmem:[#allocation9_spill] sm:$0xff] %v7647_v52 }
 0x300   :  { %v7622_v13 = vadd.f32 %v2469_v53, %v9878_v43  ;;  %v9882_v53 = vld [vmem:[#allocation133_spill] sm:$0xff]  ;;  %v2475_v17 = vmax.f32 %v2358_v51, 0.0  ;;  %v7659_v35 = vadd.f32 %v2727_v54, %v5199_v22  ;;  %v7664_v51 = vadd.f32 %v7459_v58, %v5181_v45  ;;  %9890 = vst [vmem:[#allocation26_spill] sm:$0xff] %v7697_v10 }
 0x301   :  { %3010 = vmatpush.msra.mxu0 %v7591_v39  ;;  %v7629_v39 = vadd.f32 %v2686_v7, %v5199_v22  ;;  %v2364_v43 = vadd.f32 %v9882_v53, %v9652_v48  ;;  %v9884_v7 = vld [vmem:[#allocation82_spill] sm:$0xff]  ;;  %v2519_v53 = vadd.f32 %v2479_v60, %v9885_v18  ;;  %v2465_v60 = vmax.f32 %v7637_v55, 0.0 }
 0x302   :  { %v2514_v31 = vadd.f32 %v2474_v14, %v9884_v7  ;;  %v2524_v14 = vadd.f32 %v2484_v38, %v9886_v37  ;;  %v2510_v54 = vadd.f32 %v2470_v4, %v9887_v23  ;;  %v7676_v37 = vadd.f32 %v7527_v56, %v5155_v46  ;;  %v9888_v38 = vld [vmem:[#allocation35_spill] sm:$0xff] }
 0x303   :  { %3011 = vmatpush.msra.mxu0 %v7614_v24  ;;  %v7642_v59 = vpop.f32.mrf.mxu2  ;;  %v2485_v18 = vmax.f32 %v2364_v43, 0.0  ;;  %v2515_v58 = vadd.f32 %v2475_v17, %v9888_v38  ;;  %v2520_v55 = vadd.f32 %v2480_v26, %v9889_v3  ;;  %v7688_v4 = vadd.f32 %v7472_v0, %v5181_v45  ;;  %v7704_v26 = vpop.f32.mrf.mxu3  ;;  %v9896_v38 = vld [vmem:[#allocation33_spill] sm:$0xff] }
 0x304   :  { %3012 = vmatmul.f32.vlgmr.msra.gmra.mxu0 %v7619_v25  ;;  %v7701_v17 = vadd.f32 %v7340_v8, %v5291_v41  ;;  %9892 = vst [vmem:[#allocation113_spill] sm:$0xff] %v7704_v26  ;;  %v9893_v0 = vmax.f32 %v7629_v39, 0.0  ;;  %v9897_v26 = vld [vmem:[#allocation40_spill] sm:$0xff]  ;;  %v7796_v25 = vadd.f32 %v9923_v29, %v7594_v34 }
 0x305   :  { %v2689_v62 = vpop.f32.mrf.mxu0  ;;  %v2525_v56 = vadd.f32 %v2485_v18, %v9896_v38  ;;  %v9932_v29 = vld [vmem:[#allocation88_spill] sm:$0xff] }
 0x306   :  { %v7668_v7 = vadd.f32 %v2689_v62, %v9652_v48  ;;  %4244 = vmatmul.msk.f32.gmra.mxu1 %vm2983_vm8, %v7647_v52  ;;  %9891 = vst [vmem:[#allocation34_spill] sm:$0xff] %v7701_v17  ;;  %v7708_v23 = vadd.f32 %v9893_v0, %v2519_v53  ;;  %v7717_v62 = vadd.f32 %v7420_v27, %v5223_v61  ;;  %v9901_v27 = vld [vmem:[#allocation91_spill] sm:$0xff]  ;;  %v9933_v34 = vmax.f32 %v9932_v29, 0.0 }
 0x307   :  { %v2730_v30 = vpop.f32.mrf.mxu1  ;;  %v7725_v53 = vadd.f32 %v9897_v26, %v5241_v11  ;;  %v9902_v18 = vmax.f32 %v9901_v27, 0.0  ;;  %v7742_v26 = vld [vmem:[%s9076_s3 + $0x38] sm:$0xff]  ;;  %v7746_v0 = vadd.f32 %v7354_v19, %v5291_v41  ;;  %v9910_v19 = vmax.f32 %v7664_v51, 0.0 }
 0x308   :  { %v9257_v24 = vmax.f32 %v7668_v7, 0.0  ;;  %v7692_v43 = vadd.f32 %v2730_v30, %v9652_v48  ;;  %9894 = vst [vmem:[#allocation79_spill] sm:$0xff] %v7708_v23 }
 0x309   :  { %9898 = vst [vmem:[#allocation129_spill] sm:$0xff] %v7725_v53  ;;  %v7765_v63 = vadd.f32 %v9910_v19, %v7622_v13  ;;  %v9919_v13 = vld [vmem:[#allocation93_spill] sm:$0xff] }
 0x30a   :  { %v7712_v30 = vadd.f32 %v9257_v24, %v2524_v14  ;;  %v9261_v3 = vmax.f32 %v7692_v43, 0.0  ;;  %v9899_v14 = vmax.f32 %v7653_v20, 0.0  ;;  %9904 = vst [vmem:[#allocation82_spill] sm:$0xff] %v7742_v26  ;;  %v9920_v19 = vmax.f32 %v9919_v13, 0.0 }
 0x30b   :  { %v7721_v42 = vpop.f32.mrf.mxu2  ;;  %9911 = vst [vmem:[#allocation35_spill] sm:$0xff] %v7765_v63 }
 0x30c   :  { %9895 = vst [vmem:[#allocation101_spill] sm:$0xff] %v7712_v30  ;;  %v7730_v24 = vadd.f32 %v9899_v14, %v2514_v31  ;;  %3054 = vmatpush.msrb.mxu2 %v7712_v30  ;;  %v7736_v38 = vsub.f32 %v7712_v30, %v9902_v18  ;;  %3015 = vmatmul.f32.gmra.mxu0 %v7697_v10  ;;  %v9905_v14 = vmax.f32 %v7659_v35, 0.0  ;;  %v9908_v18 = vld [vmem:[#allocation136_spill] sm:$0xff]  ;;  %v9917_v31 = vmax.f32 %v7676_v37, 0.0 }
 0x30d   :  { %v7755_v27 = vadd.f32 %v9261_v3, %v2525_v56  ;;  %v7759_v15 = vadd.f32 %v9908_v18, %v5207_v44  ;;  %v9915_v3 = vld [vmem:[#allocation49_spill] sm:$0xff]  ;;  %9924 = vst [vmem:[#allocation136_spill] sm:$0xff] %v7796_v25 }
 0x30e   :  { %9900 = vst [vmem:[#allocation21_spill] sm:$0xff] %v7730_v24  ;;  %v7751_v8 = vadd.f32 %v9905_v14, %v2520_v55  ;;  %3055 = vmatpush.msrb.mxu2 %v7708_v23  ;;  %3091 = vmatpush.msrb.mxu3 %v7736_v38  ;;  %v9912_v55 = vld [vmem:[#allocation58_spill] sm:$0xff]  ;;  %v7776_v18 = vadd.f32 %v9915_v3, %v5241_v11 }
 0x30f   :  { %9903 = vst [vmem:[#allocation133_spill] sm:$0xff] %v7736_v38  ;;  %v9913_v14 = vmax.f32 %v9912_v55, 0.0  ;;  %v7781_v10 = vadd.f32 %v9917_v31, %v2515_v58  ;;  %3112 = vmatpush.msrb.mxu0 %v7755_v27  ;;  %v7787_v52 = vsub.f32 %v7755_v27, %v9920_v19  ;;  %4245 = vmatmul.msk.f32.gmra.mxu1 %vm2983_vm8, %v7742_v26  ;;  %v9922_v55 = vld [vmem:[#allocation31_spill] sm:$0xff]  ;;  %v9928_v19 = vld [vmem:[#allocation10_spill] sm:$0xff] }
 0x310   :  { %9906 = vst [vmem:[#allocation22_spill] sm:$0xff] %v7751_v8  ;;  %3056 = vmatpush.msrb.mxu2 %v7730_v24  ;;  %v9925_v58 = vld [vmem:[#allocation55_spill] sm:$0xff]  ;;  %v7807_v26 = vadd.f32 %v9928_v19, %v5207_v44  ;;  %v9936_v19 = vmax.f32 %v7606_v5, 0.0 }
 0x311   :  { %9907 = vst [vmem:[#allocation32_spill] sm:$0xff] %v7755_v27  ;;  %v7772_v56 = vsub.f32 %v7708_v23, %v9913_v14  ;;  %v2505_v14 = vadd.f32 %v2465_v60, %v9922_v55  ;;  %v9926_v31 = vmax.f32 %v9925_v58, 0.0  ;;  %v9930_v55 = vmax.f32 %v7688_v4, 0.0  ;;  %3113 = vmatpush.msrb.mxu0 %v7751_v8  ;;  %3149 = vmatpush.msrb.mxu1 %v7787_v52 }
 0x312   :  { %9909 = vst [vmem:[#allocation48_spill] sm:$0xff] %v7759_v15  ;;  %v7819_v58 = vsub.f32 %v7751_v8, %v9933_v34  ;;  %v2500_v40 = vadd.f32 %v9936_v19, %v9935_v49  ;;  %v9937_v60 = vmax.f32 %v7701_v17, 0.0  ;;  %3057 = vmatpush.msrb.mxu2 %v7765_v63  ;;  %v9942_v49 = vmax.f32 %v7717_v62, 0.0 }
 0x313   :  { %9914 = vst [vmem:[#allocation36_spill] sm:$0xff] %v7772_v56  ;;  %3092 = vmatpush.msrb.mxu3 %v7772_v56  ;;  %v7803_v13 = vsub.f32 %v7730_v24, %v9926_v31  ;;  %v7812_v3 = vadd.f32 %v9930_v55, %v2510_v54  ;;  %v2450_v31 = vmax.f32 %v7633_v16, 0.0  ;;  %v9939_v55 = vld [vmem:[#allocation52_spill] sm:$0xff]  ;;  %3114 = vmatpush.msrb.mxu0 %v7781_v10 }
 0x314   :  { %9916 = vst [vmem:[#allocation33_spill] sm:$0xff] %v7776_v18  ;;  %v7828_v54 = vadd.f32 %v9937_v60, %v7583_v6  ;;  %v9940_v29 = vmax.f32 %v9939_v55, 0.0  ;;  %v7841_v5 = vadd.f32 %v9942_v49, %v2505_v14  ;;  %3150 = vmatpush.msrb.mxu1 %v7819_v58  ;;  %v9944_v6 = vld [vmem:[#allocation86_spill] sm:$0xff]  ;;  %v2768_v55 = vpop.f32.mrf.mxu2  ;;  %v7859_v14 = vpop.f32.mrf.mxu3  ;;  %3058 = vmatpush.msrb.mxu2 %v7796_v25 }
 0x315   :  { %9918 = vst [vmem:[#allocation40_spill] sm:$0xff] %v7781_v10  ;;  %3093 = vmatpush.msrb.mxu3 %v7803_v13  ;;  %v9945_v60 = vmax.f32 %v9944_v6, 0.0  ;;  %v9951_v49 = vld [vmem:[#allocation46_spill] sm:$0xff]  ;;  %3115 = vmatpush.msrb.mxu0 %v7812_v3 }
 0x316   :  { %9921 = vst [vmem:[#allocation91_spill] sm:$0xff] %v7787_v52  ;;  %v7835_v34 = vsub.f32 %v7765_v63, %v9940_v29  ;;  %v9947_v29 = vld [vmem:[#allocation121_spill] sm:$0xff]  ;;  %v9948_v52 = vmax.f32 %v7725_v53, 0.0  ;;  %v9952_v6 = vmax.f32 %v9951_v49, 0.0  ;;  %3059 = vmatpush.msrb.mxu2 %v7828_v54 }
 0x317   :  { %9927 = vst [vmem:[#allocation58_spill] sm:$0xff] %v7803_v13  ;;  %v7848_v19 = vsub.f32 %v7781_v10, %v9945_v60  ;;  %v7852_v2 = vadd.f32 %v9947_v29, %v5199_v22  ;;  %v9955_v29 = vmax.f32 %v7598_v36, 0.0  ;;  %3116 = vmatpush.msrb.mxu0 %v7841_v5 }
 0x318   :  { %9929 = vst [vmem:[#allocation49_spill] sm:$0xff] %v7807_v26  ;;  %v7857_v16 = vadd.f32 %v9948_v52, %v7580_v12  ;;  %3094 = vmatpush.msrb.mxu3 %v7835_v34  ;;  %v7866_v60 = vsub.f32 %v7796_v25, %v9952_v6  ;;  %v9956_v12 = vmax.f32 %v7746_v0, 0.0  ;;  %v2129_v6 = vmax.f32 %v7626_v33, 0.0 }
 0x319   :  { %9931 = vst [vmem:[#allocation93_spill] sm:$0xff] %v7812_v3  ;;  %3151 = vmatpush.msrb.mxu1 %v7848_v19  ;;  %v9968_v33 = vmax.f32 %v7776_v18, 0.0  ;;  %v9989_v18 = vld [vmem:[#allocation110_spill] sm:$0xff] }
 0x31a   :  { %9934 = vst [vmem:[#allocation31_spill] sm:$0xff] %v7819_v58  ;;  %v9954_v58 = vld [vmem:[#allocation8_spill] sm:$0xff]  ;;  %v7874_v52 = vadd.f32 %v9956_v12, %v2500_v40  ;;  %3095 = vmatpush.msrb.mxu3 %v7866_v60  ;;  %v9963_v40 = vld [vmem:[#allocation5_spill] sm:$0xff]  ;;  %3060 = vmatpush.msrb.mxu2 %v7857_v16 }
 0x31b   :  { %9938 = vst [vmem:[#allocation55_spill] sm:$0xff] %v7828_v54  ;;  %v2495_v17 = vadd.f32 %v9955_v29, %v9954_v58  ;;  %v9962_v58 = vld [vmem:[#allocation134_spill] sm:$0xff]  ;;  %v9964_v12 = vmax.f32 %v9963_v40, 0.0 }
 0x31c   :  { %9941 = vst [vmem:[#allocation10_spill] sm:$0xff] %v7835_v34  ;;  %v9961_v34 = vld [vmem:[#allocation73_spill] sm:$0xff]  ;;  %v2405_v29 = vadd.f32 %v9962_v58, %v9652_v48  ;;  %3117 = vmatpush.msrb.mxu0 %v7874_v52 }
 0x31d   :  { %9943 = vst [vmem:[#allocation88_spill] sm:$0xff] %v7841_v5  ;;  %v2490_v36 = vadd.f32 %v2450_v31, %v9961_v34  ;;  %v7892_v44 = vsub.f32 %v7828_v54, %v9964_v12  ;;  %v7901_v31 = vadd.f32 %v9968_v33, %v2495_v17  ;;  %v9970_v34 = vld [vmem:[#allocation80_spill] sm:$0xff]  ;;  %v9978_v12 = vld [vmem:[#allocation118_spill] sm:$0xff] }
 0x31e   :  { %9946 = vst [vmem:[#allocation24_spill] sm:$0xff] %v7848_v19  ;;  %v9971_v58 = vmax.f32 %v9970_v34, 0.0  ;;  %v9973_v19 = vld [vmem:[#allocation38_spill] sm:$0xff]  ;;  %v9975_v17 = vld [vmem:[#allocation100_spill] sm:$0xff] }
 0x31f   :  { %9949 = vst [vmem:[#allocation52_spill] sm:$0xff] %v7857_v16  ;;  %3096 = vmatpush.msrb.mxu3 %v7892_v44  ;;  %v9976_v33 = vmax.f32 %v9975_v17, 0.0  ;;  %3118 = vmatpush.msrb.mxu0 %v7901_v31 }
 0x320   :  { %9950 = vst [vmem:[#allocation86_spill] sm:$0xff] %v7859_v14  ;;  %v9958_v14 = vld [vmem:[#allocation83_spill] sm:$0xff]  ;;  %v7908_v40 = vsub.f32 %v7841_v5, %v9971_v58  ;;  %v2114_v58 = vmax.f32 %v7573_v50, 0.0 }
 0x321   :  { %9953 = vst [vmem:[#allocation121_spill] sm:$0xff] %v7866_v60  ;;  %v9959_v53 = vmax.f32 %v9958_v14, 0.0  ;;  %v7924_v34 = vsub.f32 %v7857_v16, %v9976_v33  ;;  %v7943_v50 = vld [vmem:[%s9076_s3 + $0x20] sm:$0xff]  ;;  %v9985_v33 = vld [vmem:[#allocation122_spill] sm:$0xff]  ;;  %v2399_v16 = vadd.f32 %v9989_v18, %v5155_v46 }
 0x322   :  { %9957 = vst [vmem:[#allocation46_spill] sm:$0xff] %v7874_v52  ;;  %3018 = vmatmul.f32.gmra.mxu0 %v7943_v50 }
 0x323   :  { %v7881_v49 = vsub.f32 %v7812_v3, %v9959_v53  ;;  %9965 = vst [vmem:[#allocation83_spill] sm:$0xff] %v7892_v44  ;;  %v9966_v53 = vmax.f32 %v7759_v15, 0.0  ;;  %v7913_v15 = vadd.f32 %v9973_v19, %v5291_v41  ;;  %v9979_v19 = vmax.f32 %v7807_v26, 0.0  ;;  %v9986_v26 = vld [vmem:[#allocation131_spill] sm:$0xff]  ;;  %3097 = vmatpush.msrb.mxu3 %v7924_v34 }
 0x324   :  { %9969 = vst [vmem:[#allocation134_spill] sm:$0xff] %v7901_v31 }
 0x325   :  { %9960 = vst [vmem:[#allocation8_spill] sm:$0xff] %v7881_v49  ;;  %v7897_v14 = vadd.f32 %v9966_v53, %v7569_v9  ;;  %3152 = vmatpush.msrb.mxu1 %v7881_v49  ;;  %v9974_v9 = vld [vmem:[#allocation87_spill] sm:$0xff]  ;;  %v2042_v49 = vadd.f32 %v9978_v12, %v5155_v46  ;;  %v7931_v28 = vadd.f32 %v9979_v19, %v2490_v36  ;;  %v2486_v19 = vmax.f32 %v2405_v29, 0.0 }
 0x326   :  { %9972 = vst [vmem:[#allocation5_spill] sm:$0xff] %v7908_v40  ;;  %v7917_v53 = vadd.f32 %v9974_v9, %v5223_v61  ;;  %v9981_v9 = vld [vmem:[#allocation77_spill] sm:$0xff]  ;;  %v2169_v12 = vadd.f32 %v2129_v6, %v9985_v33  ;;  %v2402_v36 = vadd.f32 %v9986_v26, %v5199_v22  ;;  %v9990_v26 = vld [vmem:[#allocation74_spill] sm:$0xff]  ;;  %v2771_v33 = vpop.f32.mrf.mxu2 }
 0x327   :  { %9967 = vst [vmem:[#allocation73_spill] sm:$0xff] %v7897_v14  ;;  %3153 = vmatpush.msrb.mxu1 %v7908_v40  ;;  %v9982_v44 = vmax.f32 %v9981_v9, 0.0  ;;  %3061 = vmatpush.msrb.mxu2 %v7897_v14  ;;  %v9987_v9 = vmax.f32 %v7668_v7, 0.0  ;;  %v2124_v40 = vmax.f32 %v7852_v2, 0.0  ;;  %v9991_v6 = vmax.f32 %v9990_v26, 0.0 }
 0x328   :  { %9977 = vst [vmem:[#allocation80_spill] sm:$0xff] %v7924_v34  ;;  %v9993_v34 = vld [vmem:[#allocation96_spill] sm:$0xff]  ;;  %v2109_v2 = vmax.f32 %v7917_v53, 0.0  ;;  %v7975_v18 = vadd.f32 %v2771_v33, %v9652_v48  ;;  %v9996_v26 = vmax.f32 %v7629_v39, 0.0  ;;  %3119 = vmatpush.msrb.mxu0 %v7931_v28  ;;  %v10000_v33 = vld [vmem:[#allocation70_spill] sm:$0xff] }
 0x329   :  { %9980 = vst [vmem:[#allocation38_spill] sm:$0xff] %v7931_v28  ;;  %v7938_v17 = vsub.f32 %v7874_v52, %v9982_v44  ;;  %v7953_v44 = vsub.f32 %v7712_v30, %v9987_v9  ;;  %v7963_v29 = vsub.f32 %v7901_v31, %v9991_v6  ;;  %v9994_v7 = vmax.f32 %v9993_v34, 0.0 }
 0x32a   :  { %9984 = vst [vmem:[#allocation100_spill] sm:$0xff] %v7943_v50  ;;  %v7972_v30 = vadd.f32 %v2768_v55, %v5199_v22  ;;  %v7982_v6 = vsub.f32 %v7708_v23, %v9996_v26  ;;  %v2119_v34 = vmax.f32 %v2042_v49, 0.0  ;;  %v9998_v55 = vmax.f32 %v7692_v43, 0.0  ;;  %v7998_v49 = vpop.f32.mrf.mxu3  ;;  %v10002_v43 = vld [vmem:[#allocation64_spill] sm:$0xff] }
 0x32b   :  { %9983 = vst [vmem:[#allocation87_spill] sm:$0xff] %v7938_v17  ;;  %3154 = vmatpush.msrb.mxu1 %v7938_v17  ;;  %v7968_v9 = vsub.f32 %v7897_v14, %v9994_v7  ;;  %3062 = vmatpush.msrb.mxu2 %v7953_v44  ;;  %v9997_v7 = vld [vmem:[#allocation105_spill] sm:$0xff]  ;;  %v2481_v26 = vmax.f32 %v2402_v36, 0.0  ;;  %v2526_v50 = vadd.f32 %v2486_v19, %v2169_v12  ;;  %v10004_v12 = vmax.f32 %v7659_v35, 0.0 }
 0x32c   :  { %9988 = vst [vmem:[#allocation118_spill] sm:$0xff] %v7953_v44  ;;  %v2396_v17 = vadd.f32 %v9997_v7, %v5181_v45  ;;  %v7991_v53 = vsub.f32 %v7755_v27, %v9998_v55  ;;  %v10001_v44 = vmax.f32 %v10000_v33, 0.0  ;;  %v8002_v7 = vadd.f32 %v7721_v42, %v5155_v46  ;;  %v10003_v33 = vld [vmem:[#allocation128_spill] sm:$0xff] }
 0x32d   :  { %9992 = vst [vmem:[#allocation77_spill] sm:$0xff] %v7963_v29  ;;  %3155 = vmatpush.msrb.mxu1 %v7963_v29  ;;  %v9310_v29 = vmax.f32 %v7975_v18, 0.0  ;;  %3098 = vmatpush.msrb.mxu3 %v7968_v9  ;;  %v2154_v55 = vadd.f32 %v2114_v58, %v10002_v43  ;;  %v2164_v27 = vadd.f32 %v2124_v40, %v10003_v33  ;;  %v10007_v35 = vmax.f32 %v7653_v20, 0.0  ;;  %v10009_v40 = vld [vmem:[#allocation119_spill] sm:$0xff]  ;;  %v8047_v20 = vld [vmem:[%s9076_s3 + $0x30] sm:$0xff] }
 0x32e   :  { %9995 = vst [vmem:[#allocation122_spill] sm:$0xff] %v7968_v9  ;;  %v7996_v39 = vsub.f32 %v7931_v28, %v10001_v44  ;;  %3063 = vmatpush.msrb.mxu2 %v7982_v6  ;;  %v2476_v44 = vmax.f32 %v2399_v16, 0.0  ;;  %3120 = vmatpush.msrb.mxu0 %v7991_v53  ;;  %v8014_v42 = vsub.f32 %v7751_v8, %v10004_v12  ;;  %v10010_v43 = vld [vmem:[#allocation27_spill] sm:$0xff]  ;;  %v2471_v12 = vmax.f32 %v2396_v17, 0.0 }
 0x32f   :  { %9999 = vst [vmem:[#allocation131_spill] sm:$0xff] %v7991_v53  ;;  %v8018_v36 = vadd.f32 %v7642_v59, %v5181_v45  ;;  %v8023_v58 = vadd.f32 %v9310_v29, %v2526_v50  ;;  %4246 = vmatmul.msk.f32.vlgmr.msrb.gmra.mxu3 %vm2983_vm8, %v7498_v32  ;;  %v8032_v16 = vsub.f32 %v7730_v24, %v10007_v35  ;;  %v10011_v50 = vmax.f32 %v7676_v37, 0.0  ;;  %v10049_v53 = vld [vmem:[#allocation52_spill] sm:$0xff] }
 0x330   :  { %3156 = vmatpush.msrb.mxu1 %v7996_v39  ;;  %10005 = vst [vmem:[#allocation110_spill] sm:$0xff] %v8014_v42  ;;  %v2159_v59 = vadd.f32 %v2119_v34, %v10009_v40  ;;  %v2393_v33 = vadd.f32 %v10010_v43, %v5223_v61  ;;  %3121 = vmatpush.msrb.mxu0 %v8014_v42  ;;  %v10013_v17 = vmax.f32 %v7664_v51, 0.0  ;;  %v10015_v43 = vld [vmem:[#allocation16_spill] sm:$0xff]  ;;  %v2104_v19 = vmax.f32 %v7913_v15, 0.0 }
 0x331   :  { %10006 = vst [vmem:[#allocation74_spill] sm:$0xff] %v8023_v58  ;;  %4250 = vmatmul.msk.f32.vlgmr.msrb.gmra.mxu1 %vm2983_vm8, %v7498_v32  ;;  %v8042_v29 = vsub.f32 %v7781_v10, %v10011_v50  ;;  %v2521_v35 = vadd.f32 %v2481_v26, %v2164_v27  ;;  %3064 = vmatpush.msrb.mxu2 %v8032_v16  ;;  %v10016_v37 = vmax.f32 %v10015_v43, 0.0  ;;  %v10019_v51 = vmax.f32 %v7688_v4, 0.0  ;;  %v10025_v4 = vld [vmem:[#allocation124_spill] sm:$0xff] }
 0x332   :  { %10008 = vst [vmem:[#allocation96_spill] sm:$0xff] %v8032_v16  ;;  %3293 = vmatpush.msra.mxu1 %v7736_v38  ;;  %v8054_v40 = vsub.f32 %v7765_v63, %v10013_v17  ;;  %v10018_v38 = vld [vmem:[#allocation102_spill] sm:$0xff]  ;;  %v8066_v27 = vadd.f32 %v7543_v1, %v5223_v61  ;;  %v2516_v17 = vadd.f32 %v2476_v44, %v2159_v59  ;;  %v10021_v15 = vmax.f32 %v7972_v30, 0.0 }
 0x333   :  { %10012 = vst [vmem:[#allocation105_spill] sm:$0xff] %v8042_v29  ;;  %v8059_v50 = vsub.f32 %v8023_v58, %v10016_v37  ;;  %v2390_v42 = vadd.f32 %v10018_v38, %v5291_v41  ;;  %3122 = vmatpush.msrb.mxu0 %v8042_v29  ;;  %v8073_v26 = vsub.f32 %v7812_v3, %v10019_v51  ;;  %v10023_v1 = vmax.f32 %v7681_v21, 0.0  ;;  %v10026_v51 = vld [vmem:[#allocation14_spill] sm:$0xff] }
 0x334   :  { %10014 = vst [vmem:[#allocation70_spill] sm:$0xff] %v8054_v40  ;;  %3294 = vmatpush.msra.mxu1 %v7772_v56  ;;  %v8078_v37 = vadd.f32 %v10021_v15, %v2521_v35  ;;  %3065 = vmatpush.msrb.mxu2 %v8054_v40  ;;  %v2149_v34 = vadd.f32 %v2109_v2, %v10025_v4  ;;  %v2466_v59 = vmax.f32 %v2393_v33, 0.0  ;;  %v10027_v35 = vmax.f32 %v7717_v62, 0.0  ;;  %v10031_v33 = vld [vmem:[#allocation69_spill] sm:$0xff] }
 0x335   :  { %10017 = vst [vmem:[#allocation64_spill] sm:$0xff] %v8059_v50  ;;  %3021 = vmatmul.f32.gmra.mxu0 %v8047_v20  ;;  %v8085_v38 = vsub.f32 %v7796_v25, %v10023_v1  ;;  %v2387_v44 = vadd.f32 %v10026_v51, %v5241_v11  ;;  %v2099_v21 = vmax.f32 %v7558_v47, 0.0  ;;  %v2511_v43 = vadd.f32 %v2471_v12, %v2154_v55  ;;  %v10032_v62 = vld [vmem:[#allocation61_spill] sm:$0xff]  ;;  %v10034_v47 = vld [vmem:[#allocation34_spill] sm:$0xff] }
 0x336   :  { %10020 = vst [vmem:[#allocation128_spill] sm:$0xff] %v8073_v26  ;;  %3295 = vmatpush.msra.mxu1 %v7803_v13  ;;  %3123 = vmatpush.msrb.mxu0 %v8073_v26  ;;  %v8095_v15 = vsub.f32 %v7841_v5, %v10027_v35  ;;  %v8100_v1 = vadd.f32 %v7493_v57, %v5291_v41  ;;  %v10029_v2 = vmax.f32 %v8002_v7, 0.0  ;;  %v10033_v13 = vld [vmem:[#allocation10_spill] sm:$0xff]  ;;  %v10035_v57 = vmax.f32 %v10034_v47, 0.0  ;;  %v10039_v26 = vld [vmem:[#allocation56_spill] sm:$0xff]  ;;  %v10051_v5 = vld [vmem:[#allocation47_spill] sm:$0xff] }
 0x337   :  { %10022 = vst [vmem:[#allocation119_spill] sm:$0xff] %v8078_v37  ;;  %3066 = vmatpush.msrb.mxu2 %v8085_v38  ;;  %3207 = vmatpush.msra.mxu3 %v8059_v50  ;;  %v2384_v51 = vadd.f32 %v10032_v62, %v10031_v33  ;;  %v10037_v12 = vmax.f32 %v7746_v0, 0.0  ;;  %v8125_v62 = vadd.f32 %v10039_v26, %v5241_v11  ;;  %v10040_v35 = vmax.f32 %v8018_v36, 0.0  ;;  %v10042_v47 = vld [vmem:[#allocation142_spill] sm:$0xff]  ;;  %v10043_v0 = vld [vmem:[#allocation20_spill] sm:$0xff] }
 0x338   :  { %10024 = vst [vmem:[#allocation27_spill] sm:$0xff] %v8085_v38  ;;  %v8104_v4 = vadd.f32 %v10029_v2, %v2516_v17  ;;  %3296 = vmatpush.msra.mxu1 %v10033_v13  ;;  %3124 = vmatpush.msrb.mxu0 %v8095_v15  ;;  %v8116_v55 = vsub.f32 %v7828_v54, %v10035_v57  ;;  %v2461_v2 = vmax.f32 %v2390_v42, 0.0  ;;  %v10044_v57 = vmax.f32 %v10043_v0, 0.0 }
 0x339   :  { %10028 = vst [vmem:[#allocation16_spill] sm:$0xff] %v8095_v15  ;;  %v8121_v17 = vsub.f32 %v7874_v52, %v10037_v12  ;;  %v8129_v13 = vadd.f32 %v10040_v35, %v2511_v43  ;;  %v8131_v15 = vpop.f32.mrf.mxu3  ;;  %4247 = vmatmul.msk.f32.gmra.mxu3 %vm2983_vm8, %v10042_v47  ;;  %4251 = vmatmul.msk.f32.gmra.mxu1 %vm2983_vm8, %v10042_v47  ;;  %v10046_v12 = vld [vmem:[#allocation81_spill] sm:$0xff]  ;;  %v2456_v56 = vmax.f32 %v2387_v44, 0.0 }
 0x33a   :  { %10030 = vst [vmem:[#allocation102_spill] sm:$0xff] %v8104_v4  ;;  %v8140_v42 = vsub.f32 %v8078_v37, %v10044_v57  ;;  %v2144_v26 = vadd.f32 %v2104_v19, %v10046_v12  ;;  %v2506_v29 = vadd.f32 %v2466_v59, %v2149_v34  ;;  %3297 = vmatpush.msra.mxu1 %v7866_v60  ;;  %v10047_v43 = vld [vmem:[#allocation129_spill] sm:$0xff]  ;;  %v10056_v59 = vld [vmem:[#allocation99_spill] sm:$0xff]  ;;  %v10060_v60 = vmax.f32 %v8066_v27, 0.0 }
 0x33b   :  { %10036 = vst [vmem:[#allocation124_spill] sm:$0xff] %v8116_v55  ;;  %3067 = vmatpush.msrb.mxu2 %v8116_v55  ;;  %v10048_v35 = vmax.f32 %v10047_v43, 0.0  ;;  %v8152_v3 = vadd.f32 %v10051_v5, %v10031_v33  ;;  %3125 = vmatpush.msrb.mxu0 %v8121_v17  ;;  %v10053_v19 = vld [vmem:[#allocation33_spill] sm:$0xff]  ;;  %v10057_v57 = vmax.f32 %v10056_v59, 0.0  ;;  %v10059_v43 = vld [vmem:[#allocation63_spill] sm:$0xff]  ;;  %v2451_v5 = vmax.f32 %v2384_v51, 0.0 }
 0x33c   :  { %10038 = vst [vmem:[#allocation14_spill] sm:$0xff] %v8121_v17  ;;  %3208 = vmatpush.msra.mxu3 %v8140_v42  ;;  %v10054_v34 = vmax.f32 %v10053_v19, 0.0  ;;  %v8170_v0 = vadd.f32 %v10060_v60, %v2506_v29  ;;  %v10062_v17 = vld [vmem:[#allocation83_spill] sm:$0xff]  ;;  %v10063_v19 = vld [vmem:[#allocation48_spill] sm:$0xff]  ;;  %v2501_v59 = vadd.f32 %v2461_v2, %v2144_v26  ;;  %v10069_v29 = vld [vmem:[#allocation30_spill] sm:$0xff] }
 0x33d   :  { %10041 = vst [vmem:[#allocation69_spill] sm:$0xff] %v8129_v13  ;;  %v8148_v52 = vsub.f32 %v10049_v53, %v10048_v35  ;;  %v8165_v12 = vsub.f32 %v8104_v4, %v10057_v57  ;;  %v2139_v35 = vadd.f32 %v2099_v21, %v10059_v43  ;;  %3298 = vmatpush.msra.mxu1 %v10062_v17  ;;  %v10064_v10 = vmax.f32 %v10063_v19, 0.0  ;;  %v10066_v21 = vld [vmem:[#allocation49_spill] sm:$0xff]  ;;  %v10072_v19 = vld [vmem:[#allocation80_spill] sm:$0xff]  ;;  %v10074_v2 = vld [vmem:[#allocation143_spill] sm:$0xff] }
 0x33e   :  { %10045 = vst [vmem:[#allocation61_spill] sm:$0xff] %v8140_v42  ;;  %v8160_v44 = vsub.f32 %v7901_v31, %v10054_v34  ;;  %v10067_v51 = vmax.f32 %v10066_v21, 0.0  ;;  %v10070_v43 = vmax.f32 %v10069_v29, 0.0  ;;  %v10075_v26 = vmax.f32 %v10074_v2, 0.0  ;;  %v10078_v29 = vld [vmem:[#allocation130_spill] sm:$0xff] }
 0x33f   :  { %10050 = vst [vmem:[#allocation34_spill] sm:$0xff] %v8148_v52  ;;  %3068 = vmatpush.msrb.mxu2 %v8148_v52  ;;  %v8177_v34 = vsub.f32 %v7897_v14, %v10064_v10  ;;  %3209 = vmatpush.msra.mxu3 %v8165_v12  ;;  %v10073_v10 = vld [vmem:[#allocation78_spill] sm:$0xff]  ;;  %v9339_v31 = vmax.f32 %v8152_v3, 0.0  ;;  %v10076_v21 = vmax.f32 %v8100_v1, 0.0 }
 0x340   :  { %10052 = vst [vmem:[#allocation56_spill] sm:$0xff] %v8152_v3  ;;  %3126 = vmatpush.msrb.mxu0 %v8160_v44  ;;  %v8185_v60 = vsub.f32 %v7931_v28, %v10067_v51  ;;  %v8190_v17 = vsub.f32 %v8129_v13, %v10070_v43  ;;  %3299 = vmatpush.msra.mxu1 %v10072_v19  ;;  %v10079_v43 = vld [vmem:[#allocation28_spill] sm:$0xff] }
 0x341   :  { %10055 = vst [vmem:[#allocation142_spill] sm:$0xff] %v8160_v44  ;;  %3069 = vmatpush.msrb.mxu2 %v8177_v34  ;;  %v2134_v57 = vadd.f32 %v10075_v26, %v10073_v10  ;;  %v2496_v44 = vadd.f32 %v2456_v56, %v2139_v35  ;;  %v8200_v51 = vadd.f32 %v10076_v21, %v2501_v59  ;;  %v10080_v19 = vmax.f32 %v10079_v43, 0.0  ;;  %v10084_v59 = vld [vmem:[#allocation101_spill] sm:$0xff]  ;;  %v8223_v21 = vpop.f32.mrf.mxu3 }
 0x342   :  { %10058 = vst [vmem:[#allocation20_spill] sm:$0xff] %v8165_v12  ;;  %3127 = vmatpush.msrb.mxu0 %v8185_v60  ;;  %3210 = vmatpush.msra.mxu3 %v8190_v17  ;;  %v10082_v35 = vmax.f32 %v8125_v62, 0.0  ;;  %v10090_v43 = vld [vmem:[#allocation89_spill] sm:$0xff] }
 0x343   :  { %10061 = vst [vmem:[#allocation81_spill] sm:$0xff] %v8170_v0  ;;  %3070 = vmatmul.f32.vlgmr.msrb.gmra.mxu2 %v10078_v29  ;;  %3128 = vmatmul.f32.vlgmr.msrb.gmra.mxu0 %v10078_v29  ;;  %v8209_v2 = vsub.f32 %v8170_v0, %v10080_v19  ;;  %v2491_v56 = vadd.f32 %v2451_v5, %v2134_v57  ;;  %v10086_v5 = vld [vmem:[#allocation9_spill] sm:$0xff] }
 0x344   :  { %10065 = vst [vmem:[#allocation129_spill] sm:$0xff] %v8177_v34  ;;  %v8213_v10 = vadd.f32 %v10082_v35, %v2496_v44  ;;  %3170 = vmatpush.msra.mxu2 %v8023_v58  ;;  %3256 = vmatpush.msra.mxu0 %v10084_v59  ;;  %v10087_v44 = vld [vmem:[#allocation62_spill] sm:$0xff] }
 0x345   :  { %10068 = vst [vmem:[#allocation47_spill] sm:$0xff] %v8185_v60  ;;  %3300 = vmatpush.msra.mxu1 %v7968_v9  ;;  %3211 = vmatpush.msra.mxu3 %v8209_v2  ;;  %v8221_v26 = vadd.f32 %v9339_v31, %v2491_v56  ;;  %v10088_v57 = vmax.f32 %v10087_v44, 0.0  ;;  %v10091_v56 = vmax.f32 %v10090_v43, 0.0  ;;  %v10092_v31 = vld [vmem:[#allocation103_spill] sm:$0xff]  ;;  %v10108_v34 = vld [vmem:[#allocation18_spill] sm:$0xff] }
 0x346   :  { %10071 = vst [vmem:[#allocation33_spill] sm:$0xff] %v8190_v17  ;;  %4248 = vmatmul.msk.f32.gmra.mxu3 %vm2983_vm8, %v10086_v5  ;;  %4252 = vmatmul.msk.f32.gmra.mxu1 %vm2983_vm8, %v10086_v5  ;;  %v1737_v44 = vadd.f32 %v10092_v31, %v10031_v33  ;;  %v10097_v31 = vld [vmem:[#allocation108_spill] sm:$0xff] }
 0x347   :  { %10077 = vst [vmem:[#allocation99_spill] sm:$0xff] %v8200_v51  ;;  %3409 = vmatpush.msrb.mxu1 %v8059_v50  ;;  %v8231_v19 = vsub.f32 %v8200_v51, %v10088_v57  ;;  %3171 = vmatpush.msra.mxu2 %v8078_v37  ;;  %v8241_v35 = vsub.f32 %v8213_v10, %v10091_v56  ;;  %v10093_v57 = vld [vmem:[#allocation106_spill] sm:$0xff] }
 0x348   :  { %10081 = vst [vmem:[#allocation63_spill] sm:$0xff] %v8209_v2  ;;  %3257 = vmatpush.msra.mxu0 %v7708_v23  ;;  %v1743_v59 = vadd.f32 %v10093_v57, %v5291_v41  ;;  %v10094_v23 = vld [vmem:[#allocation45_spill] sm:$0xff]  ;;  %v1746_v56 = vadd.f32 %v10097_v31, %v5223_v61  ;;  %v1764_v57 = vmax.f32 %v1737_v44, 0.0  ;;  %v10103_v44 = vld [vmem:[#allocation6_spill] sm:$0xff] }
 0x349   :  { %10083 = vst [vmem:[#allocation48_spill] sm:$0xff] %v8213_v10  ;;  %3212 = vmatpush.msra.mxu3 %v8231_v19  ;;  %3410 = vmatpush.msrb.mxu1 %v8140_v42  ;;  %v10095_v50 = vmax.f32 %v10094_v23, 0.0  ;;  %v10098_v42 = vld [vmem:[#allocation126_spill] sm:$0xff]  ;;  %v10099_v23 = vld [vmem:[#allocation15_spill] sm:$0xff] }
 0x34a   :  { %10085 = vst [vmem:[#allocation49_spill] sm:$0xff] %v8221_v26  ;;  %3172 = vmatpush.msra.mxu2 %v8104_v4  ;;  %3258 = vmatpush.msra.mxu0 %v7730_v24  ;;  %v1749_v9 = vadd.f32 %v10098_v42, %v5181_v45  ;;  %v1752_v24 = vadd.f32 %v10099_v23, %v5155_v46  ;;  %v1774_v28 = vmax.f32 %v1743_v59, 0.0  ;;  %v10102_v42 = vld [vmem:[#allocation29_spill] sm:$0xff]  ;;  %v10104_v23 = vld [vmem:[#allocation91_spill] sm:$0xff]  ;;  %v10105_v59 = vld [vmem:[#allocation82_spill] sm:$0xff] }
 0x34b   :  { %10089 = vst [vmem:[#allocation30_spill] sm:$0xff] %v8231_v19  ;;  %3213 = vmatpush.msra.mxu3 %v8241_v35  ;;  %v8254_v43 = vsub.f32 %v8221_v26, %v10095_v50  ;;  %3411 = vmatpush.msrb.mxu1 %v8165_v12  ;;  %v10100_v50 = vld [vmem:[#allocation115_spill] sm:$0xff]  ;;  %v10101_v12 = vld [vmem:[#allocation26_spill] sm:$0xff]  ;;  %v1755_v31 = vadd.f32 %v10102_v42, %v5199_v22 }
 0x34c   :  { %3173 = vmatpush.msra.mxu2 %v8129_v13  ;;  %3259 = vmatpush.msra.mxu0 %v7765_v63  ;;  %v1758_v60 = vadd.f32 %v10100_v50, %v9652_v48  ;;  %v2089_v63 = vadd.f32 %v10103_v44, %v9652_v48  ;;  %v1779_v50 = vmax.f32 %v1746_v56, 0.0  ;;  %v1784_v5 = vmax.f32 %v1749_v9, 0.0  ;;  %v10109_v9 = vld [vmem:[#allocation104_spill] sm:$0xff] }
 0x34d   :  { %10096 = vst [vmem:[#allocation78_spill] sm:$0xff] %v8254_v43  ;;  %3214 = vmatpush.msra.mxu3 %v8254_v43  ;;  %3412 = vmatpush.msrb.mxu1 %v8190_v17  ;;  %v2812_v17 = vpop.f32.mrf.mxu3  ;;  %v1789_v29 = vmax.f32 %v1752_v24, 0.0  ;;  %v2446_v44 = vadd.f32 %v10108_v34, %v9652_v48  ;;  %v8291_v56 = vadd.f32 %v10109_v9, %v5241_v11  ;;  %v10112_v24 = vld [vmem:[#allocation31_spill] sm:$0xff]  ;;  %v1794_v34 = vmax.f32 %v1755_v31, 0.0  ;;  %v10117_v31 = vld [vmem:[#allocation24_spill] sm:$0xff] }
 0x34e   :  { %3073 = vmatmul.f32.gmra.mxu2 %v10101_v12  ;;  %3131 = vmatmul.f32.gmra.mxu0 %v10101_v12  ;;  %v10106_v12 = vld [vmem:[#allocation51_spill] sm:$0xff]  ;;  %v1799_v42 = vmax.f32 %v1758_v60, 0.0  ;;  %v10113_v60 = vld [vmem:[#allocation97_spill] sm:$0xff] }
 0x34f   :  { %3174 = vmatpush.msra.mxu2 %v8170_v0  ;;  %3260 = vmatpush.msra.mxu0 %v7796_v25  ;;  %v8282_v8 = vadd.f32 %v1764_v57, %v10106_v12  ;;  %v10110_v25 = vld [vmem:[#allocation112_spill] sm:$0xff]  ;;  %v10111_v12 = vld [vmem:[#allocation125_spill] sm:$0xff]  ;;  %v10115_v9 = vld [vmem:[#allocation71_spill] sm:$0xff]  ;;  %v2487_v3 = vmax.f32 %v2446_v44, 0.0 }
 0x350   :  { %3351 = vmatpush.msrb.mxu3 %v10104_v23  ;;  %3413 = vmatpush.msrb.mxu1 %v8209_v2  ;;  %v8294_v2 = vadd.f32 %v1774_v28, %v10110_v25  ;;  %v2086_v57 = vadd.f32 %v10111_v12, %v5199_v22  ;;  %v2083_v23 = vadd.f32 %v10113_v60, %v5155_v46  ;;  %v10114_v28 = vld [vmem:[#allocation11_spill] sm:$0xff]  ;;  %v10125_v44 = vld [vmem:[#allocation13_spill] sm:$0xff] }
 0x351   :  { %4249 = vmatmul.msk.f32.gmra.mxu3 %vm2983_vm8, %v10105_v59  ;;  %10107 = vst [vmem:[#allocation143_spill] sm:$0xff] %v8282_v8  ;;  %4253 = vmatmul.msk.f32.gmra.mxu1 %vm2983_vm8, %v10105_v59  ;;  %v2130_v59 = vmax.f32 %v2089_v63, 0.0  ;;  %v8303_v8 = vadd.f32 %v2812_v17, %v9652_v48  ;;  %v8308_v25 = vadd.f32 %v1779_v50, %v10114_v28  ;;  %v10118_v63 = vld [vmem:[#allocation75_spill] sm:$0xff]  ;;  %v10119_v48 = vld [vmem:[#allocation60_spill] sm:$0xff] }
 0x352   :  { %3175 = vmatpush.msra.mxu2 %v8200_v51  ;;  %3261 = vmatpush.msra.mxu0 %v7828_v54  ;;  %v1824_v12 = vadd.f32 %v1784_v5, %v10115_v9  ;;  %v10116_v54 = vld [vmem:[#allocation7_spill] sm:$0xff]  ;;  %v1829_v60 = vadd.f32 %v1789_v29, %v10118_v63  ;;  %v1839_v17 = vadd.f32 %v1799_v42, %v10119_v48  ;;  %v2125_v5 = vmax.f32 %v2086_v57, 0.0  ;;  %v10122_v29 = vld [vmem:[#allocation8_spill] sm:$0xff] }
 0x353   :  { %3352 = vmatpush.msrb.mxu3 %v10112_v24  ;;  %3414 = vmatpush.msrb.mxu1 %v8231_v19  ;;  %v2443_v24 = vadd.f32 %v10116_v54, %v5199_v22  ;;  %v10120_v19 = vld [vmem:[#allocation92_spill] sm:$0xff]  ;;  %v10121_v50 = vld [vmem:[#allocation135_spill] sm:$0xff]  ;;  %v8325_v28 = vadd.f32 %v8223_v21, %v5199_v22  ;;  %v10123_v42 = vmax.f32 %v7975_v18, 0.0  ;;  %v1834_v9 = vadd.f32 %v1794_v34, %v10125_v44 }
 0x354   :  { %3176 = vmatpush.msra.mxu2 %v8213_v10  ;;  %3262 = vmatpush.msra.mxu0 %v10049_v53  ;;  %v2080_v52 = vadd.f32 %v10120_v19, %v5181_v45  ;;  %v2440_v54 = vadd.f32 %v10121_v50, %v5155_v46  ;;  %v2120_v63 = vmax.f32 %v2083_v23, 0.0  ;;  %v2170_v57 = vadd.f32 %v2130_v59, %v1839_v17  ;;  %v10126_v50 = vld [vmem:[#allocation100_spill] sm:$0xff] }
 0x355   :  { %3353 = vmatpush.msrb.mxu3 %v10117_v31  ;;  %3415 = vmatpush.msrb.mxu1 %v8241_v35  ;;  %v8332_v19 = vsub.f32 %v8023_v58, %v10123_v42  ;;  %v10127_v22 = vld [vmem:[#allocation132_spill] sm:$0xff]  ;;  %v8342_v18 = vadd.f32 %v8131_v15, %v5155_v46  ;;  %v10128_v23 = vmax.f32 %v7972_v30, 0.0  ;;  %v10133_v30 = vld [vmem:[#allocation5_spill] sm:$0xff]  ;;  %v8366_v53 = vadd.f32 %v7998_v49, %v5181_v45 }
 0x356   :  { %3177 = vmatpush.msra.mxu2 %v8221_v26  ;;  %3263 = vmatpush.msra.mxu0 %v7897_v14  ;;  %v2437_v21 = vadd.f32 %v10127_v22, %v5181_v45  ;;  %v2482_v14 = vmax.f32 %v2443_v24, 0.0  ;;  %v8354_v34 = vld [vmem:[%s9076_s3 + $0x88] sm:$0xff]  ;;  %v2115_v42 = vmax.f32 %v2080_v52, 0.0  ;;  %v2527_v44 = vadd.f32 %v2487_v3, %v2170_v57  ;;  %v10132_v22 = vld [vmem:[#allocation118_spill] sm:$0xff] }
 0x357   :  { %3354 = vmatpush.msrb.mxu3 %v10122_v29  ;;  %10124 = vst [vmem:[#allocation28_spill] sm:$0xff] %v8332_v19  ;;  %3416 = vmatpush.msrb.mxu1 %v8254_v43  ;;  %v8349_v59 = vsub.f32 %v8078_v37, %v10128_v23  ;;  %v10130_v24 = vld [vmem:[#allocation85_spill] sm:$0xff]  ;;  %v10131_v46 = vld [vmem:[#allocation12_spill] sm:$0xff]  ;;  %v2165_v23 = vadd.f32 %v2125_v5, %v1834_v9  ;;  %v2477_v48 = vmax.f32 %v2440_v54, 0.0  ;;  %v1769_v52 = vmax.f32 %v8291_v56, 0.0  ;;  %v10136_v5 = vld [vmem:[#allocation98_spill] sm:$0xff] }
 0x358   :  { %3076 = vmatmul.f32.gmra.mxu2 %v10126_v50  ;;  %3134 = vmatmul.f32.gmra.mxu0 %v10126_v50  ;;  %v8358_v17 = vadd.f32 %v10130_v24, %v5291_v41  ;;  %v2077_v15 = vadd.f32 %v10131_v46, %v5223_v61  ;;  %v2160_v3 = vadd.f32 %v2120_v63, %v1829_v60  ;;  %v10134_v57 = vmax.f32 %v8303_v8, 0.0  ;;  %v10137_v9 = vld [vmem:[#allocation87_spill] sm:$0xff]  ;;  %v10138_v63 = vld [vmem:[#allocation120_spill] sm:$0xff]  ;;  %v10139_v46 = vld [vmem:[#allocation37_spill] sm:$0xff] }
 0x359   :  { %3178 = vmatpush.msra.mxu2 %v8332_v19  ;;  %10129 = vst [vmem:[#allocation62_spill] sm:$0xff] %v8349_v59  ;;  %3264 = vmatpush.msra.mxu0 %v10132_v22  ;;  %v10135_v45 = vmax.f32 %v8002_v7, 0.0  ;;  %v2472_v54 = vmax.f32 %v2437_v21, 0.0  ;;  %v2522_v56 = vadd.f32 %v2482_v14, %v2165_v23  ;;  %v9371_v60 = vmax.f32 %v8342_v18, 0.0  ;;  %v10141_v23 = vld [vmem:[#allocation86_spill] sm:$0xff] }
 0x35a   :  { %3355 = vmatpush.msrb.mxu3 %v10133_v30  ;;  %v8375_v24 = vadd.f32 %v10134_v57, %v2527_v44  ;;  %4258 = vmatmul.msk.f32.vlgmr.msra.gmra.mxu1 %vm2983_vm8, %v8354_v34  ;;  %v2071_v44 = vadd.f32 %v10139_v46, %v5241_v11  ;;  %v2110_v57 = vmax.f32 %v2077_v15, 0.0  ;;  %v2155_v43 = vadd.f32 %v2115_v42, %v1824_v12  ;;  %v10143_v12 = vld [vmem:[#allocation77_spill] sm:$0xff]  ;;  %v10144_v42 = vld [vmem:[#allocation123_spill] sm:$0xff] }
 0x35b   :  { %3179 = vmatpush.msra.mxu2 %v8349_v59  ;;  %4254 = vmatmul.msk.f32.vlgmr.msra.gmra.mxu3 %vm2983_vm8, %v7498_v32  ;;  %v8383_v49 = vsub.f32 %v8104_v4, %v10135_v45  ;;  %v2434_v32 = vadd.f32 %v10136_v5, %v5223_v61  ;;  %v10140_v7 = vmax.f32 %v8018_v36, 0.0  ;;  %v2517_v14 = vadd.f32 %v2477_v48, %v2160_v3  ;;  %v10145_v36 = vld [vmem:[#allocation117_spill] sm:$0xff]  ;;  %v10146_v48 = vld [vmem:[#allocation107_spill] sm:$0xff] }
 0x35c   :  { %3265 = vmatpush.msra.mxu0 %v7982_v6  ;;  %3356 = vmatpush.msrb.mxu3 %v10137_v9  ;;  %v8401_v45 = vadd.f32 %v10141_v23, %v5223_v61  ;;  %v2068_v46 = vadd.f32 %v10145_v36, %v10031_v33  ;;  %v2431_v3 = vadd.f32 %v10146_v48, %v5291_v41  ;;  %v10147_v61 = vld [vmem:[#allocation19_spill] sm:$0xff]  ;;  %v10150_v36 = vmax.f32 %v8066_v27, 0.0 }
 0x35d   :  { %3537 = vmatpush.msra.mxu1 %v10138_v63  ;;  %3180 = vmatpush.msra.mxu2 %v8383_v49  ;;  %v8397_v21 = vsub.f32 %v8129_v13, %v10140_v7  ;;  %v10142_v63 = vmax.f32 %v8325_v28, 0.0  ;;  %v2105_v7 = vmax.f32 %v8358_v17, 0.0  ;;  %v10148_v23 = vmax.f32 %v10147_v61, 0.0  ;;  %v10149_v17 = vld [vmem:[#allocation114_spill] sm:$0xff] }
 0x35e   :  { %3266 = vmatpush.msra.mxu0 %v8032_v16  ;;  %3357 = vmatpush.msrb.mxu3 %v10143_v12  ;;  %v2512_v5 = vadd.f32 %v2472_v54, %v2155_v43  ;;  %v8431_v48 = vsub.f32 %v8170_v0, %v10150_v36  ;;  %v2150_v61 = vadd.f32 %v2110_v57, %v8308_v25  ;;  %v10152_v43 = vld [vmem:[#allocation113_spill] sm:$0xff]  ;;  %v10153_v27 = vmax.f32 %v8366_v53, 0.0 }
 0x35f   :  { %v8406_v15 = vadd.f32 %v10142_v63, %v2522_v56  ;;  %3538 = vmatpush.msra.mxu1 %v10144_v42  ;;  %3181 = vmatpush.msra.mxu2 %v8397_v21  ;;  %v8420_v56 = vsub.f32 %v8375_v24, %v10148_v23  ;;  %v2467_v63 = vmax.f32 %v2434_v32, 0.0  ;;  %v8424_v42 = vadd.f32 %v9371_v60, %v2517_v14  ;;  %v10151_v23 = vld [vmem:[#allocation25_spill] sm:$0xff]  ;;  %v10159_v60 = vld [vmem:[#allocation66_spill] sm:$0xff]  ;;  %v10160_v14 = vld [vmem:[#allocation111_spill] sm:$0xff] }
 0x360   :  { %3267 = vmatpush.msra.mxu0 %v8054_v40  ;;  %3358 = vmatpush.msrb.mxu3 %v7996_v39  ;;  %v2100_v40 = vmax.f32 %v2071_v44, 0.0  ;;  %v2428_v32 = vadd.f32 %v10151_v23, %v5241_v11  ;;  %v8438_v54 = vadd.f32 %v10152_v43, %v5291_v41  ;;  %v10154_v25 = vld [vmem:[#allocation57_spill] sm:$0xff]  ;;  %v10156_v41 = vmax.f32 %v8100_v1, 0.0  ;;  %v10158_v23 = vld [vmem:[#allocation23_spill] sm:$0xff] }
 0x361   :  { %3539 = vmatpush.msra.mxu1 %v10149_v17  ;;  %3079 = vmatmul.f32.gmra.mxu2 %v8047_v20  ;;  %v8445_v17 = vadd.f32 %v10153_v27, %v2512_v5  ;;  %v10155_v44 = vmax.f32 %v10154_v25, 0.0  ;;  %v1809_v43 = vadd.f32 %v1769_v52, %v10158_v23  ;;  %v2425_v5 = vadd.f32 %v10159_v60, %v10031_v33  ;;  %v10161_v25 = vld [vmem:[#allocation42_spill] sm:$0xff] }
 0x362   :  { %3467 = vmatpush.msra.mxu3 %v8420_v56  ;;  %3137 = vmatmul.f32.gmra.mxu0 %v8047_v20  ;;  %v8457_v36 = vsub.f32 %v8200_v51, %v10156_v41  ;;  %v2462_v27 = vmax.f32 %v2431_v3, 0.0  ;;  %v8464_v16 = vadd.f32 %v10160_v14, %v5241_v11  ;;  %v8471_v1 = vld [vmem:[%s9076_s3 + $0x98] sm:$0xff]  ;;  %v2145_v52 = vadd.f32 %v2105_v7, %v8294_v2 }
 0x363   :  { %3182 = vmatpush.msra.mxu2 %v8431_v48  ;;  %v8452_v57 = vsub.f32 %v8406_v15, %v10155_v44  ;;  %3268 = vmatpush.msra.mxu0 %v8085_v38  ;;  %v2095_v44 = vmax.f32 %v2068_v46, 0.0  ;;  %v2507_v41 = vadd.f32 %v2467_v63, %v2150_v61  ;;  %v10162_v60 = vld [vmem:[#allocation54_spill] sm:$0xff]  ;;  %v2457_v14 = vmax.f32 %v2428_v32, 0.0 }
 0x364   :  { %10157 = vst [vmem:[#allocation89_spill] sm:$0xff] %v8457_v36  ;;  %3540 = vmatpush.msra.mxu1 %v10161_v25  ;;  %v10163_v11 = vmax.f32 %v10162_v60, 0.0  ;;  %v10164_v23 = vld [vmem:[#allocation138_spill] sm:$0xff]  ;;  %v9375_v38 = vmax.f32 %v8438_v54, 0.0  ;;  %4255 = vmatmul.msk.f32.gmra.mxu3 %vm2983_vm8, %v10042_v47  ;;  %v10165_v2 = vmax.f32 %v8125_v62, 0.0  ;;  %v2140_v7 = vadd.f32 %v2100_v40, %v1809_v43  ;;  %v10170_v40 = vld [vmem:[#allocation56_spill] sm:$0xff] }
 0x365   :  { %3468 = vmatpush.msra.mxu3 %v8452_v57  ;;  %3183 = vmatpush.msra.mxu2 %v8457_v36  ;;  %v8483_v25 = vadd.f32 %v10164_v23, %v10031_v33  ;;  %v10166_v63 = vmax.f32 %v8401_v45, 0.0  ;;  %v10167_v33 = vld [vmem:[#allocation95_spill] sm:$0xff]  ;;  %v2452_v60 = vmax.f32 %v2425_v5, 0.0  ;;  %v2502_v62 = vadd.f32 %v2462_v27, %v2145_v52  ;;  %v10169_v23 = vld [vmem:[#allocation53_spill] sm:$0xff]  ;;  %v10174_v52 = vld [vmem:[#allocation72_spill] sm:$0xff] }
 0x366   :  { %v8479_v3 = vsub.f32 %v8424_v42, %v10163_v11  ;;  %3269 = vmatpush.msra.mxu0 %v8116_v55  ;;  %v8492_v46 = vsub.f32 %v8213_v10, %v10165_v2  ;;  %4259 = vmatmul.msk.f32.gmra.mxu1 %vm2983_vm8, %v8471_v1  ;;  %v10168_v32 = vmax.f32 %v10167_v33, 0.0  ;;  %v10171_v43 = vmax.f32 %v10170_v40, 0.0  ;;  %v10172_v2 = vld [vmem:[#allocation34_spill] sm:$0xff]  ;;  %v10176_v40 = vld [vmem:[#allocation32_spill] sm:$0xff] }
 0x367   :  { %v8496_v61 = vadd.f32 %v10166_v63, %v2507_v41  ;;  %3541 = vmatpush.msra.mxu1 %v10169_v23  ;;  %v10173_v63 = vld [vmem:[#allocation143_spill] sm:$0xff]  ;;  %v9374_v5 = vmax.f32 %v8483_v25, 0.0  ;;  %v8520_v27 = vadd.f32 %v9375_v38, %v2502_v62  ;;  %v10175_v23 = vld [vmem:[#allocation129_spill] sm:$0xff]  ;;  %v10206_v55 = vld [vmem:[#allocation128_spill] sm:$0xff] }
 0x368   :  { %3469 = vmatpush.msra.mxu3 %v8479_v3  ;;  %v8504_v47 = vsub.f32 %v8445_v17, %v10168_v32  ;;  %3184 = vmatpush.msra.mxu2 %v8492_v46  ;;  %v8512_v41 = vsub.f32 %v8221_v26, %v10171_v43  ;;  %v2135_v33 = vadd.f32 %v2095_v44, %v10173_v63  ;;  %v10177_v43 = vld [vmem:[#allocation94_spill] sm:$0xff]  ;;  %v8534_v44 = vld [vmem:[%s9076_s3 + $0x80] sm:$0xff] }
 0x369   :  { %3270 = vmatpush.msra.mxu0 %v10172_v2  ;;  %v2497_v32 = vadd.f32 %v2457_v14, %v2140_v7  ;;  %3542 = vmatpush.msra.mxu1 %v10174_v52  ;;  %v10178_v11 = vmax.f32 %v10177_v43, 0.0  ;;  %v10179_v7 = vmax.f32 %v8464_v16, 0.0  ;;  %v10180_v63 = vld [vmem:[#allocation44_spill] sm:$0xff]  ;;  %v10181_v52 = vld [vmem:[#allocation130_spill] sm:$0xff] }
 0x36a   :  { %3470 = vmatpush.msra.mxu3 %v8504_v47  ;;  %3185 = vmatpush.msra.mxu2 %v8512_v41  ;;  %v2492_v14 = vadd.f32 %v2452_v60, %v2135_v33  ;;  %v10182_v33 = vld [vmem:[#allocation41_spill] sm:$0xff] }
 0x36b   :  { %3271 = vmatpush.msra.mxu0 %v10175_v23  ;;  %v8529_v2 = vsub.f32 %v8496_v61, %v10178_v11  ;;  %v8538_v62 = vadd.f32 %v10179_v7, %v2497_v32  ;;  %3543 = vmatpush.msra.mxu1 %v10180_v63  ;;  %v8547_v11 = vld [vmem:[%s9076_s3 + $0xa8] sm:$0xff]  ;;  %v10185_v63 = vld [vmem:[#allocation22_spill] sm:$0xff] }
 0x36c   :  { %3314 = vmatpush.msrb.mxu2 %v10176_v40  ;;  %v8551_v60 = vadd.f32 %v9374_v5, %v2492_v14  ;;  %3272 = vmatmul.f32.vlgmr.msra.gmra.mxu0 %v8534_v44  ;;  %v10183_v32 = vld [vmem:[#allocation109_spill] sm:$0xff]  ;;  %v10186_v14 = vld [vmem:[#allocation90_spill] sm:$0xff] }
 0x36d   :  { %3372 = vmatpush.msrb.mxu0 %v8023_v58  ;;  %3471 = vmatpush.msra.mxu3 %v8529_v2  ;;  %v10184_v43 = vmax.f32 %v10183_v32, 0.0  ;;  %v10189_v32 = vld [vmem:[#allocation40_spill] sm:$0xff]  ;;  %v10192_v58 = vld [vmem:[#allocation93_spill] sm:$0xff]  ;;  %v10198_v23 = vld [vmem:[#allocation38_spill] sm:$0xff] }
 0x36e   :  { %3186 = vmatmul.f32.vlgmr.msra.gmra.mxu2 %v10181_v52  ;;  %3544 = vmatpush.msra.mxu1 %v10182_v33  ;;  %v10187_v52 = vmax.f32 %v10186_v14, 0.0  ;;  %v10188_v33 = vld [vmem:[#allocation9_spill] sm:$0xff] }
 0x36f   :  { %v8558_v7 = vsub.f32 %v8520_v27, %v10184_v43  ;;  %3315 = vmatpush.msrb.mxu2 %v10185_v63  ;;  %3373 = vmatpush.msrb.mxu0 %v8078_v37  ;;  %v10190_v43 = vld [vmem:[#allocation59_spill] sm:$0xff]  ;;  %v8586_v14 = vld [vmem:[%s9076_s3 + $0x90] sm:$0xff] }
 0x370   :  { %4260 = vmatmul.msk.f32.gmra.mxu1 %vm2983_vm8, %v8547_v11  ;;  %v8568_v5 = vsub.f32 %v8538_v62, %v10187_v52  ;;  %4256 = vmatmul.msk.f32.gmra.mxu3 %vm2983_vm8, %v10188_v33  ;;  %v10191_v38 = vmax.f32 %v10190_v43, 0.0  ;;  %v10193_v52 = vld [vmem:[#allocation88_spill] sm:$0xff]  ;;  %v8592_v33 = vld [vmem:[%s9076_s3 + $0xb8] sm:$0xff] }
 0x371   :  { %3472 = vmatpush.msra.mxu3 %v8558_v7  ;;  %3316 = vmatpush.msrb.mxu2 %v10189_v32  ;;  %v10195_v43 = vld [vmem:[#allocation46_spill] sm:$0xff] }
 0x372   :  { %3374 = vmatpush.msrb.mxu0 %v8104_v4  ;;  %v8578_v37 = vsub.f32 %v8551_v60, %v10191_v38  ;;  %v10194_v38 = vld [vmem:[#allocation26_spill] sm:$0xff] }
 0x373   :  { %3473 = vmatpush.msra.mxu3 %v8568_v5  ;;  %3317 = vmatpush.msrb.mxu2 %v10192_v58  ;;  %v10197_v4 = vld [vmem:[#allocation134_spill] sm:$0xff] }
 0x374   :  { %3375 = vmatpush.msrb.mxu0 %v8129_v13  ;;  %v10196_v13 = vld [vmem:[#allocation82_spill] sm:$0xff] }
 0x375   :  { %3474 = vmatpush.msra.mxu3 %v8578_v37  ;;  %3318 = vmatpush.msrb.mxu2 %v10193_v52 }
 0x376   :  { %3376 = vmatpush.msrb.mxu0 %v8170_v0  ;;  %3189 = vmatmul.f32.gmra.mxu2 %v10194_v38  ;;  %v8610_v38 = vld [vmem:[%s9076_s3 + $0xa0] sm:$0xff]  ;;  %v10203_v0 = vld [vmem:[#allocation105_spill] sm:$0xff] }
 0x377   :  { %3275 = vmatmul.f32.gmra.mxu0 %v8586_v14  ;;  %3319 = vmatpush.msrb.mxu2 %v10195_v43 }
 0x378   :  { %3377 = vmatpush.msrb.mxu0 %v8200_v51  ;;  %4261 = vmatmul.msk.f32.gmra.mxu1 %vm2983_vm8, %v8592_v33  ;;  %v10199_v51 = vld [vmem:[#allocation131_spill] sm:$0xff] }
 0x379   :  { %4257 = vmatmul.msk.f32.gmra.mxu3 %vm2983_vm8, %v10196_v13  ;;  %3320 = vmatpush.msrb.mxu2 %v10197_v4  ;;  %v10200_v13 = vld [vmem:[#allocation110_spill] sm:$0xff] }
 0x37a   :  { %3378 = vmatpush.msrb.mxu0 %v8213_v10  ;;  %v10202_v10 = vld [vmem:[#allocation133_spill] sm:$0xff] }
 0x37b   :  { %3321 = vmatpush.msrb.mxu2 %v10198_v23 }
 0x37c   :  { %3379 = vmatpush.msrb.mxu0 %v8221_v26  ;;  %v10201_v26 = vld [vmem:[#allocation91_spill] sm:$0xff] }
 0x37d   :  { %3322 = vmatpush.msrb.mxu2 %v10199_v51 }
 0x37e   :  { %3380 = vmatpush.msrb.mxu0 %v8332_v19  ;;  %3192 = vmatmul.f32.gmra.mxu2 %v10126_v50  ;;  %v10204_v50 = vld [vmem:[#allocation31_spill] sm:$0xff]  ;;  %v10205_v19 = vld [vmem:[#allocation36_spill] sm:$0xff] }
 0x37f   :  { %3278 = vmatmul.f32.gmra.mxu0 %v8610_v38  ;;  %3323 = vmatpush.msrb.mxu2 %v10200_v13 }
 0x380   :  { %3381 = vmatpush.msrb.mxu0 %v8349_v59  ;;  %4266 = vmatmul.msk.f32.vlgmr.msrb.gmra.mxu1 %vm2983_vm8, %v8354_v34  ;;  %v10208_v59 = vld [vmem:[#allocation16_spill] sm:$0xff] }
 0x381   :  { %4262 = vmatmul.msk.f32.vlgmr.msrb.gmra.mxu3 %vm2983_vm8, %v8354_v34  ;;  %3653 = vmatpush.msrb.mxu1 %v10201_v26  ;;  %v8634_v26 = vld [vmem:[%s9076_s3 + $0xb0] sm:$0xff] }
 0x382   :  { %3595 = vmatpush.msrb.mxu3 %v10202_v10  ;;  %3324 = vmatpush.msrb.mxu2 %v10203_v0  ;;  %v10207_v10 = vld [vmem:[#allocation58_spill] sm:$0xff] }
 0x383   :  { %3382 = vmatpush.msrb.mxu0 %v8383_v49  ;;  %3654 = vmatpush.msrb.mxu1 %v10204_v50  ;;  %v10211_v50 = vld [vmem:[#allocation121_spill] sm:$0xff] }
 0x384   :  { %3596 = vmatpush.msrb.mxu3 %v10205_v19  ;;  %3325 = vmatpush.msrb.mxu2 %v10206_v55  ;;  %v10209_v19 = vld [vmem:[#allocation10_spill] sm:$0xff] }
 0x385   :  { %3383 = vmatpush.msrb.mxu0 %v8397_v21  ;;  %3655 = vmatpush.msrb.mxu1 %v10117_v31  ;;  %v10210_v31 = vld [vmem:[#allocation14_spill] sm:$0xff] }
 0x386   :  { %3597 = vmatpush.msrb.mxu3 %v10207_v10  ;;  %3326 = vmatpush.msrb.mxu2 %v10208_v59  ;;  %v10213_v10 = vld [vmem:[#allocation83_spill] sm:$0xff] }
 0x387   :  { %3384 = vmatpush.msrb.mxu0 %v8431_v48  ;;  %3195 = vmatmul.f32.gmra.mxu2 %v8047_v20  ;;  %v10212_v20 = vld [vmem:[#allocation142_spill] sm:$0xff] }
 0x388   :  { %3281 = vmatmul.f32.gmra.mxu0 %v8634_v26  ;;  %3598 = vmatpush.msrb.mxu3 %v10209_v19  ;;  %v10215_v19 = vld [vmem:[#allocation68_spill] sm:$0xff] }
 0x389   :  { %3656 = vmatpush.msrb.mxu1 %v10122_v29  ;;  %3327 = vmatpush.msrb.mxu2 %v10210_v31  ;;  %v10214_v29 = vld [vmem:[#allocation47_spill] sm:$0xff] }
 0x38a   :  { %3385 = vmatpush.msrb.mxu0 %v8457_v36  ;;  %4263 = vmatmul.msk.f32.gmra.mxu3 %vm2983_vm8, %v8471_v1  ;;  %v10216_v36 = vld [vmem:[#allocation80_spill] sm:$0xff] }
 0x38b   :  { %4267 = vmatmul.msk.f32.gmra.mxu1 %vm2983_vm8, %v8471_v1  ;;  %3599 = vmatpush.msrb.mxu3 %v10211_v50  ;;  %v10219_v50 = vld [vmem:[#allocation122_spill] sm:$0xff] }
 0x38c   :  { %3657 = vmatpush.msrb.mxu1 %v10133_v30  ;;  %3328 = vmatpush.msrb.mxu2 %v10212_v20  ;;  %v8664_v30 = vpop.f32.mrf.mxu1 }
 0x38d   :  { %3386 = vmatpush.msrb.mxu0 %v8492_v46  ;;  %3600 = vmatpush.msrb.mxu3 %v10213_v10  ;;  %10217 = vst [vmem:[#allocation103_spill] sm:$0xff] %v8664_v30  ;;  %v10222_v10 = vld [vmem:[#allocation127_spill] sm:$0xff]  ;;  %v10230_v30 = vld [vmem:[#allocation65_spill] sm:$0xff] }
 0x38e   :  { %3658 = vmatpush.msrb.mxu1 %v10137_v9  ;;  %3329 = vmatpush.msrb.mxu2 %v10214_v29  ;;  %v10218_v9 = vld [vmem:[#allocation43_spill] sm:$0xff] }
 0x38f   :  { %3387 = vmatpush.msrb.mxu0 %v8512_v41  ;;  %3601 = vmatpush.msrb.mxu3 %v10216_v36  ;;  %v10221_v36 = vld [vmem:[#allocation84_spill] sm:$0xff] }
 0x390   :  { %3430 = vmatpush.msra.mxu2 %v8375_v24  ;;  %3659 = vmatpush.msrb.mxu1 %v10143_v12  ;;  %v10220_v12 = vld [vmem:[#allocation50_spill] sm:$0xff] }
 0x391   :  { %3500 = vmatpush.msra.mxu0 %v10215_v19  ;;  %3330 = vmatmul.f32.vlgmr.msrb.gmra.mxu2 %v8534_v44 }
 0x392   :  { %3388 = vmatmul.f32.vlgmr.msrb.gmra.mxu0 %v8534_v44  ;;  %3431 = vmatpush.msra.mxu2 %v8406_v15 }
 0x393   :  { %3501 = vmatpush.msra.mxu0 %v10218_v9  ;;  %3602 = vmatpush.msrb.mxu3 %v10219_v50  ;;  %v10225_v9 = vld [vmem:[#allocation67_spill] sm:$0xff]  ;;  %v10226_v50 = vld [vmem:[#allocation116_spill] sm:$0xff] }
 0x394   :  { %3660 = vmatpush.msrb.mxu1 %v7996_v39  ;;  %4264 = vmatmul.msk.f32.gmra.mxu3 %vm2983_vm8, %v8547_v11  ;;  %v8680_v39 = vpop.f32.mrf.mxu0  ;;  %v8682_v19 = vpop.f32.mrf.mxu1 }
 0x395   :  { %4268 = vmatmul.msk.f32.gmra.mxu1 %vm2983_vm8, %v8547_v11  ;;  %3432 = vmatpush.msra.mxu2 %v8424_v42  ;;  %10223 = vst [vmem:[#allocation106_spill] sm:$0xff] %v8680_v39  ;;  %v10240_v39 = vld [vmem:[#allocation61_spill] sm:$0xff] }
 0x396   :  { %3502 = vmatpush.msra.mxu0 %v10220_v12  ;;  %10224 = vst [vmem:[#allocation45_spill] sm:$0xff] %v8682_v19  ;;  %v10227_v12 = vmax.f32 %v8303_v8, 0.0  ;;  %v8711_v8 = vld [vmem:[%s9076_s3 + $0x48] sm:$0xff] }
 0x397   :  { %3433 = vmatpush.msra.mxu2 %v8445_v17 }
 0x398   :  { %3503 = vmatpush.msra.mxu0 %v10221_v36  ;;  %v8697_v36 = vsub.f32 %v8375_v24, %v10227_v12 }
 0x399   :  { %3434 = vmatpush.msra.mxu2 %v8496_v61 }
 0x39a   :  { %3504 = vmatpush.msra.mxu0 %v10222_v10  ;;  %3333 = vmatmul.f32.gmra.mxu2 %v8586_v14  ;;  %v10228_v10 = vld [vmem:[#allocation17_spill] sm:$0xff] }
 0x39b   :  { %3391 = vmatmul.f32.gmra.mxu0 %v8586_v14  ;;  %3435 = vmatpush.msra.mxu2 %v8520_v27 }
 0x39c   :  { %3505 = vmatpush.msra.mxu0 %v10225_v9  ;;  %4265 = vmatmul.msk.f32.gmra.mxu3 %vm2983_vm8, %v8592_v33  ;;  %v10229_v9 = vmax.f32 %v8325_v28, 0.0  ;;  %v10232_v28 = vmax.f32 %v8342_v18, 0.0  ;;  %v10236_v18 = vld [vmem:[#allocation139_spill] sm:$0xff] }
 0x39d   :  { %4269 = vmatmul.msk.f32.gmra.mxu1 %vm2983_vm8, %v8592_v33  ;;  %3436 = vmatpush.msra.mxu2 %v8538_v62 }
 0x39e   :  { %3506 = vmatpush.msra.mxu0 %v10226_v50  ;;  %v8704_v19 = vsub.f32 %v8406_v15, %v10229_v9  ;;  %v8713_v50 = vpop.f32.mrf.mxu1  ;;  %v8720_v12 = vsub.f32 %v8424_v42, %v10232_v28  ;;  %v10235_v9 = vmax.f32 %v8366_v53, 0.0  ;;  %v10237_v28 = vld [vmem:[#allocation64_spill] sm:$0xff]  ;;  %v10241_v53 = vld [vmem:[#allocation141_spill] sm:$0xff] }
 0x39f   :  { %3437 = vmatpush.msra.mxu2 %v8551_v60  ;;  %10231 = vst [vmem:[#allocation108_spill] sm:$0xff] %v8713_v50 }
 0x3a0   :  { %3507 = vmatpush.msra.mxu0 %v10228_v10  ;;  %v10233_v10 = vld [vmem:[#allocation137_spill] sm:$0xff]  ;;  %v8733_v50 = vsub.f32 %v8445_v17, %v10235_v9  ;;  %v10242_v9 = vld [vmem:[#allocation20_spill] sm:$0xff] }
 0x3a1   :  { %3438 = vmatpush.msra.mxu2 %v8697_v36 }
 0x3a2   :  { %3508 = vmatpush.msra.mxu0 %v10230_v30  ;;  %3336 = vmatmul.f32.gmra.mxu2 %v8610_v38  ;;  %v8725_v30 = vpop.f32.mrf.mxu0 }
 0x3a3   :  { %3394 = vmatmul.f32.gmra.mxu0 %v8610_v38  ;;  %3439 = vmatpush.msra.mxu2 %v8704_v19  ;;  %10234 = vst [vmem:[#allocation126_spill] sm:$0xff] %v8725_v30  ;;  %v10239_v30 = vld [vmem:[#allocation140_spill] sm:$0xff] }
 0x3a4   :  { %3509 = vmatpush.msra.mxu0 %v10233_v10  ;;  %4270 = vmatmul.msk.f32.vlgmr.msra.gmra.mxu3 %vm2983_vm8, %v8354_v34  ;;  %v10238_v34 = vmax.f32 %v8401_v45, 0.0 }
 0x3a5   :  { %3440 = vmatpush.msra.mxu2 %v8720_v12  ;;  %4274 = vmatmul.msk.f32.vlgmr.msra.gmra.mxu1 %vm2983_vm8, %v8711_v8 }
 0x3a6   :  { %3510 = vmatpush.msra.mxu0 %v10236_v18  ;;  %3711 = vmatpush.msra.mxu3 %v10237_v28  ;;  %v8742_v10 = vsub.f32 %v8496_v61, %v10238_v34  ;;  %v8755_v45 = vpop.f32.mrf.mxu1 }
 0x3a7   :  { %3769 = vmatpush.msra.mxu1 %v8420_v56  ;;  %3441 = vmatpush.msra.mxu2 %v8733_v50  ;;  %v10243_v56 = vmax.f32 %v8438_v54, 0.0  ;;  %v10246_v54 = vld [vmem:[#allocation33_spill] sm:$0xff] }
 0x3a8   :  { %3511 = vmatpush.msra.mxu0 %v10239_v30  ;;  %3712 = vmatpush.msra.mxu3 %v10240_v39  ;;  %v10245_v30 = vld [vmem:[#allocation144_spill] sm:$0xff] }
 0x3a9   :  { %3770 = vmatpush.msra.mxu1 %v8452_v57  ;;  %3442 = vmatpush.msra.mxu2 %v8742_v10  ;;  %v8753_v18 = vsub.f32 %v8520_v27, %v10243_v56  ;;  %v10244_v57 = vmax.f32 %v8464_v16, 0.0  ;;  %v10249_v16 = vld [vmem:[#allocation63_spill] sm:$0xff] }
 0x3aa   :  { %3512 = vmatpush.msra.mxu0 %v10241_v53  ;;  %3713 = vmatpush.msra.mxu3 %v10242_v9  ;;  %v8775_v34 = vpop.f32.mrf.mxu0  ;;  %v10248_v53 = vld [vmem:[#allocation76_spill] sm:$0xff]  ;;  %v10250_v9 = vld [vmem:[#allocation39_spill] sm:$0xff] }
 0x3ab   :  { %3771 = vmatpush.msra.mxu1 %v8479_v3  ;;  %3339 = vmatmul.f32.gmra.mxu2 %v8634_v26  ;;  %v8764_v39 = vsub.f32 %v8538_v62, %v10244_v57  ;;  %v10247_v3 = vmax.f32 %v8483_v25, 0.0  ;;  %v10252_v25 = vld [vmem:[#allocation101_spill] sm:$0xff]  ;;  %v8790_v56 = vld [vmem:[%s9076_s3 + $0x40] sm:$0xff] }
 0x3ac   :  { %3397 = vmatmul.f32.gmra.mxu0 %v8634_v26  ;;  %3443 = vmatpush.msra.mxu2 %v8753_v18  ;;  %v10253_v57 = vld [vmem:[#allocation79_spill] sm:$0xff] }
 0x3ad   :  { %3513 = vmatpush.msra.mxu0 %v10245_v30  ;;  %3714 = vmatpush.msra.mxu3 %v10246_v54  ;;  %v8773_v28 = vsub.f32 %v8551_v60, %v10247_v3  ;;  %v8827_v54 = vld [vmem:[%s9076_s3 + $0x68] sm:$0xff] }
 0x3ae   :  { %3772 = vmatpush.msra.mxu1 %v8504_v47  ;;  %3444 = vmatpush.msra.mxu2 %v8764_v39  ;;  %v10251_v47 = vld [vmem:[#allocation30_spill] sm:$0xff] }
 0x3af   :  { %3514 = vmatpush.msra.mxu0 %v10248_v53  ;;  %3715 = vmatpush.msra.mxu3 %v10249_v16  ;;  %v10264_v53 = vld [vmem:[#allocation124_spill] sm:$0xff] }
 0x3b0   :  { %3773 = vmatpush.msra.mxu1 %v8529_v2  ;;  %3445 = vmatpush.msra.mxu2 %v8773_v28  ;;  %v3158_v2 = vpop.f32.mrf.mxu1 }
 0x3b1   :  { %3515 = vmatpush.msra.mxu0 %v10250_v9  ;;  %3716 = vmatpush.msra.mxu3 %v10251_v47 }
 0x3b2   :  { %3774 = vmatpush.msra.mxu1 %v8558_v7  ;;  %3558 = vmatpush.msrb.mxu2 %v10252_v25  ;;  %v10255_v7 = vld [vmem:[#allocation21_spill] sm:$0xff]  ;;  %v8815_v30 = vpop.f32.mrf.mxu3  ;;  %v10268_v25 = vld [vmem:[#allocation119_spill] sm:$0xff] }
 0x3b3   :  { %3616 = vmatpush.msrb.mxu0 %v10176_v40  ;;  %3717 = vmatpush.msra.mxu3 %v8241_v35  ;;  %v8799_v40 = vld [vmem:[%s9076_s3 + $0x58] sm:$0xff] }
 0x3b4   :  { %3775 = vmatpush.msra.mxu1 %v8568_v5  ;;  %3559 = vmatpush.msrb.mxu2 %v10253_v57  ;;  %v10254_v35 = vld [vmem:[#allocation78_spill] sm:$0xff]  ;;  %v8805_v5 = vpop.f32.mrf.mxu0 }
 0x3b5   :  { %3617 = vmatpush.msrb.mxu0 %v10185_v63  ;;  %3446 = vmatmul.f32.vlgmr.msra.gmra.mxu2 %v8534_v44  ;;  %v10256_v44 = vld [vmem:[#allocation35_spill] sm:$0xff]  ;;  %v10257_v63 = vld [vmem:[#allocation136_spill] sm:$0xff] }
 0x3b6   :  { %3516 = vmatmul.f32.vlgmr.msra.gmra.mxu0 %v8790_v56  ;;  %3718 = vmatpush.msra.mxu3 %v10254_v35 }
 0x3b7   :  { %3776 = vmatpush.msra.mxu1 %v8578_v37  ;;  %3560 = vmatpush.msrb.mxu2 %v10255_v7  ;;  %v8821_v37 = vld [vmem:[%s9076_s3 + $0x50] sm:$0xff] }
 0x3b8   :  { %3618 = vmatpush.msrb.mxu0 %v10189_v32  ;;  %4275 = vmatmul.msk.f32.gmra.mxu1 %vm2983_vm8, %v8799_v40  ;;  %v10258_v32 = vld [vmem:[#allocation55_spill] sm:$0xff] }
 0x3b9   :  { %3561 = vmatpush.msrb.mxu2 %v10256_v44  ;;  %4271 = vmatmul.msk.f32.gmra.mxu3 %vm2983_vm8, %v8471_v1  ;;  %v3161_v1 = vpop.f32.mrf.mxu1 }
 0x3ba   :  { %3619 = vmatpush.msrb.mxu0 %v10192_v58  ;;  %v10259_v58 = vld [vmem:[#allocation52_spill] sm:$0xff] }
 0x3bb   :  { %3562 = vmatpush.msrb.mxu2 %v10257_v63  ;;  %v10273_v63 = vld [vmem:[#allocation48_spill] sm:$0xff] }
 0x3bc   :  { %3620 = vmatpush.msrb.mxu0 %v10193_v52  ;;  %v10260_v52 = vld [vmem:[#allocation73_spill] sm:$0xff] }
 0x3bd   :  { %3563 = vmatpush.msrb.mxu2 %v10258_v32  ;;  %v10274_v32 = vld [vmem:[#allocation49_spill] sm:$0xff] }
 0x3be   :  { %3621 = vmatpush.msrb.mxu0 %v10195_v43  ;;  %3449 = vmatmul.f32.gmra.mxu2 %v8586_v14  ;;  %v3103_v14 = vpop.f32.mrf.mxu3 }
 0x3bf   :  { %3519 = vmatmul.f32.gmra.mxu0 %v8821_v37  ;;  %3564 = vmatpush.msrb.mxu2 %v10259_v58  ;;  %v10276_v58 = vld [vmem:[#allocation62_spill] sm:$0xff] }
 0x3c0   :  { %3622 = vmatpush.msrb.mxu0 %v10197_v4  ;;  %4276 = vmatmul.msk.f32.gmra.mxu1 %vm2983_vm8, %v8827_v54  ;;  %v3129_v3 = vpop.f32.mrf.mxu0  ;;  %v8847_v4 = vld [vmem:[%s9076_s3 + $0x60] sm:$0xff] }
 0x3c1   :  { %3565 = vmatpush.msrb.mxu2 %v10260_v52  ;;  %4272 = vmatmul.msk.f32.gmra.mxu3 %vm2983_vm8, %v8547_v11  ;;  %v8840_v43 = vadd.f32 %v3158_v2, %v3129_v3  ;;  %v8853_v11 = vld [vmem:[%s9076_s3 + $0x78] sm:$0xff] }
 0x3c2   :  { %3623 = vmatpush.msrb.mxu0 %v10198_v23  ;;  %v10269_v2 = vld [vmem:[#allocation102_spill] sm:$0xff] }
 0x3c3   :  { %3566 = vmatpush.msrb.mxu2 %v10132_v22  ;;  %v3164_v23 = vpop.f32.mrf.mxu1 }
 0x3c4   :  { %3624 = vmatpush.msrb.mxu0 %v10199_v51  ;;  %v10261_v51 = vld [vmem:[#allocation96_spill] sm:$0xff] }
 0x3c5   :  { %3567 = vmatpush.msrb.mxu2 %v7982_v6  ;;  %v10262_v6 = vld [vmem:[#allocation70_spill] sm:$0xff] }
 0x3c6   :  { %3625 = vmatpush.msrb.mxu0 %v10200_v13  ;;  %3452 = vmatmul.f32.gmra.mxu2 %v8610_v38  ;;  %v8859_v22 = vpop.f32.mrf.mxu2  ;;  %v10263_v38 = vld [vmem:[#allocation27_spill] sm:$0xff]  ;;  %v8873_v13 = vld [vmem:[%s9076_s3 + $0x70] sm:$0xff] }
 0x3c7   :  { %3522 = vmatmul.f32.gmra.mxu0 %v8847_v4  ;;  %3568 = vmatpush.msrb.mxu2 %v10261_v51 }
 0x3c8   :  { %3626 = vmatpush.msrb.mxu0 %v10203_v0  ;;  %4277 = vmatmul.msk.f32.gmra.mxu1 %vm2983_vm8, %v8853_v11 }
 0x3c9   :  { %3569 = vmatpush.msrb.mxu2 %v10262_v6  ;;  %4273 = vmatmul.msk.f32.gmra.mxu3 %vm2983_vm8, %v8592_v33  ;;  %v3106_v33 = vpop.f32.mrf.mxu3 }
 0x3ca   :  { %3627 = vmatpush.msrb.mxu0 %v10206_v55  ;;  %v10265_v55 = vld [vmem:[#allocation34_spill] sm:$0xff] }
 0x3cb   :  { %3570 = vmatpush.msrb.mxu2 %v10263_v38  ;;  %v3132_v0 = vpop.f32.mrf.mxu0 }
 0x3cc   :  { %3628 = vmatpush.msrb.mxu0 %v10208_v59  ;;  %v8876_v16 = vadd.f32 %v3161_v1, %v3132_v0  ;;  %v10266_v59 = vld [vmem:[#allocation129_spill] sm:$0xff]  ;;  %v10275_v1 = vld [vmem:[#allocation28_spill] sm:$0xff] }
 0x3cd   :  { %3571 = vmatpush.msrb.mxu2 %v10264_v53 }
 0x3ce   :  { %3629 = vmatpush.msrb.mxu0 %v10210_v31  ;;  %3455 = vmatmul.f32.gmra.mxu2 %v8634_v26  ;;  %v3167_v47 = vpop.f32.mrf.mxu1  ;;  %v10267_v26 = vld [vmem:[#allocation74_spill] sm:$0xff] }
 0x3cf   :  { %3525 = vmatmul.f32.gmra.mxu0 %v8873_v13  ;;  %3572 = vmatpush.msrb.mxu2 %v10265_v55 }
 0x3d0   :  { %3630 = vmatpush.msrb.mxu0 %v10212_v20  ;;  %4282 = vmatmul.msk.f32.vlgmr.msrb.gmra.mxu1 %vm2983_vm8, %v8711_v8 }
 0x3d1   :  { %3573 = vmatpush.msrb.mxu2 %v10266_v59  ;;  %4278 = vmatmul.msk.f32.vlgmr.msrb.gmra.mxu3 %vm2983_vm8, %v8711_v8  ;;  %v3074_v9 = vpop.f32.mrf.mxu2 }
 0x3d2   :  { %3631 = vmatpush.msrb.mxu0 %v10214_v29  ;;  %v8890_v31 = vadd.f32 %v3103_v14, %v3074_v9 }
 0x3d3   :  { %3674 = vmatpush.msra.mxu2 %v10267_v26 }
 0x3d4   :  { %3732 = vmatpush.msra.mxu0 %v8375_v24  ;;  %v3109_v29 = vpop.f32.mrf.mxu3  ;;  %v10270_v24 = vld [vmem:[#allocation69_spill] sm:$0xff] }
 0x3d5   :  { %3675 = vmatpush.msra.mxu2 %v10268_v25  ;;  %v3135_v20 = vpop.f32.mrf.mxu0 }
 0x3d6   :  { %3733 = vmatpush.msra.mxu0 %v8406_v15  ;;  %3574 = vmatmul.f32.vlgmr.msrb.gmra.mxu2 %v8790_v56  ;;  %v8898_v57 = vadd.f32 %v3164_v23, %v3135_v20  ;;  %v10271_v15 = vld [vmem:[#allocation81_spill] sm:$0xff] }
 0x3d7   :  { %3632 = vmatmul.f32.vlgmr.msrb.gmra.mxu0 %v8790_v56  ;;  %3676 = vmatpush.msra.mxu2 %v10269_v2  ;;  %v3302_v7 = vpop.f32.mrf.mxu1 }
 0x3d8   :  { %3734 = vmatpush.msra.mxu0 %v8424_v42  ;;  %4283 = vmatmul.msk.f32.gmra.mxu1 %vm2983_vm8, %v8799_v40  ;;  %v10272_v42 = vld [vmem:[#allocation99_spill] sm:$0xff] }
 0x3d9   :  { %3677 = vmatpush.msra.mxu2 %v10270_v24  ;;  %4279 = vmatmul.msk.f32.gmra.mxu3 %vm2983_vm8, %v8799_v40 }
 0x3da   :  { %3735 = vmatpush.msra.mxu0 %v8445_v17 }
 0x3db   :  { %3678 = vmatpush.msra.mxu2 %v10271_v15  ;;  %v3077_v35 = vpop.f32.mrf.mxu2 }
 0x3dc   :  { %3736 = vmatpush.msra.mxu0 %v8496_v61  ;;  %v8909_v44 = vadd.f32 %v3106_v33, %v3077_v35 }
 0x3dd   :  { %3679 = vmatpush.msra.mxu2 %v10272_v42 }
 0x3de   :  { %3737 = vmatpush.msra.mxu0 %v8520_v27  ;;  %3577 = vmatmul.f32.gmra.mxu2 %v8821_v37  ;;  %v3216_v27 = vpop.f32.mrf.mxu3 }
 0x3df   :  { %3635 = vmatmul.f32.gmra.mxu0 %v8821_v37  ;;  %3680 = vmatpush.msra.mxu2 %v10273_v63  ;;  %v3138_v17 = vpop.f32.mrf.mxu0 }
 0x3e0   :  { %3738 = vmatpush.msra.mxu0 %v8538_v62  ;;  %4284 = vmatmul.msk.f32.gmra.mxu1 %vm2983_vm8, %v8827_v54  ;;  %v8922_v61 = vadd.f32 %v3167_v47, %v3138_v17 }
 0x3e1   :  { %3681 = vmatpush.msra.mxu2 %v10274_v32  ;;  %4280 = vmatmul.msk.f32.gmra.mxu3 %vm2983_vm8, %v8827_v54 }
 0x3e2   :  { %3739 = vmatpush.msra.mxu0 %v8551_v60 }
 0x3e3   :  { %3682 = vmatpush.msra.mxu2 %v10275_v1  ;;  %v3305_v52 = vpop.f32.mrf.mxu1 }
 0x3e4   :  { %3740 = vmatpush.msra.mxu0 %v8697_v36  ;;  %v3080_v62 = vpop.f32.mrf.mxu2  ;;  %v10277_v36 = vld [vmem:[#allocation89_spill] sm:$0xff] }
 0x3e5   :  { %3683 = vmatpush.msra.mxu2 %v10276_v58  ;;  %v8930_v3 = vadd.f32 %v3109_v29, %v3080_v62 }
 0x3e6   :  { %3741 = vmatpush.msra.mxu0 %v8704_v19  ;;  %3580 = vmatmul.f32.gmra.mxu2 %v8847_v4 }
 0x3e7   :  { %3638 = vmatmul.f32.gmra.mxu0 %v8847_v4  ;;  %3684 = vmatpush.msra.mxu2 %v8383_v49  ;;  %v3219_v49 = vpop.f32.mrf.mxu3 }
 0x3e8   :  { %3742 = vmatpush.msra.mxu0 %v8720_v12  ;;  %4285 = vmatmul.msk.f32.gmra.mxu1 %vm2983_vm8, %v8853_v11 }
 0x3e9   :  { %3685 = vmatpush.msra.mxu2 %v8397_v21  ;;  %4281 = vmatmul.msk.f32.gmra.mxu3 %vm2983_vm8, %v8853_v11  ;;  %v3273_v60 = vpop.f32.mrf.mxu0 }
 0x3ea   :  { %3743 = vmatpush.msra.mxu0 %v8733_v50  ;;  %v8943_v19 = vadd.f32 %v3302_v7, %v3273_v60 }
 0x3eb   :  { %3686 = vmatpush.msra.mxu2 %v8431_v48 }
 0x3ec   :  { %3744 = vmatpush.msra.mxu0 %v8742_v10 }
 0x3ed   :  { %3687 = vmatpush.msra.mxu2 %v10277_v36  ;;  %v3308_v21 = vpop.f32.mrf.mxu1 }
 0x3ee   :  { %3745 = vmatpush.msra.mxu0 %v8753_v18  ;;  %3583 = vmatmul.f32.gmra.mxu2 %v8873_v13 }
 0x3ef   :  { %3641 = vmatmul.f32.gmra.mxu0 %v8873_v13  ;;  %3688 = vmatpush.msra.mxu2 %v8492_v46 }
 0x3f0   :  { %3746 = vmatpush.msra.mxu0 %v8764_v39  ;;  %4290 = vmatmul.msk.f32.vlgmr.msra.gmra.mxu1 %vm2983_vm8, %v8711_v8 }
 0x3f1   :  { %v3187_v48 = vpop.f32.mrf.mxu2  ;;  %3689 = vmatpush.msra.mxu2 %v8512_v41  ;;  %4286 = vmatmul.msk.f32.vlgmr.msra.gmra.mxu3 %vm2983_vm8, %v8711_v8 }
 0x3f2   :  { %v8956_v50 = vadd.f32 %v3216_v27, %v3187_v48  ;;  %3747 = vmatpush.msra.mxu0 %v8773_v28 }
 0x3f3   :  { %v3222_v46 = vpop.f32.mrf.mxu3 }
 0x3f4   :  { %v3276_v12 = vpop.f32.mrf.mxu0 }
 0x3f5   :  { %v8959_v10 = vadd.f32 %v3305_v52, %v3276_v12  ;;  %v3311_v8 = vpop.f32.mrf.mxu1 }
 0x3f6   :  { %3690 = vmatmul.f32.vlgmr.msra.gmra.mxu2 %v8790_v56 }
 0x3f7   :  { %3748 = vmatmul.f32.vlgmr.msra.gmra.mxu0 %v8790_v56 }
 0x3f8   :  { %4291 = vmatmul.msk.f32.gmra.mxu1 %vm2983_vm8, %v8799_v40 }
 0x3f9   :  { %4287 = vmatmul.msk.f32.gmra.mxu3 %vm2983_vm8, %v8799_v40  ;;  %v3190_v41 = vpop.f32.mrf.mxu2 }
 0x3fa   :  { %v8967_v18 = vadd.f32 %v3219_v49, %v3190_v41 }
 0x3fc   :  { %v3279_v39 = vpop.f32.mrf.mxu0  ;;  %v3225_v56 = vpop.f32.mrf.mxu3 }
 0x3fd   :  { %v3309_v28 = vadd.f32 %v3308_v21, %v3279_v39  ;;  %v3418_v40 = vpop.f32.mrf.mxu1 }
 0x3fe   :  { %3693 = vmatmul.f32.gmra.mxu2 %v8821_v37 }
 0x3ff   :  { %3751 = vmatmul.f32.gmra.mxu0 %v8821_v37 }
 0x400   :  { %4292 = vmatmul.msk.f32.gmra.mxu1 %vm2983_vm8, %v8827_v54 }
 0x401   :  { %4288 = vmatmul.msk.f32.gmra.mxu3 %vm2983_vm8, %v8827_v54  ;;  %v3193_v14 = vpop.f32.mrf.mxu2 }
 0x402   :  { %v8975_v51 = vadd.f32 %v3222_v46, %v3193_v14 }
 0x404   :  { %v3360_v38 = vpop.f32.mrf.mxu3 }
 0x405   :  { %v3282_v23 = vpop.f32.mrf.mxu0 }
 0x406   :  { %3696 = vmatmul.f32.gmra.mxu2 %v8847_v4  ;;  %v3312_v6 = vadd.f32 %v3311_v8, %v3282_v23 }
 0x407   :  { %3754 = vmatmul.f32.gmra.mxu0 %v8847_v4 }
 0x408   :  { %4293 = vmatmul.msk.f32.gmra.mxu1 %vm2983_vm8, %v8853_v11  ;;  %v3421_v54 = vpop.f32.mrf.mxu1 }
 0x409   :  { %4289 = vmatmul.msk.f32.gmra.mxu3 %vm2983_vm8, %v8853_v11 }
 0x40a   :  { %v3196_v37 = vpop.f32.mrf.mxu2 }
 0x40b   :  { %v8983_v0 = vadd.f32 %v3225_v56, %v3196_v37 }
 0x40d   :  { %v3363_v59 = vpop.f32.mrf.mxu3 }
 0x40e   :  { %3699 = vmatmul.f32.gmra.mxu2 %v8873_v13 }
 0x40f   :  { %3757 = vmatmul.f32.gmra.mxu0 %v8873_v13  ;;  %v3389_v53 = vpop.f32.mrf.mxu0 }
 0x410   :  { %v3419_v33 = vadd.f32 %v3418_v40, %v3389_v53 }
 0x412   :  { %v3424_v9 = vpop.f32.mrf.mxu1 }
 0x414   :  { %v3331_v55 = vpop.f32.mrf.mxu2 }
 0x415   :  { %v3361_v4 = vadd.f32 %v3360_v38, %v3331_v55 }
 0x417   :  { %v3366_v11 = vpop.f32.mrf.mxu3 }
 0x418   :  { %v3392_v47 = vpop.f32.mrf.mxu0 }
 0x419   :  { %v3422_v26 = vadd.f32 %v3421_v54, %v3392_v47  ;;  %v3101_v47 = vadd.f32 %v8815_v30, %v8859_v22  ;;  %v10280_v22 = vld [vmem:[#allocation126_spill] sm:$0xff] }
 0x41a   :  { %v3427_v24 = vpop.f32.mrf.mxu1 }
 0x41d   :  { %v3334_v25 = vpop.f32.mrf.mxu2 }
 0x41e   :  { %v8987_v20 = vadd.f32 %v3363_v59, %v3334_v25 }
 0x41f   :  { %v3369_v13 = vpop.f32.mrf.mxu3 }
 0x420   :  { %v3395_v2 = vpop.f32.mrf.mxu0 }
 0x421   :  { %v8989_v29 = vadd.f32 %v3424_v9, %v3395_v2 }
 0x422   :  { %v3546_v63 = vpop.f32.mrf.mxu1 }
 0x425   :  { %v3337_v15 = vpop.f32.mrf.mxu2 }
 0x426   :  { %v8991_v35 = vadd.f32 %v3366_v11, %v3337_v15  ;;  %v10278_v15 = vld [vmem:[#allocation106_spill] sm:$0xff] }
 0x427   :  { %v3476_v27 = vpop.f32.mrf.mxu3 }
 0x429   :  { %v3398_v7 = vpop.f32.mrf.mxu0 }
 0x42a   :  { %v8993_v42 = vadd.f32 %v3427_v24, %v3398_v7 }
 0x42e   :  { %v3340_v17 = vpop.f32.mrf.mxu2 }
 0x42f   :  { %v8995_v32 = vadd.f32 %v3369_v13, %v3340_v17  ;;  %v10279_v13 = vld [vmem:[#allocation103_spill] sm:$0xff] }
 0x430   :  { %v3043_v7 = vadd.f32 %v10279_v13, %v10278_v15 }
 0x433   :  { %v3517_v1 = vpop.f32.mrf.mxu0 }
 0x434   :  { %v3547_v58 = vadd.f32 %v3546_v63, %v3517_v1 }
 0x435   :  { %v3549_v62 = vpop.f32.mrf.mxu1 }
 0x436   :  { %v8998_v52 = vadd.f32 %v3547_v58, %v8943_v19 }
 0x438   :  { %v3447_v60 = vpop.f32.mrf.mxu2 }
 0x439   :  { %v9000_v49 = vadd.f32 %v3476_v27, %v3447_v60 }
 0x43c   :  { %v3520_v36 = vpop.f32.mrf.mxu0  ;;  %v3479_v21 = vpop.f32.mrf.mxu3 }
 0x43d   :  { %v3550_v48 = vadd.f32 %v3549_v62, %v3520_v36  ;;  %v3552_v12 = vpop.f32.mrf.mxu1 }
 0x43f   :  { %v9003_v46 = vadd.f32 %v3550_v48, %v8959_v10 }
 0x441   :  { %v3450_v41 = vpop.f32.mrf.mxu2 }
 0x442   :  { %v9005_v8 = vadd.f32 %v3479_v21, %v3450_v41  ;;  %v10281_v21 = vld [vmem:[#allocation45_spill] sm:$0xff] }
 0x443   :  { %v3046_v48 = vadd.f32 %v10281_v21, %v10280_v22 }
 0x444   :  { %v3523_v39 = vpop.f32.mrf.mxu0  ;;  %v3482_v56 = vpop.f32.mrf.mxu3 }
 0x445   :  { %v3553_v14 = vadd.f32 %v3552_v12, %v3523_v39  ;;  %v3555_v40 = vpop.f32.mrf.mxu1 }
 0x447   :  { %v9007_v23 = vadd.f32 %v3553_v14, %v3309_v28 }
 0x449   :  { %v3453_v19 = vpop.f32.mrf.mxu2 }
 0x44a   :  { %v9009_v37 = vadd.f32 %v3482_v56, %v3453_v19 }
 0x44c   :  { %v3526_v38 = vpop.f32.mrf.mxu0  ;;  %v3485_v54 = vpop.f32.mrf.mxu3 }
 0x44d   :  { %v3556_v53 = vadd.f32 %v3555_v40, %v3526_v38  ;;  %v3662_v55 = vpop.f32.mrf.mxu1 }
 0x44f   :  { %v9011_v59 = vadd.f32 %v3556_v53, %v3312_v6 }
 0x451   :  { %v3456_v10 = vpop.f32.mrf.mxu2 }
 0x452   :  { %v9013_v9 = vadd.f32 %v3485_v54, %v3456_v10 }
 0x454   :  { %v3633_v25 = vpop.f32.mrf.mxu0  ;;  %v3604_v11 = vpop.f32.mrf.mxu3 }
 0x455   :  { %v3634_v2 = vadd.f32 %v3633_v25, %v3101_v47  ;;  %v3665_v28 = vpop.f32.mrf.mxu1 }
 0x457   :  { %v3663_v24 = vadd.f32 %v3662_v55, %v3634_v2 }
 0x459   :  { %v9019_v63 = vadd.f32 %v3663_v24, %v3419_v33  ;;  %v3575_v17 = vpop.f32.mrf.mxu2 }
 0x45a   :  { %v3576_v27 = vadd.f32 %v3575_v17, %v3043_v7 }
 0x45c   :  { %v3605_v6 = vadd.f32 %v3604_v11, %v3576_v27  ;;  %v3636_v1 = vpop.f32.mrf.mxu0  ;;  %v3607_v58 = vpop.f32.mrf.mxu3 }
 0x45d   :  { %v3637_v62 = vadd.f32 %v3636_v1, %v8890_v31  ;;  %v3668_v60 = vpop.f32.mrf.mxu1 }
 0x45e   :  { %v9022_v36 = vadd.f32 %v3605_v6, %v3361_v4 }
 0x45f   :  { %v3666_v30 = vadd.f32 %v3665_v28, %v3637_v62 }
 0x461   :  { %v9026_v12 = vadd.f32 %v3666_v30, %v3422_v26  ;;  %v3578_v41 = vpop.f32.mrf.mxu2 }
 0x462   :  { %v3579_v39 = vadd.f32 %v3578_v41, %v3046_v48 }
 0x464   :  { %v3608_v33 = vadd.f32 %v3607_v58, %v3579_v39  ;;  %v3639_v56 = vpop.f32.mrf.mxu0  ;;  %v9028_v14 = vpop.f32.mrf.mxu3 }
 0x465   :  { %v3640_v40 = vadd.f32 %v3639_v56, %v8909_v44  ;;  %v3671_v19 = vpop.f32.mrf.mxu1 }
 0x466   :  { %v9032_v31 = vadd.f32 %v3608_v33, %v8987_v20 }
 0x467   :  { %v3669_v4 = vadd.f32 %v3668_v60, %v3640_v40 }
 0x469   :  { %v9035_v38 = vadd.f32 %v3669_v4, %v8989_v29  ;;  %v3581_v54 = vpop.f32.mrf.mxu2  ;;  %v10282_v4 = vld [vmem:[#allocation108_spill] sm:$0xff] }
 0x46c   :  { %v3642_v53 = vpop.f32.mrf.mxu0  ;;  %v3613_v26 = vpop.f32.mrf.mxu3 }
 0x46d   :  { %v3643_v55 = vadd.f32 %v3642_v53, %v8930_v3  ;;  %v3778_v10 = vpop.f32.mrf.mxu1 }
 0x46f   :  { %v3672_v47 = vadd.f32 %v3671_v19, %v3643_v55 }
 0x471   :  { %v3807_v25 = vadd.f32 %v3672_v47, %v8993_v42  ;;  %v3584_v11 = vpop.f32.mrf.mxu2 }
 0x474   :  { %v3749_v2 = vpop.f32.mrf.mxu0  ;;  %v3720_v44 = vpop.f32.mrf.mxu3 }
 0x475   :  { %v3781_v28 = vpop.f32.mrf.mxu1  ;;  %v3750_v39 = vadd.f32 %v3749_v2, %v8956_v50  ;;  %v3052_v50 = vadd.f32 %v8755_v45, %v8805_v5  ;;  %v3815_v5 = vpop.permute.xlu2 %3814 }
 0x477   :  { %v3585_v53 = vadd.f32 %v3584_v11, %v3052_v50 }
 0x479   :  { %v3691_v24 = vpop.f32.mrf.mxu2 }
 0x47a   :  { %v3692_v20 = vadd.f32 %v3691_v24, %v8840_v43 }
 0x47c   :  { %v3721_v15 = vadd.f32 %v3720_v44, %v3692_v20  ;;  %v3752_v13 = vpop.f32.mrf.mxu0  ;;  %v3723_v29 = vpop.f32.mrf.mxu3 }
 0x47d   :  { %v3784_v3 = vpop.f32.mrf.mxu1 }
 0x47e   :  { %v3793_v7 = vadd.f32 %v3721_v15, %v9000_v49 }
 0x481   :  { %v3694_v17 = vpop.f32.mrf.mxu2 }
 0x482   :  { %v3695_v27 = vadd.f32 %v3694_v17, %v8876_v16  ;;  %v3753_v16 = vadd.f32 %v3752_v13, %v8967_v18 }
 0x484   :  { %v3724_v6 = vadd.f32 %v3723_v29, %v3695_v27  ;;  %v3755_v1 = vpop.f32.mrf.mxu0  ;;  %v3726_v58 = vpop.f32.mrf.mxu3  ;;  %v3782_v40 = vadd.f32 %v3781_v28, %v3753_v16 }
 0x485   :  { %v3787_v43 = vpop.f32.mrf.mxu1  ;;  %v3756_v21 = vadd.f32 %v3755_v1, %v8975_v51 }
 0x486   :  { %v3798_v42 = vadd.f32 %v3724_v6, %v9005_v8  ;;  %v3810_v8 = vld [vmem:[%s9077_s4] sm:$0x77]  ;;  %s4354_s4 = smov [#allocation2]  }
 0x487   :  { %v3785_v33 = vadd.f32 %v3784_v3, %v3756_v21  ;;  %3818 = vst [vmem:[#allocation1] ss:$2 sm:$0xff] %v3810_v8  ;;  %s3871_s22 = sshll.u32 %s4354_s4, 4  ;;  %s3872_s22 = int_to_ptr.vmem [resolvable:$true] %s3871_s22 }
 0x489   :  { %v3697_v62 = vpop.f32.mrf.mxu2 }
 0x48a   :  { %v3698_v60 = vadd.f32 %v3697_v62, %v8898_v57 }
 0x48c   :  { %v3727_v30 = vadd.f32 %v3726_v58, %v3698_v60  ;;  %v3758_v22 = vpop.f32.mrf.mxu0  ;;  %v3729_v56 = vpop.f32.mrf.mxu3 }
 0x48d   :  { %v3759_v48 = vadd.f32 %v3758_v22, %v8983_v0 }
 0x48e   :  { %v3803_v49 = vadd.f32 %v3727_v30, %v9009_v37  ;;  %v3779_v37 = vadd.f32 %v3778_v10, %v3750_v39  ;;  %v3820_v19 = vld.sshfl [vmem:[#allocation1 + $0x8] sm:$0xff pattern:$0x75316420]  ;;  %v3614_v10 = vadd.f32 %v3613_v26, %v3585_v53 }
 0x48f   :  { %v3788_v41 = vadd.f32 %v3787_v43, %v3759_v48 }
 0x490   :  { %v3806_v47 = vadd.f32 %v3614_v10, %v8995_v32 }
 0x491   :  { %3857 = vmatpush.msrb.mxu3 %v3788_v41  ;;  %v3700_v57 = vpop.f32.mrf.mxu2 }
 0x492   :  { %v3701_v51 = vadd.f32 %v3700_v57, %v8922_v61  ;;  %v3049_v61 = vadd.f32 %v10282_v4, %v8775_v34  ;;  %v3819_v34 = vld.sshfl [vmem:[#allocation1] sm:$0xff pattern:$0x75316420] }
 0x493   :  { %3858 = vmatpush.msrb.mxu3 %v3785_v33 }
 0x494   :  { %v3730_v0 = vadd.f32 %v3729_v56, %v3701_v51  ;;  %v3582_v55 = vadd.f32 %v3581_v54, %v3049_v61 }
 0x495   :  { %3859 = vmatpush.msrb.mxu3 %v3782_v40 }
 0x496   :  { %v3808_v18 = vadd.f32 %v3730_v0, %v9013_v9  ;;  %v3611_v9 = vadd.f32 %v9028_v14, %v3582_v55 }
 0x497   :  { %3860 = vmatpush.msrb.mxu3 %v3779_v37 }
 0x498   :  { %3825 = vmatpush.msrb.mxu2 %v3808_v18  ;;  %4294 = vmatmul.msk.f32.vlgmr.msrb.gmra.mxu3 %vm3822_vm9, %v3820_v19  ;;  %v3801_v45 = vadd.f32 %v3611_v9, %v8991_v35 }
 0x49a   :  { %3826 = vmatpush.msrb.mxu2 %v3803_v49 }
 0x49c   :  { %3827 = vmatpush.msrb.mxu2 %v3798_v42 }
 0x49e   :  { %3828 = vmatpush.msrb.mxu2 %v3793_v7 }
 0x4a0   :  { %3829 = vmatpush.msrb.mxu2 %v3807_v25 }
 0x4a2   :  { %3830 = vmatpush.msrb.mxu2 %v9035_v38 }
 0x4a4   :  { %3831 = vmatpush.msrb.mxu2 %v9026_v12 }
 0x4a6   :  { %3832 = vmatpush.msrb.mxu2 %v9019_v63 }
 0x4a8   :  { %3833 = vmatpush.msrb.mxu2 %v3806_v47 }
 0x4aa   :  { %3834 = vmatpush.msrb.mxu2 %v3801_v45 }
 0x4ac   :  { %3835 = vmatpush.msrb.mxu2 %v9032_v31 }
 0x4ae   :  { %3836 = vmatpush.msrb.mxu2 %v9022_v36 }
 0x4b0   :  { %3837 = vmatpush.msrb.mxu2 %v9011_v59 }
 0x4b2   :  { %3838 = vmatpush.msrb.mxu2 %v9007_v23 }
 0x4b4   :  { %3839 = vmatpush.msrb.mxu2 %v9003_v46 }
 0x4b6   :  { %3840 = vmatpush.msrb.mxu2 %v8998_v52 }
 0x4b7   :  { %3841 = vmatmul.f32.vlgmr.msrb.gmra.mxu2 %v3819_v34 }
 0x51b   :  { %v3862_v63 = vpop.f32.mrf.mxu3 }
 0x53a   :  { %v3842_v32 = vpop.f32.mrf.mxu2 }
 0x53b   :  { %v3843_v35 = vadd.f32 %v3842_v32, %v3815_v5 }
 0x53d   :  { %v3863_v36 = vadd.f32 %v3862_v63, %v3843_v35 }
 0x53f   :  { %3865 = vst [vmem:[#allocation2] sm:$0x7] %v3863_v36 }
 0x540   :  { %3876 = dma.vmem_to_hbm [thread:$0]  %s3872_s22, 64, %s3874_s25, [#allocation3]  }
 0x541   :  { %4351 = dma.done.wait [#allocation3], 64  }
 0x542   :  { %4352 = vsyncadd [#allocation3], 4294967232 }
 0x543   :  { %3881 = vsyncpa [#allocation3], 1 }

</bundles_post_ra>
